<compile_context>
chip_gen: v7x
topology: tpu7x:2x2x1
jax: 0.10.0
libtpu: 0.0.40
codegen_flags: <defaults>
</compile_context>

<pallas_src>
import functools

import numpy as np
import jax
import jax.numpy as jnp
from jax import lax
from jax.experimental import pallas as pl
from jax.experimental.pallas import tpu as pltpu

_EPS = 1e-5
_NEG = -1e30   # "minus infinity" padding that stays NaN-free under max/exp/log


def _round_up(x, m):
    return ((x + m - 1) // m) * m


# ----------------------------------------------------------------------------
# Fused per-iteration Pallas kernel
# ----------------------------------------------------------------------------
def _fused_iter_kernel(beta_ref, alpha_ref, ignt_ref,       # SMEM (B,) scalars
                       pts_ref,                             # VMEM (bt, J+KSP, 6)
                       w1_ref, b1_ref, w2_ref, b2_ref,      # MLP params (VMEM)
                       gamma_ref, perm_ref,                 # VMEM outs (bt, J, KSP)
                       la_ref,                              # VMEM scratch (bt, JP8, KSP)
                       *, bt, J, K, KSP, n_sk_iters):
    P = J + KSP
    JP8 = la_ref.shape[1]
    base = pl.program_id(0) * bt

    # ---- per-point feature MLP: all bt items' src+ref in ONE matmul ----
    pts = pts_ref[...].reshape(bt * P, 6)
    h = jnp.dot(pts, w1_ref[...], preferred_element_type=jnp.float32) + b1_ref[...]
    h = jnp.maximum(h, 0.0)
    feat = jnp.dot(h, w2_ref[...], preferred_element_type=jnp.float32) + b2_ref[...]
    feat = feat.reshape(bt, P, feat.shape[-1])
    fs = feat[:, :J, :]          # (bt, J, C)
    fr = feat[:, J:, :]          # (bt, KSP, C)  (points >= K are zero padding)

    # ---- match_features (squared L2), lane-dense (KSP multiple of 128) ----
    inner = jnp.einsum('bjc,bkc->bjk', fs, fr,
                       preferred_element_type=jnp.float32)              # (bt,J,KSP)
    dist = (-2.0 * inner
            + jnp.sum(fs * fs, axis=2, keepdims=True)
            + jnp.sum(fr * fr, axis=2)[:, None, :])

    # ---- compute_affinity + slack-padded Sinkhorn init (slice stores) ----
    la_ref[...] = jnp.full((bt, JP8, KSP), _NEG, jnp.float32)   # padding rows/cols
    col2 = lax.broadcasted_iota(jnp.int32, (J, KSP), 1)
    colr = lax.broadcasted_iota(jnp.int32, (1, KSP), 1)
    for i in range(bt):                                   # static unroll (bt small)
        beta = beta_ref[base + i]
        alpha = alpha_ref[base + i]
        ign = ignt_ref[base + i]
        aff = -beta * (dist[i] - alpha)                   # (J, KSP)
        # gamma = exp(affinity) BEFORE Sinkhorn, unclamped exactly like the
        # torch reference (`perm_matrices_init`). Padding lanes are garbage and
        # are sliced off in the wrapper.
        gamma_ref[i] = jnp.exp(aff)
        la_i = la_ref.at[i]
        la_i[:J, :] = jnp.where(col2 < K, aff,
                                jnp.where(col2 == K, ign, _NEG))
        la_i[J:J + 1, :] = jnp.where(colr <= K, ign, _NEG)    # slack row

    # ---- Sinkhorn (log domain; kept because exp(affinity) can overflow) ----
    row_ids = lax.broadcasted_iota(jnp.int32, (bt, JP8, KSP), 1)
    col_ids = lax.broadcasted_iota(jnp.int32, (bt, JP8, KSP), 2)

    def body(_, la):
        # row normalization (rows < J) over all K+1 real columns; padding
        # columns sit at _NEG so they add ~0 to the logsumexp.
        m = jnp.max(la, axis=2, keepdims=True)
        lse = m + jnp.log(jnp.sum(jnp.exp(la - m), axis=2, keepdims=True))
        la = jnp.where(row_ids < J, la - lse, la)
        # column normalization (cols < K) over all J+1 real rows.
        m = jnp.max(la, axis=1, keepdims=True)
        lse = m + jnp.log(jnp.sum(jnp.exp(la - m), axis=1, keepdims=True))
        la = jnp.where(col_ids < K, la - lse, la)
        return la

    la = lax.fori_loop(0, n_sk_iters, body, la_ref[...], unroll=True)

    # Lane-dense store; slack column / padding lanes sliced off in the wrapper.
    # The torch one2one_mask (argmax != K+1) is vacuously all-True, so the
    # per-batch row selection in the reference is an identity.
    perm_ref[...] = jnp.exp(la[:, :J, :])


def fused_iteration(points_cat, beta, alpha, ignore_t, params, num_sk_iter,
                    J, K, KSP, batch_tile):
    """One INOPNet iteration hot path (features + affinity + Sinkhorn) fused."""
    B = points_cat.shape[0]
    P = J + KSP
    H = params['w1'].shape[1]
    C = params['w2'].shape[1]
    bt = batch_tile
    JP8 = _round_up(J + 1, 8)
    kernel = functools.partial(_fused_iter_kernel, bt=bt, J=J, K=K, KSP=KSP,
                               n_sk_iters=num_sk_iter)
    gamma, perm = pl.pallas_call(
        kernel,
        out_shape=(
            jax.ShapeDtypeStruct((B, J, KSP), jnp.float32),   # gamma (pre-sinkhorn)
            jax.ShapeDtypeStruct((B, J, KSP), jnp.float32),   # perm matrix
        ),
        grid=(B // bt,),
        in_specs=[
            pl.BlockSpec(memory_space=pltpu.MemorySpace.SMEM),   # beta (B,)
            pl.BlockSpec(memory_space=pltpu.MemorySpace.SMEM),   # alpha (B,)
            pl.BlockSpec(memory_space=pltpu.MemorySpace.SMEM),   # ignore_t (B,)
            pl.BlockSpec((bt, P, 6), lambda g: (g, 0, 0)),       # src|ref points
            pl.BlockSpec((6, H), lambda g: (0, 0)),
            pl.BlockSpec((1, H), lambda g: (0, 0)),
            pl.BlockSpec((H, C), lambda g: (0, 0)),
            pl.BlockSpec((1, C), lambda g: (0, 0)),
        ],
        out_specs=[
            pl.BlockSpec((bt, J, KSP), lambda g: (g, 0, 0)),
            pl.BlockSpec((bt, J, KSP), lambda g: (g, 0, 0)),
        ],
        scratch_shapes=[pltpu.VMEM((bt, JP8, KSP), jnp.float32)],
        compiler_params=pltpu.CompilerParams(
            dimension_semantics=("parallel",),        # shards batch on v7x 2 TCs
            vmem_limit_bytes=48 * 1024 * 1024),       # above v5e/v7x scoped defaults
    )(beta.astype(jnp.float32), alpha.astype(jnp.float32),
      ignore_t.astype(jnp.float32),
      points_cat, params['w1'], params['b1'], params['w2'], params['b2'])
    return gamma, perm


# ----------------------------------------------------------------------------
# Plain-JAX glue (tiny ops: weights net, rigid transform / SVD, se3)
# ----------------------------------------------------------------------------
def weights_net(xyz_src, xyz_ref, wp, bp):
    """Surrogate ParameterPredictionNet -> (beta, alpha, ignore_t), each (B,)."""
    pooled = jnp.concatenate(
        [jnp.mean(xyz_src, axis=1), jnp.mean(xyz_ref, axis=1)], axis=-1)   # (B, 6)
    o = pooled @ wp + bp                                                   # (B, 3)
    return jax.nn.softplus(o[:, 0]), jax.nn.softplus(o[:, 1]), o[:, 2]


def compute_rigid_transform(a, b, weights):
    """(B,M,3),(B,M,3),(B,M) -> (B,3,4); matches the torch reference."""
    wn = weights[..., None] / (jnp.sum(weights[..., None], axis=1, keepdims=True)
                               + _EPS)
    centroid_a = jnp.sum(a * wn, axis=1)
    centroid_b = jnp.sum(b * wn, axis=1)
    a_c = a - centroid_a[:, None, :]
    b_c = b - centroid_b[:, None, :]
    cov = jnp.einsum('bji,bjk->bik', a_c, b_c * wn)                       # (B,3,3)
    u, _, vh = jnp.linalg.svd(cov)            # torch.svd returns V; jnp returns Vh
    v = jnp.swapaxes(vh, -1, -2)
    ut = jnp.swapaxes(u, -1, -2)
    rot_pos = v @ ut
    v_neg = v.at[:, :, 2].multiply(-1.0)
    rot_neg = v_neg @ ut
    rot = jnp.where(jnp.linalg.det(rot_pos)[:, None, None] > 0, rot_pos, rot_neg)
    # TODO(synk): torch asserts det(rot) > 0 here; dropped to avoid a
    # per-iteration device->host sync (the reflection fix above covers it).
    translation = -rot @ centroid_a[:, :, None] + centroid_b[:, :, None]
    return jnp.concatenate([rot, translation], axis=2)                   # (B,3,4)


def se3_transform(transform, xyz, norm):
    rot = transform[:, :, :3]
    t = transform[:, :, 3]
    xyz_t = jnp.einsum('bij,bnj->bni', rot, xyz) + t[:, None, :]
    norm_t = jnp.einsum('bij,bnj->bni', rot, norm)
    return xyz_t, norm_t


@functools.partial(jax.jit,
                   static_argnames=('num_sk_iter', 'K', 'KSP', 'batch_tile'))
def _iteration_step(xyz_src, norm_src, xyz_src_t, norm_src_t,
                    points_ref_pad, xyz_ref, params,
                    num_sk_iter, K, KSP, batch_tile):
    J = xyz_src.shape[1]
    beta, alpha, ignore_t = weights_net(xyz_src_t, xyz_ref,
                                        params['wp'], params['bp'])
    points_src_t = jnp.concatenate([xyz_src_t, norm_src_t], axis=-1)      # (B,J,6)
    points_cat = jnp.concatenate([points_src_t, points_ref_pad], axis=1)  # (B,J+KSP,6)

    gamma_p, perm_p = fused_iteration(points_cat, beta, alpha, ignore_t,
                                      params, num_sk_iter, J, K, KSP, batch_tile)
    gamma = gamma_p[:, :, :K]
    perm = perm_p[:, :, :K]

    # Rigid statistics + transform: tiny (B x J x 3 / B x 3 x 3) work, done in XLA
    # instead of lane-width-3 kernel stores.
    weights = jnp.sum(perm, axis=2)                                       # (B, J)
    wref = (perm @ xyz_ref) / (weights[..., None] + _EPS)                 # (B, J, 3)
    transform = compute_rigid_transform(xyz_src, wref, weights)
    xyz_src_t_new, norm_src_t_new = se3_transform(transform, xyz_src, norm_src)
    return (transform, gamma, perm, wref, beta, alpha,
            xyz_src_t_new, norm_src_t_new)


def inopnet_forward(points_src, points_ref, params, num_iter=1, num_sk_iter=5,
                    batch_tile=None):
    B, J, _ = points_src.shape
    K = points_ref.shape[1]
    KSP = _round_up(K + 1, 128)                  # slack col + lane padding to 128
    if batch_tile is None:
        # keep >= 2 grid steps so the parallel batch axis still feeds v7x's 2 TCs
        batch_tile = B // 2 if (B >= 2 and B % 2 == 0) else 1
    assert B % batch_tile == 0

    xyz_src, norm_src = points_src[:, :, :3], points_src[:, :, 3:6]
    xyz_ref = points_ref[:, :, :3]
    # Pad ref points ONCE so all in-kernel tiles / output stores are lane-dense.
    points_ref_pad = jnp.pad(points_ref, ((0, 0), (0, KSP - K), (0, 0)))

    xyz_src_t, norm_src_t = xyz_src, norm_src
    transforms = []
    all_gamma, all_perm, all_wref, all_beta, all_alpha = [], [], [], [], []

    for _ in range(num_iter):
        (transform, gamma, perm, wref, beta, alpha,
         xyz_src_t, norm_src_t) = _iteration_step(
            xyz_src, norm_src, xyz_src_t, norm_src_t,
            points_ref_pad, xyz_ref, params,
            num_sk_iter=num_sk_iter, K=K, KSP=KSP, batch_tile=batch_tile)
        transforms.append(transform)
        all_gamma.append(gamma)
        all_perm.append(perm)
        all_wref.append(wref)
        all_beta.append(beta)
        all_alpha.append(alpha)

    endpoints = {
        'perm_matrices_init': all_gamma,
        'perm_matrices': all_perm,
        'weighted_ref': all_wref,
        # single device->host transfer after the loop (no per-iteration syncs)
        'beta': np.asarray(jax.device_get(jnp.stack(all_beta, axis=0))),
        'alpha': np.asarray(jax.device_get(jnp.stack(all_alpha, axis=0))),
    }
    return transforms, endpoints


# ----------------------------------------------------------------------------
# Main
# ----------------------------------------------------------------------------
if __name__ == "__main__":
    B, J, K = 2, 8, 8
    HIDDEN, FEAT_DIM = 32, 32

    key = jax.random.PRNGKey(0)
    ks = jax.random.split(key, 8)

    points_src = jax.random.normal(ks[0], (B, J, 6), dtype=jnp.float32)
    points_ref = jax.random.normal(ks[1], (B, K, 6), dtype=jnp.float32)

    params = {
        'w1': 0.5 * jax.random.normal(ks[2], (6, HIDDEN), dtype=jnp.float32),
        'b1': 0.1 * jax.random.normal(ks[3], (1, HIDDEN), dtype=jnp.float32),
        'w2': 0.5 * jax.random.normal(ks[4], (HIDDEN, FEAT_DIM), dtype=jnp.float32),
        'b2': 0.1 * jax.random.normal(ks[5], (1, FEAT_DIM), dtype=jnp.float32),
        'wp': 0.5 * jax.random.normal(ks[6], (6, 3), dtype=jnp.float32),
        'bp': 0.1 * jax.random.normal(ks[7], (3,), dtype=jnp.float32),
    }

    transforms, endpoints = inopnet_forward(points_src, points_ref, params,
                                            num_iter=1, num_sk_iter=5)
    transform = jax.block_until_ready(transforms[-1])
    assert transform.shape == (B, 3, 4)
    assert endpoints['perm_matrices'][-1].shape == (B, J, K)
    jax.block_until_ready(endpoints['perm_matrices'][-1])
    jax.block_until_ready(endpoints['weighted_ref'][-1])
    print("KERNEL_OK")
</pallas_src>

<mosaic_0001>
module attributes {stable_mosaic.version = 11 : i64} {
  func.func @_fused_iter_kernel(%arg0: i32, %arg1: memref<2xf32, #tpu.memory_space<smem>>, %arg2: memref<2xf32, #tpu.memory_space<smem>>, %arg3: memref<2xf32, #tpu.memory_space<smem>>, %arg4: memref<1x136x6xf32, #tpu.memory_space<vmem>>, %arg5: memref<6x32xf32, #tpu.memory_space<vmem>>, %arg6: memref<1x32xf32, #tpu.memory_space<vmem>>, %arg7: memref<32x32xf32, #tpu.memory_space<vmem>>, %arg8: memref<1x32xf32, #tpu.memory_space<vmem>>, %arg9: memref<1x8x128xf32, #tpu.memory_space<vmem>>, %arg10: memref<1x8x128xf32, #tpu.memory_space<vmem>>, %arg11: memref<1x16x128xf32, #tpu.memory_space<vmem>>) attributes {dimension_semantics = [#tpu.dimension_semantics<parallel>], iteration_bounds = array<i64: 2>, scalar_prefetch = 0 : i64, scratch_operands = 1 : i64, tpu.core_type = #tpu.core_type<tc>, window_params = [{transform_indices = @transform_0, window_bounds = array<i64: 2>}, {transform_indices = @transform_1, window_bounds = array<i64: 2>}, {transform_indices = @transform_2, window_bounds = array<i64: 2>}, {transform_indices = @transform_3, window_bounds = array<i64: 1, 136, 6>}, {pipeline_mode = #tpu.pipeline_mode<synchronous>, transform_indices = @transform_4, window_bounds = array<i64: 6, 32>}, {pipeline_mode = #tpu.pipeline_mode<synchronous>, transform_indices = @transform_5, window_bounds = array<i64: 1, 32>}, {pipeline_mode = #tpu.pipeline_mode<synchronous>, transform_indices = @transform_6, window_bounds = array<i64: 32, 32>}, {pipeline_mode = #tpu.pipeline_mode<synchronous>, transform_indices = @transform_7, window_bounds = array<i64: 1, 32>}, {transform_indices = @transform_8, window_bounds = array<i64: 1, 8, 128>}, {transform_indices = @transform_9, window_bounds = array<i64: 1, 8, 128>}]} {
    %c1_i32 = arith.constant 1 : i32
    %0 = arith.muli %arg0, %c1_i32 : i32
    %c0 = arith.constant 0 : index
    %c0_0 = arith.constant 0 : index
    %c0_1 = arith.constant 0 : index
    %1 = vector.load %arg4[%c0, %c0_0, %c0_1] : memref<1x136x6xf32, #tpu.memory_space<vmem>>, vector<1x136x6xf32>
    %2 = vector.shape_cast %1 : vector<1x136x6xf32> to vector<136x6xf32>
    %c0_2 = arith.constant 0 : index
    %c0_3 = arith.constant 0 : index
    %3 = vector.load %arg5[%c0_2, %c0_3] : memref<6x32xf32, #tpu.memory_space<vmem>>, vector<6x32xf32>
    %cst = arith.constant dense<0.000000e+00> : vector<136x32xf32>
    %4 = tpu.matmul %2, %3, %cst {dimension_numbers = #tpu.dot_dimension_numbers<[1], [0], [0], [1], [0, 0, 1, 1], [], []>} : vector<136x6xf32>, vector<6x32xf32>, vector<136x32xf32> -> vector<136x32xf32>
    %c0_4 = arith.constant 0 : index
    %c0_5 = arith.constant 0 : index
    %5 = vector.load %arg6[%c0_4, %c0_5] : memref<1x32xf32, #tpu.memory_space<vmem>>, vector<1x32xf32>
    %6 = vector.broadcast %5 : vector<1x32xf32> to vector<136x32xf32>
    %7 = arith.addf %4, %6 : vector<136x32xf32>
    %cst_6 = arith.constant 0.000000e+00 : f32
    %8 = vector.broadcast %cst_6 : f32 to vector<136x32xf32>
    %9 = arith.maximumf %7, %8 : vector<136x32xf32>
    %c0_7 = arith.constant 0 : index
    %c0_8 = arith.constant 0 : index
    %10 = vector.load %arg7[%c0_7, %c0_8] : memref<32x32xf32, #tpu.memory_space<vmem>>, vector<32x32xf32>
    %cst_9 = arith.constant dense<0.000000e+00> : vector<136x32xf32>
    %11 = tpu.matmul %9, %10, %cst_9 {dimension_numbers = #tpu.dot_dimension_numbers<[1], [0], [0], [1], [0, 0, 1, 1], [], []>} : vector<136x32xf32>, vector<32x32xf32>, vector<136x32xf32> -> vector<136x32xf32>
    %c0_10 = arith.constant 0 : index
    %c0_11 = arith.constant 0 : index
    %12 = vector.load %arg8[%c0_10, %c0_11] : memref<1x32xf32, #tpu.memory_space<vmem>>, vector<1x32xf32>
    %13 = vector.broadcast %12 : vector<1x32xf32> to vector<136x32xf32>
    %14 = arith.addf %11, %13 : vector<136x32xf32>
    %15 = vector.shape_cast %14 : vector<136x32xf32> to vector<1x136x32xf32>
    %16 = vector.extract_strided_slice %15 {offsets = [0, 0, 0], sizes = [1, 8, 32], strides = [1, 1, 1]} : vector<1x136x32xf32> to vector<1x8x32xf32>
    %17 = vector.extract_strided_slice %15 {offsets = [0, 8, 0], sizes = [1, 128, 32], strides = [1, 1, 1]} : vector<1x136x32xf32> to vector<1x128x32xf32>
    "tpu.trace_start"() <{level = 10 : i32, message = "bjc,bkc->bjk"}> : () -> ()
    %cst_12 = arith.constant dense<0.000000e+00> : vector<1x8x128xf32>
    %18 = tpu.matmul %16, %17, %cst_12 {dimension_numbers = #tpu.dot_dimension_numbers<[2], [2], [1], [1], [0, 0, 0, 1, 1, 1], [0], [0]>} : vector<1x8x32xf32>, vector<1x128x32xf32>, vector<1x8x128xf32> -> vector<1x8x128xf32>
    "tpu.trace_stop"() : () -> ()
    %cst_13 = arith.constant -2.000000e+00 : f32
    %19 = vector.broadcast %cst_13 : f32 to vector<1x8x128xf32>
    %20 = arith.mulf %19, %18 : vector<1x8x128xf32>
    %21 = arith.mulf %16, %16 : vector<1x8x32xf32>
    %cst_14 = arith.constant dense<0.000000e+00> : vector<1x8xf32>
    %22 = vector.multi_reduction <add>, %21, %cst_14 [2] : vector<1x8x32xf32> to vector<1x8xf32>
    %23 = vector.shape_cast %22 : vector<1x8xf32> to vector<1x8x1xf32>
    %24 = vector.broadcast %23 : vector<1x8x1xf32> to vector<1x8x128xf32>
    %25 = arith.addf %20, %24 : vector<1x8x128xf32>
    %26 = arith.mulf %17, %17 : vector<1x128x32xf32>
    %cst_15 = arith.constant dense<0.000000e+00> : vector<1x128xf32>
    %27 = vector.multi_reduction <add>, %26, %cst_15 [2] : vector<1x128x32xf32> to vector<1x128xf32>
    %28 = vector.shape_cast %27 : vector<1x128xf32> to vector<1x1x128xf32>
    %29 = vector.broadcast %28 : vector<1x1x128xf32> to vector<1x8x128xf32>
    %30 = arith.addf %25, %29 : vector<1x8x128xf32>
    %cst_16 = arith.constant -1.000000e+30 : f32
    %31 = vector.broadcast %cst_16 : f32 to vector<1x16x128xf32>
    %c0_17 = arith.constant 0 : index
    %c0_18 = arith.constant 0 : index
    %c0_19 = arith.constant 0 : index
    %32 = vector.load %arg11[%c0_17, %c0_18, %c0_19] : memref<1x16x128xf32, #tpu.memory_space<vmem>>, vector<1x16x128xf32>
    tpu.vector_store %arg11[%c0_17, %c0_18, %c0_19], %31 {strides = array<i32>} : memref<1x16x128xf32, #tpu.memory_space<vmem>>, vector<1x16x128xf32>,
    %33 = tpu.iota {dimensions = array<i32: 1>} : vector<8x128xi32>
    %34 = tpu.iota {dimensions = array<i32: 1>} : vector<1x128xi32>
    %c0_i32 = arith.constant 0 : i32
    %35 = arith.addi %0, %c0_i32 : i32
    %36 = arith.index_cast %35 : i32 to index
    %37 = memref.load %arg1[%36] : memref<2xf32, #tpu.memory_space<smem>>
    %c0_i32_20 = arith.constant 0 : i32
    %38 = arith.addi %0, %c0_i32_20 : i32
    %39 = arith.index_cast %38 : i32 to index
    %40 = memref.load %arg2[%39] : memref<2xf32, #tpu.memory_space<smem>>
    %c0_i32_21 = arith.constant 0 : i32
    %41 = arith.addi %0, %c0_i32_21 : i32
    %42 = arith.index_cast %41 : i32 to index
    %43 = memref.load %arg3[%42] : memref<2xf32, #tpu.memory_space<smem>>
    %cst_22 = arith.constant 0.000000e+00 : f32
    %44 = arith.subf %cst_22, %37 : f32
    %45 = vector.shape_cast %30 : vector<1x8x128xf32> to vector<8x128xf32>
    %46 = vector.broadcast %40 : f32 to vector<8x128xf32>
    %47 = arith.subf %45, %46 : vector<8x128xf32>
    %48 = vector.broadcast %44 : f32 to vector<8x128xf32>
    %49 = arith.mulf %48, %47 : vector<8x128xf32>
    %50 = math.exp %49 : vector<8x128xf32>
    %c0_23 = arith.constant 0 : index
    %c0_24 = arith.constant 0 : index
    %c0_25 = arith.constant 0 : index
    %51 = vector.load %arg9[%c0_23, %c0_24, %c0_25] : memref<1x8x128xf32, #tpu.memory_space<vmem>>, vector<1x8x128xf32>
    %52 = vector.shape_cast %51 : vector<1x8x128xf32> to vector<8x128xf32>
    %53 = vector.shape_cast %50 : vector<8x128xf32> to vector<1x8x128xf32>
    tpu.vector_store %arg9[%c0_23, %c0_24, %c0_25], %53 {strides = array<i32>} : memref<1x8x128xf32, #tpu.memory_space<vmem>>, vector<1x8x128xf32>,
    %c8_i32 = arith.constant 8 : i32
    %54 = vector.broadcast %c8_i32 : i32 to vector<8x128xi32>
    %55 = arith.cmpi slt, %33, %54 : vector<8x128xi32>
    %c8_i32_26 = arith.constant 8 : i32
    %56 = vector.broadcast %c8_i32_26 : i32 to vector<8x128xi32>
    %57 = arith.cmpi eq, %33, %56 : vector<8x128xi32>
    %cst_27 = arith.constant -1.000000e+30 : f32
    %58 = vector.broadcast %43 : f32 to vector<8x128xf32>
    %59 = vector.broadcast %cst_27 : f32 to vector<8x128xf32>
    %60 = arith.select %57, %58, %59 : vector<8x128xi1>, vector<8x128xf32>
    %61 = arith.select %55, %49, %60 : vector<8x128xi1>, vector<8x128xf32>
    %c0_i32_28 = arith.constant 0 : i32
    %c0_i32_29 = arith.constant 0 : i32
    %c0_i32_30 = arith.constant 0 : i32
    %62 = tpu.memref_slice %arg11[%c0_i32_28, %c0_i32_29, %c0_i32_30] : memref<1x16x128xf32, #tpu.memory_space<vmem>> -> memref<1x16x128xf32, #tpu.memory_space<vmem>>
    %63 = tpu.memref_squeeze %62 : memref<1x16x128xf32, #tpu.memory_space<vmem>> -> memref<16x128xf32, #tpu.memory_space<vmem>>
    %c0_31 = arith.constant 0 : index
    %c0_32 = arith.constant 0 : index
    %64 = vector.load %63[%c0_31, %c0_32] : memref<16x128xf32, #tpu.memory_space<vmem>>, vector<8x128xf32>
    tpu.vector_store %63[%c0_31, %c0_32], %61 {strides = array<i32>} : memref<16x128xf32, #tpu.memory_space<vmem>>, vector<8x128xf32>,
    %c8_i32_33 = arith.constant 8 : i32
    %65 = vector.broadcast %c8_i32_33 : i32 to vector<1x128xi32>
    %66 = arith.cmpi sle, %34, %65 : vector<1x128xi32>
    %cst_34 = arith.constant -1.000000e+30 : f32
    %67 = vector.broadcast %43 : f32 to vector<1x128xf32>
    %68 = vector.broadcast %cst_34 : f32 to vector<1x128xf32>
    %69 = arith.select %66, %67, %68 : vector<1x128xi1>, vector<1x128xf32>
    %c0_i32_35 = arith.constant 0 : i32
    %c0_i32_36 = arith.constant 0 : i32
    %c0_i32_37 = arith.constant 0 : i32
    %70 = tpu.memref_slice %arg11[%c0_i32_35, %c0_i32_36, %c0_i32_37] : memref<1x16x128xf32, #tpu.memory_space<vmem>> -> memref<1x16x128xf32, #tpu.memory_space<vmem>>
    %71 = tpu.memref_squeeze %70 : memref<1x16x128xf32, #tpu.memory_space<vmem>> -> memref<16x128xf32, #tpu.memory_space<vmem>>
    %c8 = arith.constant 8 : index
    %c0_38 = arith.constant 0 : index
    %72 = vector.load %71[%c8, %c0_38] : memref<16x128xf32, #tpu.memory_space<vmem>>, vector<1x128xf32>
    tpu.vector_store %71[%c8, %c0_38], %69 {strides = array<i32>} : memref<16x128xf32, #tpu.memory_space<vmem>>, vector<1x128xf32>,
    %73 = tpu.iota {dimensions = array<i32: 1>} : vector<1x16x128xi32>
    %74 = tpu.iota {dimensions = array<i32: 2>} : vector<1x16x128xi32>
    %c0_39 = arith.constant 0 : index
    %c0_40 = arith.constant 0 : index
    %c0_41 = arith.constant 0 : index
    %75 = vector.load %arg11[%c0_39, %c0_40, %c0_41] : memref<1x16x128xf32, #tpu.memory_space<vmem>>, vector<1x16x128xf32>
    %c0_i32_42 = arith.constant 0 : i32
    %cst_43 = arith.constant dense<0xFF800000> : vector<1x16xf32>
    %76 = vector.multi_reduction <maximumf>, %75, %cst_43 [2] : vector<1x16x128xf32> to vector<1x16xf32>
    %77 = vector.shape_cast %76 : vector<1x16xf32> to vector<1x16x1xf32>
    %78 = vector.broadcast %77 : vector<1x16x1xf32> to vector<1x16x128xf32>
    %79 = arith.subf %75, %78 : vector<1x16x128xf32>
    %80 = math.exp %79 : vector<1x16x128xf32>
    %cst_44 = arith.constant dense<0.000000e+00> : vector<1x16xf32>
    %81 = vector.multi_reduction <add>, %80, %cst_44 [2] : vector<1x16x128xf32> to vector<1x16xf32>
    %82 = vector.shape_cast %81 : vector<1x16xf32> to vector<1x16x1xf32>
    %83 = math.log %82 : vector<1x16x1xf32>
    %84 = arith.addf %77, %83 : vector<1x16x1xf32>
    %c8_i32_45 = arith.constant 8 : i32
    %85 = vector.broadcast %c8_i32_45 : i32 to vector<1x16x128xi32>
    %86 = arith.cmpi slt, %73, %85 : vector<1x16x128xi32>
    %87 = vector.broadcast %84 : vector<1x16x1xf32> to vector<1x16x128xf32>
    %88 = arith.subf %75, %87 : vector<1x16x128xf32>
    %89 = arith.select %86, %88, %75 : vector<1x16x128xi1>, vector<1x16x128xf32>
    %cst_46 = arith.constant dense<0xFF800000> : vector<1x128xf32>
    %90 = vector.multi_reduction <maximumf>, %89, %cst_46 [1] : vector<1x16x128xf32> to vector<1x128xf32>
    %91 = vector.shape_cast %90 : vector<1x128xf32> to vector<1x1x128xf32>
    %92 = vector.broadcast %91 : vector<1x1x128xf32> to vector<1x16x128xf32>
    %93 = arith.subf %89, %92 : vector<1x16x128xf32>
    %94 = math.exp %93 : vector<1x16x128xf32>
    %cst_47 = arith.constant dense<0.000000e+00> : vector<1x128xf32>
    %95 = vector.multi_reduction <add>, %94, %cst_47 [1] : vector<1x16x128xf32> to vector<1x128xf32>
    %96 = vector.shape_cast %95 : vector<1x128xf32> to vector<1x1x128xf32>
    %97 = math.log %96 : vector<1x1x128xf32>
    %98 = arith.addf %91, %97 : vector<1x1x128xf32>
    %c8_i32_48 = arith.constant 8 : i32
    %99 = vector.broadcast %c8_i32_48 : i32 to vector<1x16x128xi32>
    %100 = arith.cmpi slt, %74, %99 : vector<1x16x128xi32>
    %101 = vector.broadcast %98 : vector<1x1x128xf32> to vector<1x16x128xf32>
    %102 = arith.subf %89, %101 : vector<1x16x128xf32>
    %103 = arith.select %100, %102, %89 : vector<1x16x128xi1>, vector<1x16x128xf32>
    %c1_i32_49 = arith.constant 1 : i32
    %cst_50 = arith.constant dense<0xFF800000> : vector<1x16xf32>
    %104 = vector.multi_reduction <maximumf>, %103, %cst_50 [2] : vector<1x16x128xf32> to vector<1x16xf32>
    %105 = vector.shape_cast %104 : vector<1x16xf32> to vector<1x16x1xf32>
    %106 = vector.broadcast %105 : vector<1x16x1xf32> to vector<1x16x128xf32>
    %107 = arith.subf %103, %106 : vector<1x16x128xf32>
    %108 = math.exp %107 : vector<1x16x128xf32>
    %cst_51 = arith.constant dense<0.000000e+00> : vector<1x16xf32>
    %109 = vector.multi_reduction <add>, %108, %cst_51 [2] : vector<1x16x128xf32> to vector<1x16xf32>
    %110 = vector.shape_cast %109 : vector<1x16xf32> to vector<1x16x1xf32>
    %111 = math.log %110 : vector<1x16x1xf32>
    %112 = arith.addf %105, %111 : vector<1x16x1xf32>
    %c8_i32_52 = arith.constant 8 : i32
    %113 = vector.broadcast %c8_i32_52 : i32 to vector<1x16x128xi32>
    %114 = arith.cmpi slt, %73, %113 : vector<1x16x128xi32>
    %115 = vector.broadcast %112 : vector<1x16x1xf32> to vector<1x16x128xf32>
    %116 = arith.subf %103, %115 : vector<1x16x128xf32>
    %117 = arith.select %114, %116, %103 : vector<1x16x128xi1>, vector<1x16x128xf32>
    %cst_53 = arith.constant dense<0xFF800000> : vector<1x128xf32>
    %118 = vector.multi_reduction <maximumf>, %117, %cst_53 [1] : vector<1x16x128xf32> to vector<1x128xf32>
    %119 = vector.shape_cast %118 : vector<1x128xf32> to vector<1x1x128xf32>
    %120 = vector.broadcast %119 : vector<1x1x128xf32> to vector<1x16x128xf32>
    %121 = arith.subf %117, %120 : vector<1x16x128xf32>
    %122 = math.exp %121 : vector<1x16x128xf32>
    %cst_54 = arith.constant dense<0.000000e+00> : vector<1x128xf32>
    %123 = vector.multi_reduction <add>, %122, %cst_54 [1] : vector<1x16x128xf32> to vector<1x128xf32>
    %124 = vector.shape_cast %123 : vector<1x128xf32> to vector<1x1x128xf32>
    %125 = math.log %124 : vector<1x1x128xf32>
    %126 = arith.addf %119, %125 : vector<1x1x128xf32>
    %c8_i32_55 = arith.constant 8 : i32
    %127 = vector.broadcast %c8_i32_55 : i32 to vector<1x16x128xi32>
    %128 = arith.cmpi slt, %74, %127 : vector<1x16x128xi32>
    %129 = vector.broadcast %126 : vector<1x1x128xf32> to vector<1x16x128xf32>
    %130 = arith.subf %117, %129 : vector<1x16x128xf32>
    %131 = arith.select %128, %130, %117 : vector<1x16x128xi1>, vector<1x16x128xf32>
    %c2_i32 = arith.constant 2 : i32
    %cst_56 = arith.constant dense<0xFF800000> : vector<1x16xf32>
    %132 = vector.multi_reduction <maximumf>, %131, %cst_56 [2] : vector<1x16x128xf32> to vector<1x16xf32>
    %133 = vector.shape_cast %132 : vector<1x16xf32> to vector<1x16x1xf32>
    %134 = vector.broadcast %133 : vector<1x16x1xf32> to vector<1x16x128xf32>
    %135 = arith.subf %131, %134 : vector<1x16x128xf32>
    %136 = math.exp %135 : vector<1x16x128xf32>
    %cst_57 = arith.constant dense<0.000000e+00> : vector<1x16xf32>
    %137 = vector.multi_reduction <add>, %136, %cst_57 [2] : vector<1x16x128xf32> to vector<1x16xf32>
    %138 = vector.shape_cast %137 : vector<1x16xf32> to vector<1x16x1xf32>
    %139 = math.log %138 : vector<1x16x1xf32>
    %140 = arith.addf %133, %139 : vector<1x16x1xf32>
    %c8_i32_58 = arith.constant 8 : i32
    %141 = vector.broadcast %c8_i32_58 : i32 to vector<1x16x128xi32>
    %142 = arith.cmpi slt, %73, %141 : vector<1x16x128xi32>
    %143 = vector.broadcast %140 : vector<1x16x1xf32> to vector<1x16x128xf32>
    %144 = arith.subf %131, %143 : vector<1x16x128xf32>
    %145 = arith.select %142, %144, %131 : vector<1x16x128xi1>, vector<1x16x128xf32>
    %cst_59 = arith.constant dense<0xFF800000> : vector<1x128xf32>
    %146 = vector.multi_reduction <maximumf>, %145, %cst_59 [1] : vector<1x16x128xf32> to vector<1x128xf32>
    %147 = vector.shape_cast %146 : vector<1x128xf32> to vector<1x1x128xf32>
    %148 = vector.broadcast %147 : vector<1x1x128xf32> to vector<1x16x128xf32>
    %149 = arith.subf %145, %148 : vector<1x16x128xf32>
    %150 = math.exp %149 : vector<1x16x128xf32>
    %cst_60 = arith.constant dense<0.000000e+00> : vector<1x128xf32>
    %151 = vector.multi_reduction <add>, %150, %cst_60 [1] : vector<1x16x128xf32> to vector<1x128xf32>
    %152 = vector.shape_cast %151 : vector<1x128xf32> to vector<1x1x128xf32>
    %153 = math.log %152 : vector<1x1x128xf32>
    %154 = arith.addf %147, %153 : vector<1x1x128xf32>
    %c8_i32_61 = arith.constant 8 : i32
    %155 = vector.broadcast %c8_i32_61 : i32 to vector<1x16x128xi32>
    %156 = arith.cmpi slt, %74, %155 : vector<1x16x128xi32>
    %157 = vector.broadcast %154 : vector<1x1x128xf32> to vector<1x16x128xf32>
    %158 = arith.subf %145, %157 : vector<1x16x128xf32>
    %159 = arith.select %156, %158, %145 : vector<1x16x128xi1>, vector<1x16x128xf32>
    %c3_i32 = arith.constant 3 : i32
    %cst_62 = arith.constant dense<0xFF800000> : vector<1x16xf32>
    %160 = vector.multi_reduction <maximumf>, %159, %cst_62 [2] : vector<1x16x128xf32> to vector<1x16xf32>
    %161 = vector.shape_cast %160 : vector<1x16xf32> to vector<1x16x1xf32>
    %162 = vector.broadcast %161 : vector<1x16x1xf32> to vector<1x16x128xf32>
    %163 = arith.subf %159, %162 : vector<1x16x128xf32>
    %164 = math.exp %163 : vector<1x16x128xf32>
    %cst_63 = arith.constant dense<0.000000e+00> : vector<1x16xf32>
    %165 = vector.multi_reduction <add>, %164, %cst_63 [2] : vector<1x16x128xf32> to vector<1x16xf32>
    %166 = vector.shape_cast %165 : vector<1x16xf32> to vector<1x16x1xf32>
    %167 = math.log %166 : vector<1x16x1xf32>
    %168 = arith.addf %161, %167 : vector<1x16x1xf32>
    %c8_i32_64 = arith.constant 8 : i32
    %169 = vector.broadcast %c8_i32_64 : i32 to vector<1x16x128xi32>
    %170 = arith.cmpi slt, %73, %169 : vector<1x16x128xi32>
    %171 = vector.broadcast %168 : vector<1x16x1xf32> to vector<1x16x128xf32>
    %172 = arith.subf %159, %171 : vector<1x16x128xf32>
    %173 = arith.select %170, %172, %159 : vector<1x16x128xi1>, vector<1x16x128xf32>
    %cst_65 = arith.constant dense<0xFF800000> : vector<1x128xf32>
    %174 = vector.multi_reduction <maximumf>, %173, %cst_65 [1] : vector<1x16x128xf32> to vector<1x128xf32>
    %175 = vector.shape_cast %174 : vector<1x128xf32> to vector<1x1x128xf32>
    %176 = vector.broadcast %175 : vector<1x1x128xf32> to vector<1x16x128xf32>
    %177 = arith.subf %173, %176 : vector<1x16x128xf32>
    %178 = math.exp %177 : vector<1x16x128xf32>
    %cst_66 = arith.constant dense<0.000000e+00> : vector<1x128xf32>
    %179 = vector.multi_reduction <add>, %178, %cst_66 [1] : vector<1x16x128xf32> to vector<1x128xf32>
    %180 = vector.shape_cast %179 : vector<1x128xf32> to vector<1x1x128xf32>
    %181 = math.log %180 : vector<1x1x128xf32>
    %182 = arith.addf %175, %181 : vector<1x1x128xf32>
    %c8_i32_67 = arith.constant 8 : i32
    %183 = vector.broadcast %c8_i32_67 : i32 to vector<1x16x128xi32>
    %184 = arith.cmpi slt, %74, %183 : vector<1x16x128xi32>
    %185 = vector.broadcast %182 : vector<1x1x128xf32> to vector<1x16x128xf32>
    %186 = arith.subf %173, %185 : vector<1x16x128xf32>
    %187 = arith.select %184, %186, %173 : vector<1x16x128xi1>, vector<1x16x128xf32>
    %c4_i32 = arith.constant 4 : i32
    %cst_68 = arith.constant dense<0xFF800000> : vector<1x16xf32>
    %188 = vector.multi_reduction <maximumf>, %187, %cst_68 [2] : vector<1x16x128xf32> to vector<1x16xf32>
    %189 = vector.shape_cast %188 : vector<1x16xf32> to vector<1x16x1xf32>
    %190 = vector.broadcast %189 : vector<1x16x1xf32> to vector<1x16x128xf32>
    %191 = arith.subf %187, %190 : vector<1x16x128xf32>
    %192 = math.exp %191 : vector<1x16x128xf32>
    %cst_69 = arith.constant dense<0.000000e+00> : vector<1x16xf32>
    %193 = vector.multi_reduction <add>, %192, %cst_69 [2] : vector<1x16x128xf32> to vector<1x16xf32>
    %194 = vector.shape_cast %193 : vector<1x16xf32> to vector<1x16x1xf32>
    %195 = math.log %194 : vector<1x16x1xf32>
    %196 = arith.addf %189, %195 : vector<1x16x1xf32>
    %c8_i32_70 = arith.constant 8 : i32
    %197 = vector.broadcast %c8_i32_70 : i32 to vector<1x16x128xi32>
    %198 = arith.cmpi slt, %73, %197 : vector<1x16x128xi32>
    %199 = vector.broadcast %196 : vector<1x16x1xf32> to vector<1x16x128xf32>
    %200 = arith.subf %187, %199 : vector<1x16x128xf32>
    %201 = arith.select %198, %200, %187 : vector<1x16x128xi1>, vector<1x16x128xf32>
    %cst_71 = arith.constant dense<0xFF800000> : vector<1x128xf32>
    %202 = vector.multi_reduction <maximumf>, %201, %cst_71 [1] : vector<1x16x128xf32> to vector<1x128xf32>
    %203 = vector.shape_cast %202 : vector<1x128xf32> to vector<1x1x128xf32>
    %204 = vector.broadcast %203 : vector<1x1x128xf32> to vector<1x16x128xf32>
    %205 = arith.subf %201, %204 : vector<1x16x128xf32>
    %206 = math.exp %205 : vector<1x16x128xf32>
    %cst_72 = arith.constant dense<0.000000e+00> : vector<1x128xf32>
    %207 = vector.multi_reduction <add>, %206, %cst_72 [1] : vector<1x16x128xf32> to vector<1x128xf32>
    %208 = vector.shape_cast %207 : vector<1x128xf32> to vector<1x1x128xf32>
    %209 = math.log %208 : vector<1x1x128xf32>
    %210 = arith.addf %203, %209 : vector<1x1x128xf32>
    %c8_i32_73 = arith.constant 8 : i32
    %211 = vector.broadcast %c8_i32_73 : i32 to vector<1x16x128xi32>
    %212 = arith.cmpi slt, %74, %211 : vector<1x16x128xi32>
    %213 = vector.broadcast %210 : vector<1x1x128xf32> to vector<1x16x128xf32>
    %214 = arith.subf %201, %213 : vector<1x16x128xf32>
    %215 = arith.select %212, %214, %201 : vector<1x16x128xi1>, vector<1x16x128xf32>
    %216 = vector.extract_strided_slice %215 {offsets = [0, 0, 0], sizes = [1, 8, 128], strides = [1, 1, 1]} : vector<1x16x128xf32> to vector<1x8x128xf32>
    %217 = math.exp %216 : vector<1x8x128xf32>
    %c0_74 = arith.constant 0 : index
    %c0_75 = arith.constant 0 : index
    %c0_76 = arith.constant 0 : index
    %218 = vector.load %arg10[%c0_74, %c0_75, %c0_76] : memref<1x8x128xf32, #tpu.memory_space<vmem>>, vector<1x8x128xf32>
    tpu.vector_store %arg10[%c0_74, %c0_75, %c0_76], %217 {strides = array<i32>} : memref<1x8x128xf32, #tpu.memory_space<vmem>>, vector<1x8x128xf32>,
    return
  }
  func.func @transform_0(%arg0: i32) -> i32 {
    %c0_i32 = arith.constant 0 : i32
    %c0_i32_0 = arith.constant 0 : i32
    return %c0_i32 : i32
  }
  func.func @transform_1(%arg0: i32) -> i32 {
    %c0_i32 = arith.constant 0 : i32
    %c0_i32_0 = arith.constant 0 : i32
    return %c0_i32 : i32
  }
  func.func @transform_2(%arg0: i32) -> i32 {
    %c0_i32 = arith.constant 0 : i32
    %c0_i32_0 = arith.constant 0 : i32
    return %c0_i32 : i32
  }
  func.func @transform_3(%arg0: i32) -> (i32, i32, i32) {
    %c0_i32 = arith.constant 0 : i32
    %c0_i32_0 = arith.constant 0 : i32
    %c0_i32_1 = arith.constant 0 : i32
    return %arg0, %c0_i32, %c0_i32_0 : i32, i32, i32
  }
  func.func @transform_4(%arg0: i32) -> (i32, i32) {
    %c0_i32 = arith.constant 0 : i32
    %c0_i32_0 = arith.constant 0 : i32
    %c0_i32_1 = arith.constant 0 : i32
    return %c0_i32, %c0_i32_0 : i32, i32
  }
  func.func @transform_5(%arg0: i32) -> (i32, i32) {
    %c0_i32 = arith.constant 0 : i32
    %c0_i32_0 = arith.constant 0 : i32
    %c0_i32_1 = arith.constant 0 : i32
    return %c0_i32, %c0_i32_0 : i32, i32
  }
  func.func @transform_6(%arg0: i32) -> (i32, i32) {
    %c0_i32 = arith.constant 0 : i32
    %c0_i32_0 = arith.constant 0 : i32
    %c0_i32_1 = arith.constant 0 : i32
    return %c0_i32, %c0_i32_0 : i32, i32
  }
  func.func @transform_7(%arg0: i32) -> (i32, i32) {
    %c0_i32 = arith.constant 0 : i32
    %c0_i32_0 = arith.constant 0 : i32
    %c0_i32_1 = arith.constant 0 : i32
    return %c0_i32, %c0_i32_0 : i32, i32
  }
  func.func @transform_8(%arg0: i32) -> (i32, i32, i32) {
    %c0_i32 = arith.constant 0 : i32
    %c0_i32_0 = arith.constant 0 : i32
    %c0_i32_1 = arith.constant 0 : i32
    return %arg0, %c0_i32, %c0_i32_0 : i32, i32, i32
  }
  func.func @transform_9(%arg0: i32) -> (i32, i32, i32) {
    %c0_i32 = arith.constant 0 : i32
    %c0_i32_0 = arith.constant 0 : i32
    %c0_i32_1 = arith.constant 0 : i32
    return %arg0, %c0_i32, %c0_i32_0 : i32, i32, i32
  }
}

</mosaic_0001>

<bundles_post_ra>
// kernel: custom-call.57
= control target key start
LH: loop header
LB: loop body
LE: loop exit
PB: predicated region body
PF: predicated region fallthrough
CT: control target
= control target key end

     0   :  { %s645_s9 = smov 0   ;;  %s647_s10 = smov 0   ;;  %s795_s0 = inlined_call_operand.vmem [shape: f32[2,6,3], index: 0, kind: input, shape index: {}]   ;;  %s796_s1 = inlined_call_operand.vmem [shape: f32[2,6,3], index: 1, kind: output, shape index: {0}]   ;;  %s797_s2 = inlined_call_operand.vmem [shape: f32[2,3], index: 2, kind: output, shape index: {1}]  }
   0x1   :  { %s649_s11 = smov 0   ;;  %s651_s12 = smov 0  }
   0x2   :  { %s653_s13 = smov 0  }
   0x3 LB: > { %s28_s14 = sadd.s32 1, %s618_s12  ;;  %s500_s15 = sadd.s32 4294967295, %s622_s13   ;;  %s622_s13 = sphi %s653_s13, %s9_s13   ;;  %s618_s12 = sphi %s651_s12, %s804_s12   ;;  %s614_s11 = sphi %s649_s11, %s803_s11   ;;  %s610_s10 = sphi %s647_s10, %s802_s10   ;;  %s606_s9 = sphi %s645_s9, %s801_s9  }
   0x4   : > { %p30_p0 = scmp.ge.s32.totalorder %s28_s14, 2  ;;  %s33_s16 = ssub.s32 0, %s618_s12 }
   0x5   : > { %s502_s17 = smin.u32 %s618_s12, %s33_s16  ;;  %p57_p1 = scmp.ne.s32.totalorder %s610_s10, %s606_s9 }
   0x6   : > { %s806_s14 = smov (%p30_p0, %s28_s14), 0  ;;  %s35_s18 = sshrl.u32 %s502_s17, 3 }
   0x7   : > { %s39_s19 = ssub.s32 0, %s806_s14  ;;  %p58_p2 = scmp.eq.s32.totalorder %s500_s15, 1 }
   0x8   : > { %s503_s20 = smin.u32 %s39_s19, %s806_s14  ;;  %s47_s24 = sadd.s32 1, %s610_s10 }
   0x9   : > { %s41_s21 = sshrl.u32 %s503_s20, 3  ;;  %p680_p3 = por %p58_p2, %p57_p1 }
   0xa   : > { %s44_s23 = ssub.s32 %s35_s18, %s41_s21  ;;  %p505_p5 = scmp.ge.s32.totalorder %s622_s13, 2 }
   0xb   : > { %p45_p4 = scmp.eq.s32.totalorder %s44_s23, 0  ;;  %s82_s26 = sand.u32 (!%p505_p5), 1, %s622_s13  }
   0xc   : > { %80 = sbr.rel (%p505_p5) target bundleno = 19 (0x13), region = 16  ;;  %s507_s27 = sshll.u32 (!%p505_p5), %s618_s12, 3 }
   0xd   : > { %s686_s25 = scalar_select %p45_p4, %s610_s10, %s47_s24  }
   0xe   : > { %s506_s28 = sshll.u32 (!%p505_p5), %s82_s26, 3  ;;  %s88_s3 = scalar_lea.vmem (!%p505_p5), %s795_s0, %s507_s27 }
   0xf   : > { %v116_v0 = vld [vmem:[%s88_s3] sm:$0xff] (!%p505_p5)  ;;  %s84_s4 = scalar_lea.vmem (!%p505_p5), [#allocation0], %s506_s28 }
  0x10   : > { %117 = vst [vmem:[%s84_s4] sm:$0xff] (!%p505_p5), %v116_v0 }
  0x13 PF: > { %p508_p6 = scmp.ge.s32.totalorder %s622_s13, 1  ;;  %p122_p7 = scmp.lt.s32.totalorder %s622_s13, 3 }
  0x15   : > { %p123_p8 = pnand %p508_p6, %p122_p7 }
  0x17   : > { %126 = sbr.rel (%p123_p8) target bundleno = 330 (0x14a), region = 54 }
  0x1e   : > { %s129_s5 = sand.u32 1, %s500_s15   ;;  %s143_s6 = sand.u32 1, %s606_s9   ;;  %v628_v2 = vmov 0.0  }
  0x1f   : > { %s509_s7 = sshll.u32 %s129_s5, 3  ;;  %s697_s8 = sshll.u32 %s143_s6, 1 }
  0x20   : > { %s152_s16 = sand.u32 7, %s614_s11   ;;  %s131_s17 = scalar_lea.vmem [#allocation0], %s509_s7 }
  0x21   : > { %v154_v1 = vld [vmem:[%s131_s17] sm:$0xff]  ;;  %s700_s18 = scalar_lea.vmem [#allocation1], %s509_s7  ;;  %s703_s19 = scalar_lea.vmem [#allocation2], %s152_s16 }
  0x22   : > { %155 = vst [vmem:[%s700_s18] sm:$0xff] %v154_v1  ;;  %156 = vst [vmem:[%s703_s19] sm:$0x1] %v628_v2  ;;  %s145_s15 = scalar_lea.vmem [#allocation3], %s697_s8  ;;  %s707_s20 = smov 0  }
  0x23 LB: >> { %v164_v3 = vlaneseq  ;;  %v716_v5 = vstv %s626_s20  ;;  %s191_s9 = scalar_lea.vmem %s700_s18, %s626_s20 [#allocation1]  ;;  %s249_s21 = scalar_lea.vmem [#allocation4], %s626_s20  ;;  %v629_v59 = vmov 1.0   ;;  %s626_s20 = sphi %s707_s20, %s162_s20  }
  0x24   : >> { %s266_s23 = smov [#allocation4] }
  0x25   : >> { %v713_v4 = vshrl.u32 %v164_v3, 7  ;;  %v243_v48 = vand.u32 127, %v164_v3 }
  0x27   : >> { %vm168_vm0 = vcmp.gt.s32.totalorder %v713_v4, %v716_v5  ;;  %vm169_vm1 = vcmp.lt.s32.totalorder %v713_v4, 6  ;;  %v230_v4 = vmov %v713_v4  ;;  %vm734_vm12 = vcmp.eq.s32.totalorder %v243_v48, %v716_v5 }
  0x28   : >> { %vm170_vm2 = vmand %vm168_vm0, %vm169_vm1  ;;  %vm234_vm9 = vcmp.gt.s32.totalorder %v230_v4, %v716_v5  ;;  %vm235_vm10 = vcmp.lt.s32.totalorder %v230_v4, 6  ;;  %v269_v4 = vmov %v713_v4  ;;  %vm295_vm15 = vcmp.gt.s32.totalorder %v243_v48, %v716_v5 }
  0x29   : >> { %v163_v6 = vld [vmem:[%s700_s18] sm:$0xff]  ;;  %v192_v15 = vld [vmem:[%s191_s9] ss:$0 sm:$0xff]  ;;  %s227_s18 = smov %s700_s18  ;;  %vm236_vm11 = vmand %vm234_vm9, %vm235_vm10  ;;  %vm274_vm13 = vcmp.lt.s32.totalorder %v269_v4, 6  ;;  %v286_v4 = vmov %v713_v4 }
  0x2a   : >> { %v171_v7 = vsel %vm170_vm2, %v163_v6, 0.0  ;;  %v193_v16 = vand.u32 2147483647, %v192_v15  ;;  %vm218_vm8 = vcmp.lt.f32.partialorder %v192_v15, 0.0  ;;  %v231_v45 = vld [vmem:[%s227_s18] sm:$0xff]  ;;  %s265_s18 = smov %s700_s18  ;;  %vm303_vm14 = vcmp.ge.s32.totalorder %v286_v4, %v716_v5 }
  0x2b   : >> { %v172_v8 = vmul.f32 %v171_v7, %v171_v7  ;;  %v237_v49 = vsel %vm236_vm11, %v231_v45, 0.0  ;;  %v262_v60 = vld [vmem:[%s703_s19] ss:$0 sm:$0xff]  ;;  %vm304_vm0 = vmand %vm734_vm12, %vm303_vm14 }
  0x2c   : >> { %v194_v21 = vmax.f32 %v193_v16, 0.0  ;;  %v272_v63 = vld [vmem:[%s265_s18] sm:$0xff]  ;;  %s282_s18 = smov %s265_s18 }
  0x2d   : >> { %v173_v9 = vrot.slane %v172_v8, 4  ;;  %s307_s24 = scalar_lea.vmem %s282_s18, %s626_s20  ;;  %s162_s20 = sadd.s32 1, %s626_s20  }
  0x2e   : >> { %p159_p9 = scmp.ge.s32.totalorder %s162_s20, 3  }
  0x2f   : >> { %v174_v10 = vadd.f32 %v173_v9, %v172_v8  ;;  %s515_s26 = sshll.u32 (%p159_p9), %s614_s11, 3 }
  0x30   : > { %s332_s29 = scalar_lea.vmem (%p159_p9), %s796_s1, %s515_s26 }
  0x31   : >> { %v175_v11 = vrot.slane %v174_v10, 2 }
  0x33   : >> { %v176_v12 = vadd.f32 %v175_v11, %v174_v10 }
  0x35   : >> { %v177_v13 = vrot.slane %v176_v12, 1 }
  0x37   : >> { %v178_v14 = vadd.f32 %v177_v13, %v176_v12  ;;  %v293_v13 = vld [vmem:[%s282_s18] sm:$0xff] }
  0x39   : >> { %570 = vrsqrt.f32 %v178_v14  ;;  %vm181_vm3 = vcmp.eq.f32.partialorder %v178_v14, inf  ;;  %v184_v18 = vand.u32 2147483648, %v178_v14  ;;  %vm183_vm4 = vcmp.eq.f32.partialorder %v178_v14, 0.0 }
  0x43   : >> { %v571_v17 = vpop.eup %570 }
  0x44   : >> { %v180_v19 = vmul.f32 %v571_v17, %v178_v14 }
  0x46   : >> { %v182_v20 = vsel %vm181_vm3, %v178_v14, %v180_v19 }
  0x47   : >> { %v185_v22 = vsel %vm183_vm4, %v184_v18, %v182_v20 }
  0x48   : >> { %v195_v23 = vand.u32 2147483647, %v185_v22 }
  0x4a   : >> { %v196_v24 = vmax.f32 %v194_v21, %v195_v23 }
  0x4c   : >> { %572 = vrcp.f32 %v196_v24  ;;  %vm208_vm7 = vcmp.eq.f32.partialorder %v196_v24, 0.0 }
  0x56   : >> { %v573_v25 = vpop.eup %572 }
  0x57   : >> { %v198_v26 = vmul.f32 %v573_v25, %v193_v16  ;;  %v201_v27 = vmul.f32 0.0, %v573_v25  ;;  %v205_v28 = vmul.f32 %v573_v25, %v195_v23 }
  0x59   : >> { %v199_v29 = vmul.f32 %v198_v26, %v198_v26  ;;  %v202_v30 = vmul.f32 %v201_v27, %v201_v27  ;;  %v206_v31 = vmul.f32 %v205_v28, %v205_v28 }
  0x5b   : >> { %v203_v32 = vadd.f32 %v202_v30, %v199_v29 }
  0x5d   : >> { %v207_v33 = vadd.f32 %v206_v31, %v203_v32 }
  0x5f   : >> { %574 = vrsqrt.f32 %v207_v33  ;;  %vm211_vm5 = vcmp.eq.f32.partialorder %v207_v33, inf  ;;  %v214_v35 = vand.u32 2147483648, %v207_v33  ;;  %vm213_vm6 = vcmp.eq.f32.partialorder %v207_v33, 0.0 }
  0x69   : >> { %v575_v34 = vpop.eup %574 }
  0x6a   : >> { %v210_v36 = vmul.f32 %v575_v34, %v207_v33 }
  0x6c   : >> { %v212_v37 = vsel %vm211_vm5, %v207_v33, %v210_v36 }
  0x6d   : >> { %v215_v38 = vsel %vm213_vm6, %v214_v35, %v212_v37 }
  0x6e   : >> { %v216_v39 = vmul.f32 %v215_v38, %v196_v24 }
  0x70   : >> { %v217_v40 = vsel %vm208_vm7, 0.0, %v216_v39 }
  0x71   : >> { %v219_v41 = vxor.u32 2147483648, %v217_v40 }
  0x73   : >> { %v220_v42 = vsel %vm218_vm8, %v217_v40, %v219_v41 }
  0x74   : >> { %v726_v43 = vsel %vm183_vm4, %v192_v15, %v220_v42  ;;  %576 = vrcp.f32 %v220_v42  ;;  %v221_v46 = vsub.f32 %v220_v42, %v192_v15 }
  0x75   : >> { %v226_v44 = vsub.f32 %v192_v15, %v726_v43 }
  0x77   : >> { %578 = vrcp.f32 %v226_v44 }
  0x7e   : >> { %v577_v47 = vpop.eup %576 }
  0x7f   : >> { %v223_v50 = vmul.f32 %v577_v47, %v221_v46 }
  0x81   : >> { %v579_v51 = vpop.eup %578  ;;  %v225_v55 = vsel %vm183_vm4, 0.0, %v223_v50 }
  0x82   : >> { %v239_v52 = vmul.f32 %v579_v51, %v237_v49  ;;  %v255_v57 = vsel %vm734_vm12, %v225_v55, 0.0 }
  0x84   : >> { %v240_v54 = vsel %vm183_vm4, 0.0, %v239_v52 }
  0x85   : >> { %v245_v56 = vsel %vm734_vm12, %v240_v54, 0.0 }
  0x86   : >> { %246 = vadd.xlane.f32.xlu0 %v245_v56 }
  0x8a   : >> { %256 = vadd.xlane.f32.xlu0 %v255_v57 }
 0x113   : >> { %v247_v58 = vpop.xlane.xlu0 %246 }
 0x114   : >> { %248 = vst [vmem:[#allocation4] sm:$0xff] %v247_v58 }
 0x115   : >> { %250 = vst [vmem:[%s249_s21] sm:$0x1] %v629_v59 }
 0x117   : >> { %v257_v61 = vpop.xlane.xlu0 %256 }
 0x118   : >> { %v263_v62 = vsel %vm734_vm12, %v257_v61, %v262_v60 }
 0x119   : >> { %264 = vst [vmem:[%s703_s19] sm:$0x1] %v263_v62 }
 0x11c   : >> { %v271_v0 = vld [vmem:[%s266_s23] sm:$0xff]  ;;  %s283_s23 = smov %s266_s23 }
 0x11d   : >> { %v273_v1 = vmul.f32 %v272_v63, %v271_v0  ;;  %v291_v12 = vld [vmem:[%s283_s23] sm:$0xff] }
 0x11f   : >> { %v275_v2 = vsel %vm274_vm13, %v273_v1, 0.0 }
 0x120   : >> { %v276_v3 = vrot.slane %v275_v2, 4  ;;  %v318_v4 = vld [vmem:[#allocation2] sm:$0x3] (%p159_p9) }
 0x121   : > { %320 = vst [vmem:[%s145_s15] sm:$0x3] (%p159_p9), %v318_v4 }
 0x122   : >> { %v277_v6 = vadd.f32 %v276_v3, %v275_v2 }
 0x124   : >> { %v278_v7 = vrot.slane %v277_v6, 2 }
 0x126   : >> { %v279_v8 = vadd.f32 %v278_v7, %v277_v6 }
 0x128   : >> { %v280_v9 = vrot.slane %v279_v8, 1 }
 0x12a   : >> { %v281_v10 = vadd.f32 %v280_v9, %v279_v8 }
 0x12c   : >> { %v287_v11 = vmul.f32 %v281_v10, %v257_v61 }
 0x12e   : >> { %v292_v14 = vmul.f32 %v291_v12, %v287_v11 }
 0x130   : >> { %v296_v15 = vsub.f32 %v293_v13, %v292_v14 }
 0x132   : >> { %v297_v16 = vsel %vm295_vm15, %v296_v15, %v293_v13 }
 0x133   : >> { %v305_v17 = vsel %vm304_vm0, %v291_v12, %v297_v16 }
 0x134   : >> { %306 = vst [vmem:[%s282_s18] sm:$0xff] %v305_v17 }
 0x137   : > { %161 = sbr.rel (!%p159_p9) target bundleno = 35 (0x23), region = 175 }
 0x13b   : >> { %v308_v18 = vld [vmem:[%s307_s24] ss:$0 sm:$0xff] }
 0x13c   : >> { %v313_v19 = vsel %vm734_vm12, %v726_v43, %v308_v18 }
 0x13d   : >> { %314 = vst [vmem:[%s307_s24] sm:$0x1] %v313_v19 }
 0x13e   : > { %p368_p10 = scmp.lt.s32.totalorder (%p680_p3), %s614_s11, 0  ;;  %s369_s30 = ssub.s32 (%p680_p3), 0, %s614_s11  ;;  %v391_v20 = vld [vmem:[%s145_s15] sm:$0x3] (%p680_p3) }
 0x13f   : > { %367 = sbr.rel (!%p680_p3) target bundleno = 330 (0x14a), region = 99  ;;  %s516_s3 = smin.u32 (%p680_p3), %s614_s11, %s369_s30 }
 0x140   : > { %s371_s4 = sshrl.u32 (%p680_p3), %s516_s3, 3 }
 0x141   : > { %s372_s5 = ssub.s32 (%p680_p3), 0, %s371_s4 }
 0x144   : > { %v360_v5 = vld [vmem:[%s700_s18] sm:$0xff] }
 0x145   : > { %361 = vst [vmem:[%s332_s29] sm:$0xff] %v360_v5 }
 0x146   : > { %s808_s5 = smov (!%p368_p10, %s372_s5), %s371_s4 }
 0x147   : > { %s517_s6 = sshll.u32 %s808_s5, 1 }
 0x148   : > { %s375_s17 = scalar_lea.vmem %s797_s2, %s517_s6 }
 0x149   : > { %392 = vst [vmem:[%s375_s17] sm:$0x3] %v391_v20 }
 0x14a PF: > { %s9_s13 = sadd.s32 1, %s622_s13   ;;  %s801_s9 = smov %s610_s10 }
 0x14b   : > { %p6_p11 = scmp.ge.s32.totalorder %s9_s13, 4   ;;  %s802_s10 = smov %s686_s25 }
 0x14c   : > { %s803_s11 = smov %s618_s12  ;;  %s804_s12 = smov %s806_s14 }
 0x14d   :  { %8 = sbr.rel (!%p6_p11) target bundleno = 3 (0x3), region = 186 }

// kernel: custom-call.58
= control target key start
LH: loop header
LB: loop body
LE: loop exit
PB: predicated region body
PF: predicated region fallthrough
CT: control target
= control target key end

     0   :  { %s236_s6 = smov 0   ;;  %s263_s0 = inlined_call_operand.vmem [shape: f32[2,3,3], index: 0, kind: input, shape index: {}]   ;;  %s264_s1 = inlined_call_operand.vmem [shape: f32[2,3,3], index: 1, kind: output, shape index: {}]  }
   0x1 LB: > { %s198_s7 = sadd.s32 4294967295, %s224_s6   ;;  %p200_p0 = scmp.ge.s32.totalorder %s224_s6, 2  ;;  %s224_s6 = sphi %s236_s6, %s7_s6  }
   0x2   : > { %s23_s8 = sand.u32 (!%p200_p0), 1, %s224_s6   ;;  %s202_s9 = sshll.u32 (!%p200_p0), %s224_s6, 2 }
   0x3   : > { %21 = sbr.rel (%p200_p0) target bundleno = 10 (0xa), region = 16  ;;  %s201_s10 = sshll.u32 (!%p200_p0), %s23_s8, 2 }
   0x4   : > { %s27_s13 = scalar_lea.vmem (!%p200_p0), %s263_s0, %s202_s9  ;;  %s25_s14 = scalar_lea.vmem (!%p200_p0), [#allocation1], %s201_s10 }
   0x5   : > { %v43_v0 = vld [vmem:[%s27_s13] sm:$0xf] (!%p200_p0) }
   0x6   : > { %44 = vst [vmem:[%s25_s14] sm:$0xf] (!%p200_p0), %v43_v0 }
   0xa PF: > { %p203_p1 = scmp.ge.s32.totalorder %s224_s6, 1  ;;  %p60_p2 = scmp.lt.s32.totalorder %s224_s6, 3 }
   0xc   : > { %p61_p3 = pnand %p203_p1, %p60_p2 }
   0xd   : > { %s252_s15 = sand.u32 (!%p61_p3), 1, %s198_s7   ;;  %v82_v1 = vlaneseq (!%p61_p3)  ;;  %vm96_vm1 = vcmask (!%p61_p3), 23552   ;;  %s207_s19 = sshll.u32 (!%p61_p3), %s198_s7, 2 }
   0xe   : > { %64 = sbr.rel (%p61_p3) target bundleno = 334 (0x14e), region = 50  ;;  %s204_s16 = sshll.u32 (!%p61_p3), %s252_s15, 2 }
   0xf   : > { %s73_s17 = scalar_lea.vmem (!%p61_p3), [#allocation1], %s204_s16  ;;  %v83_v3 = vand.u32 (!%p61_p3), 127, %v82_v1  ;;  %v85_v4 = vshrl.u32 (!%p61_p3), %v82_v1, 7  ;;  %s77_s18 = scalar_lea.vmem (!%p61_p3), [#allocation3], %s204_s16 }
  0x10   : > { %v80_v2 = vld [vmem:[%s73_s17] sm:$0xf] (!%p61_p3)  ;;  %s128_s22 = scalar_lea.vmem (!%p61_p3), %s264_s1, %s207_s19 }
  0x11   : > { %81 = vst [vmem:[#allocation0] sm:$0xf] (!%p61_p3), %v80_v2  ;;  %vm91_vm0 = vcmp.eq.s32.totalorder (!%p61_p3), %v83_v3, 0  ;;  %vm87_vm2 = vcmp.eq.s32.totalorder (!%p61_p3), %v83_v3, %v85_v4  ;;  %vm100_vm3 = vcmp.eq.s32.totalorder (!%p61_p3), %v83_v3, 1  ;;  %vm111_vm4 = vcmp.eq.s32.totalorder (!%p61_p3), %v83_v3, 2 }
  0x18   : > { %v88_v5 = vld [vmem:[#allocation0] sm:$0xff] }
  0x19   : > { %v95_v6 = vld [vmem:[#allocation0 + $0x1] ss:$0 sm:$0xff]  ;;  %v92_v7 = vsel %vm91_vm0, %v88_v5, 1.0  ;;  %v106_v11 = vld [vmem:[#allocation0 + $0x2] ss:$0 sm:$0xff] }
  0x1a   : > { %v97_v8 = vsel %vm96_vm1, %v95_v6, 0.0  ;;  %v93_v9 = vsel %vm87_vm2, %v92_v7, 0.0  ;;  %v108_v12 = vsel %vm96_vm1, %v106_v11, 0.0 }
  0x1b   : > { %v101_v10 = vmul.f32 %v97_v8, %v93_v9 }
  0x1d   : > { %102 = vadd.xlane.f32.xlu0 %v101_v10 }
  0xaa   : > { %v103_v13 = vpop.xlane.xlu0 %102 }
  0xab   : > { %v104_v14 = vsel %vm100_vm3, %v103_v13, %v93_v9 }
  0xac   : > { %v112_v15 = vmul.f32 %v108_v12, %v104_v14 }
  0xae   : > { %113 = vadd.xlane.f32.xlu0 %v112_v15 }
 0x13b   : > { %v114_v16 = vpop.xlane.xlu0 %113 }
 0x13c   : > { %v115_v17 = vsel %vm111_vm4, %v114_v16, %v104_v14 }
 0x13d   : > { %116 = vst [vmem:[#allocation2] sm:$0xff] %v115_v17 }
 0x144   : > { %v120_v18 = vld [vmem:[#allocation2] sm:$0xf] }
 0x145   : > { %122 = vst [vmem:[%s77_s18] sm:$0xf] %v120_v18 }
 0x14c   : > { %v144_v19 = vld [vmem:[%s77_s18] sm:$0xf] }
 0x14d   : > { %145 = vst [vmem:[%s128_s22] sm:$0xf] %v144_v19 }
 0x14e PF: > { %s7_s6 = sadd.s32 1, %s224_s6  }
 0x14f   : > { %p4_p4 = scmp.ge.s32.totalorder %s7_s6, 4  }
 0x151   :  { %6 = sbr.rel (!%p4_p4) target bundleno = 1 (0x1), region = 112 }

// kernel: custom-call.50
= control target key start
LH: loop header
LB: loop body
LE: loop exit
PB: predicated region body
PF: predicated region fallthrough
CT: control target
= control target key end

     0   :  { %s6_s0 = inlined_call_operand.hbm [shape: pred[2], index: 0, kind: output, shape index: {}]  }

// kernel: custom-call.55
= control target key start
LH: loop header
LB: loop body
LE: loop exit
PB: predicated region body
PF: predicated region fallthrough
CT: control target
= control target key end

     0   :  { %s343_s6 = smov 0   ;;  %s345_s7 = smov 0   ;;  %s390_s0 = inlined_call_operand.vmem [shape: f32[2,3,3], index: 0, kind: input, shape index: {}]   ;;  %s391_s1 = inlined_call_operand.vmem [shape: f32[2,3,3], index: 1, kind: output, shape index: {}]  }
   0x1   :  { %s347_s8 = smov 0  }
   0x2 LB: > { %s265_s9 = sadd.s32 4294967295, %s330_s8   ;;  %s26_s10 = sadd.s32 1, %s326_s7  ;;  %s330_s8 = sphi %s347_s8, %s7_s8   ;;  %s326_s7 = sphi %s345_s7, %s393_s7   ;;  %s322_s6 = sphi %s343_s6, %s392_s6  }
   0x3   : > { %p28_p0 = scmp.ge.s32.totalorder %s26_s10, 2  ;;  %p267_p1 = scmp.ge.s32.totalorder %s330_s8, 2 }
   0x4   : > { %s42_s11 = sand.u32 (!%p267_p1), 1, %s330_s8   ;;  %s269_s12 = sshll.u32 (!%p267_p1), %s326_s7, 2 }
   0x5   : > { %s395_s10 = smov (%p28_p0, %s26_s10), 0  ;;  %40 = sbr.rel (%p267_p1) target bundleno = 12 (0xc), region = 16 }
   0x6   : > { %s268_s13 = sshll.u32 (!%p267_p1), %s42_s11, 2  ;;  %s48_s16 = scalar_lea.vmem (!%p267_p1), %s390_s0, %s269_s12 }
   0x7   : > { %v64_v0 = vld [vmem:[%s48_s16] sm:$0xf] (!%p267_p1)  ;;  %s44_s17 = scalar_lea.vmem (!%p267_p1), [#allocation1], %s268_s13 }
   0x8   : > { %65 = vst [vmem:[%s44_s17] sm:$0xf] (!%p267_p1), %v64_v0 }
   0xc PF: > { %p270_p2 = scmp.ge.s32.totalorder %s330_s8, 1  ;;  %p81_p3 = scmp.lt.s32.totalorder %s330_s8, 3 }
   0xe   : > { %p82_p4 = pnand %p270_p2, %p81_p3 }
   0xf   : > { %v332_v1 = vmov (!%p82_p4), 0.0   ;;  %s370_s18 = sand.u32 (!%p82_p4), 1, %s265_s9   ;;  %vm104_vm0 = vcmask (!%p82_p4), 7168   ;;  %vm122_vm1 = vcmask (!%p82_p4), 15368   ;;  %vm139_vm2 = vcmask (!%p82_p4), 1047553   ;;  %s274_s22 = sshll.u32 (!%p82_p4), %s322_s6, 2 }
  0x10   : > { %85 = sbr.rel (%p82_p4) target bundleno = 541 (0x21d), region = 50  ;;  %103 = vst [vmem:[#allocation2] sm:$0xff] (!%p82_p4), %v332_v1  ;;  %s271_s19 = sshll.u32 (!%p82_p4), %s370_s18, 2  ;;  %vm140_vm3 = vmand (!%p82_p4), %vm122_vm1, %vm139_vm2  ;;  %vm144_vm4 = vcmask (!%p82_p4), 23568   ;;  %vm161_vm5 = vcmask (!%p82_p4), 1047554  }
  0x11   : > { %s94_s20 = scalar_lea.vmem (!%p82_p4), [#allocation1], %s271_s19  ;;  %vm162_vm6 = vmand (!%p82_p4), %vm144_vm4, %vm161_vm5  ;;  %s98_s21 = scalar_lea.vmem (!%p82_p4), [#allocation3], %s271_s19 }
  0x12   : > { %v101_v5 = vld [vmem:[%s94_s20] sm:$0xf] (!%p82_p4)  ;;  %s179_s25 = scalar_lea.vmem (!%p82_p4), %s391_s1, %s274_s22 }
  0x13   : > { %102 = vst [vmem:[#allocation0] sm:$0xf] (!%p82_p4), %v101_v5 }
  0x17   : > { %v105_v2 = vld [vmem:[#allocation2] ss:$0 sm:$0xff] }
  0x18   : > { %v107_v3 = vmul.f32 %v105_v2, %v105_v2  ;;  %v114_v4 = vmul.f32 0.0, %v105_v2 }
  0x1a   : > { %108 = vadd.xlane.f32.xlu0 %v107_v3  ;;  %v106_v6 = vld [vmem:[#allocation0] ss:$0 sm:$0xff]  ;;  %v126_v18 = vld [vmem:[#allocation0 + $0x1] ss:$0 sm:$0xff]  ;;  %v148_v30 = vld [vmem:[#allocation0 + $0x2] ss:$0 sm:$0xff] }
  0x1b   : > { %v112_v10 = vld [vmem:[#allocation0] sm:$0xff] }
  0x1e   : > { %115 = vadd.xlane.f32.xlu0 %v114_v4 }
  0xa7   : > { %v109_v7 = vpop.xlane.xlu0 %108 }
  0xa8   : > { %v110_v8 = vsub.f32 %v106_v6, %v109_v7 }
  0xaa   : > { %302 = vrsqrt.f32 %v110_v8 }
  0xab   : > { %v116_v9 = vpop.xlane.xlu0 %115 }
  0xac   : > { %v117_v11 = vsub.f32 %v112_v10, %v116_v9 }
  0xb4   : > { %v303_v12 = vpop.eup %302 }
  0xb5   : > { %v118_v13 = vmul.f32 %v303_v12, %v117_v11 }
  0xb7   : > { %v119_v14 = vsel %vm104_vm0, %v118_v13, 0.0 }
  0xb8   : > { %121 = vst [vmem:[#allocation2] sm:$0xff] %v119_v14 }
  0xbf   : > { %v124_v15 = vld [vmem:[#allocation2 + $0x1] ss:$0 sm:$0xff] }
  0xc0   : > { %v127_v16 = vmul.f32 %v124_v15, %v124_v15  ;;  %v134_v17 = vmul.f32 %v124_v15, %v119_v14 }
  0xc2   : > { %128 = vadd.xlane.f32.xlu1 %v127_v16 }
  0xc6   : > { %135 = vadd.xlane.f32.xlu1 %v134_v17 }
 0x14f   : > { %v129_v19 = vpop.xlane.xlu1 %128 }
 0x150   : > { %v130_v20 = vsub.f32 %v126_v18, %v129_v19 }
 0x152   : > { %304 = vrsqrt.f32 %v130_v20 }
 0x153   : > { %v136_v21 = vpop.xlane.xlu1 %135 }
 0x154   : > { %v137_v22 = vsub.f32 %v112_v10, %v136_v21 }
 0x15c   : > { %v305_v23 = vpop.eup %304 }
 0x15d   : > { %v138_v24 = vmul.f32 %v305_v23, %v137_v22 }
 0x15f   : > { %v141_v25 = vsel %vm140_vm3, %v138_v24, 0.0 }
 0x160   : > { %v142_v26 = vadd.f32 %v141_v25, %v119_v14 }
 0x162   : > { %143 = vst [vmem:[#allocation2] sm:$0xff] %v142_v26 }
 0x169   : > { %v146_v27 = vld [vmem:[#allocation2 + $0x2] ss:$0 sm:$0xff] }
 0x16a   : > { %v156_v28 = vmul.f32 %v146_v27, %v142_v26  ;;  %v149_v29 = vmul.f32 %v146_v27, %v146_v27 }
 0x16c   : > { %157 = vadd.xlane.f32.xlu1 %v156_v28  ;;  %150 = vadd.xlane.f32.xlu0 %v149_v29 }
 0x1f9   : > { %v151_v31 = vpop.xlane.xlu0 %150  ;;  %v158_v33 = vpop.xlane.xlu1 %157 }
 0x1fa   : > { %v152_v32 = vsub.f32 %v148_v30, %v151_v31  ;;  %v159_v34 = vsub.f32 %v112_v10, %v158_v33 }
 0x1fc   : > { %306 = vrsqrt.f32 %v152_v32 }
 0x206   : > { %v307_v35 = vpop.eup %306 }
 0x207   : > { %v160_v36 = vmul.f32 %v307_v35, %v159_v34 }
 0x209   : > { %v163_v37 = vsel %vm162_vm6, %v160_v36, 0.0 }
 0x20a   : > { %v164_v38 = vadd.f32 %v163_v37, %v142_v26 }
 0x20c   : > { %165 = vst [vmem:[#allocation2] sm:$0xff] %v164_v38 }
 0x213   : > { %v169_v39 = vld [vmem:[#allocation2] sm:$0xf] }
 0x214   : > { %171 = vst [vmem:[%s98_s21] sm:$0xf] %v169_v39 }
 0x21b   : > { %v195_v40 = vld [vmem:[%s98_s21] sm:$0xf] }
 0x21c   : > { %196 = vst [vmem:[%s179_s25] sm:$0xf] %v195_v40 }
 0x21d PF: > { %s7_s8 = sadd.s32 1, %s330_s8   ;;  %s392_s6 = smov %s326_s7 }
 0x21e   : > { %p4_p5 = scmp.ge.s32.totalorder %s7_s8, 4   ;;  %s393_s7 = smov %s395_s10 }
 0x220   :  { %6 = sbr.rel (!%p4_p5) target bundleno = 2 (0x2), region = 114 }

// kernel: custom-call.56
= control target key start
LH: loop header
LB: loop body
LE: loop exit
PB: predicated region body
PF: predicated region fallthrough
CT: control target
= control target key end

     0   :  { %s343_s6 = smov 0   ;;  %s345_s7 = smov 0   ;;  %s390_s0 = inlined_call_operand.vmem [shape: f32[2,1,3,3], index: 0, kind: input, shape index: {}]   ;;  %s391_s1 = inlined_call_operand.vmem [shape: f32[2,1,3,3], index: 1, kind: output, shape index: {}]  }
   0x1   :  { %s347_s8 = smov 0  }
   0x2 LB: > { %s269_s9 = sadd.s32 4294967295, %s330_s8   ;;  %s33_s10 = sadd.s32 1, %s326_s7  ;;  %s330_s8 = sphi %s347_s8, %s7_s8   ;;  %s326_s7 = sphi %s345_s7, %s393_s7   ;;  %s322_s6 = sphi %s343_s6, %s392_s6  }
   0x3   : > { %p35_p0 = scmp.ge.s32.totalorder %s33_s10, 2  ;;  %p271_p1 = scmp.ge.s32.totalorder %s330_s8, 2 }
   0x4   : > { %s49_s11 = sand.u32 (!%p271_p1), 1, %s330_s8   ;;  %s273_s12 = sshll.u32 (!%p271_p1), %s326_s7, 2 }
   0x5   : > { %s395_s10 = smov (%p35_p0, %s33_s10), 0  ;;  %47 = sbr.rel (%p271_p1) target bundleno = 12 (0xc), region = 16 }
   0x6   : > { %s272_s13 = sshll.u32 (!%p271_p1), %s49_s11, 2  ;;  %s56_s16 = scalar_lea.vmem (!%p271_p1), %s390_s0, %s273_s12 }
   0x7   : > { %v72_v0 = vld [vmem:[%s56_s16] sm:$0xf] (!%p271_p1)  ;;  %s51_s17 = scalar_lea.vmem (!%p271_p1), [#allocation1], %s272_s13 }
   0x8   : > { %73 = vst [vmem:[%s51_s17] sm:$0xf] (!%p271_p1), %v72_v0 }
   0xc PF: > { %p274_p2 = scmp.ge.s32.totalorder %s330_s8, 1  ;;  %p89_p3 = scmp.lt.s32.totalorder %s330_s8, 3 }
   0xe   : > { %p90_p4 = pnand %p274_p2, %p89_p3 }
  0x10   : > { %93 = sbr.rel (%p90_p4) target bundleno = 511 (0x1ff), region = 50 }
  0x17   : > { %s370_s18 = sand.u32 1, %s269_s9   ;;  %v111_v1 = vlaneseq  ;;  %v332_v11 = vmov -1.0   ;;  %s278_s22 = sshll.u32 %s322_s6, 2 }
  0x18   : > { %s275_s19 = sshll.u32 %s370_s18, 2  ;;  %s178_s25 = scalar_lea.vmem %s391_s1, %s278_s22 }
  0x19   : > { %s102_s20 = scalar_lea.vmem [#allocation1], %s275_s19  ;;  %v112_v3 = vand.u32 127, %v111_v1  ;;  %v115_v4 = vshrl.u32 %v111_v1, 7  ;;  %s106_s21 = scalar_lea.vmem [#allocation3], %s275_s19 }
  0x1a   : > { %v109_v2 = vld [vmem:[%s102_s20] sm:$0xf] }
  0x1b   : > { %110 = vst [vmem:[#allocation0] sm:$0xf] %v109_v2  ;;  %vm113_vm0 = vcmp.lt.s32.totalorder %v112_v3, 3  ;;  %vm122_vm1 = vcmp.ge.s32.totalorder %v115_v4, %v112_v3  ;;  %vm117_vm2 = vcmp.eq.s32.totalorder %v115_v4, %v112_v3  ;;  %vm136_vm4 = vcmp.eq.s32.totalorder %v112_v3, 0 }
  0x1c   : > { %vm123_vm3 = vmand %vm122_vm1, %vm113_vm0  ;;  %vm133_vm5 = vcmp.eq.s32.totalorder %v112_v3, %v115_v4  ;;  %v137_v12 = vsel %vm136_vm4, 1.0, %v332_v11  ;;  %vm144_vm6 = vcmp.eq.s32.totalorder %v112_v3, 1  ;;  %vm154_vm7 = vcmp.eq.s32.totalorder %v112_v3, 2 }
  0x1d   : > { %v138_v13 = vsel %vm133_vm5, %v137_v12, 0.0 }
  0x22   : > { %v118_v5 = vld [vmem:[#allocation0] sm:$0xff] }
  0x23   : > { %v119_v6 = vsel %vm117_vm2, %v118_v5, 0.0  ;;  %v124_v7 = vsel %vm123_vm3, %v118_v5, 0.0 }
  0x24   : > { %120 = vadd.xlane.f32.xlu0 %v119_v6 }
  0xb1   : > { %v121_v8 = vpop.xlane.xlu0 %120 }
  0xb2   : > { %306 = vrcp.f32 %v121_v8  ;;  %vm161_vm8 = vweird.f32 %v121_v8 }
  0xbc   : > { %v307_v9 = vpop.eup %306 }
  0xbd   : > { %v126_v10 = vmul.f32 %v307_v9, %v124_v7 }
  0xbf   : > { %127 = vst [vmem:[#allocation4] sm:$0xff] %v126_v10 }
  0xc6   : > { %v140_v14 = vld [vmem:[#allocation4 + $0x1] ss:$0 sm:$0xff]  ;;  %v150_v17 = vld [vmem:[#allocation4 + $0x2] ss:$0 sm:$0xff] }
  0xc7   : > { %v141_v15 = vxor.u32 2147483648, %v140_v14  ;;  %v151_v19 = vxor.u32 2147483648, %v150_v17 }
  0xc9   : > { %v145_v16 = vmul.f32 %v141_v15, %v138_v13 }
  0xcb   : > { %146 = vadd.xlane.f32.xlu0 %v145_v16 }
 0x158   : > { %v147_v18 = vpop.xlane.xlu0 %146 }
 0x159   : > { %v148_v20 = vsel %vm144_vm6, %v147_v18, %v138_v13 }
 0x15a   : > { %v155_v21 = vmul.f32 %v151_v19, %v148_v20 }
 0x15c   : > { %156 = vadd.xlane.f32.xlu1 %v155_v21 }
 0x1e9   : > { %v157_v22 = vpop.xlane.xlu1 %156 }
 0x1ea   : > { %v158_v23 = vsel %vm154_vm7, %v157_v22, %v148_v20 }
 0x1eb   : > { %v160_v24 = vmul.f32 %v307_v9, %v158_v23 }
 0x1ed   : > { %v162_v25 = vsel %vm161_vm8, %v158_v23, %v160_v24 }
 0x1ee   : > { %163 = vst [vmem:[#allocation2] sm:$0xff] %v162_v25 }
 0x1f5   : > { %v167_v26 = vld [vmem:[#allocation2] sm:$0xf] }
 0x1f6   : > { %169 = vst [vmem:[%s106_s21] sm:$0xf] %v167_v26 }
 0x1fd   : > { %v194_v27 = vld [vmem:[%s106_s21] sm:$0xf] }
 0x1fe   : > { %195 = vst [vmem:[%s178_s25] sm:$0xf] %v194_v27 }
 0x1ff PF: > { %s7_s8 = sadd.s32 1, %s330_s8   ;;  %s392_s6 = smov %s326_s7 }
 0x200   : > { %p4_p5 = scmp.ge.s32.totalorder %s7_s8, 4   ;;  %s393_s7 = smov %s395_s10 }
 0x202   :  { %6 = sbr.rel (!%p4_p5) target bundleno = 2 (0x2), region = 112 }

// kernel: _iteration_step.1
= control target key start
LH: loop header
LB: loop body
LE: loop exit
PB: predicated region body
PF: predicated region fallthrough
CT: control target
= control target key end

     0   :  { %s2692_s0 = inlined_call_operand.vmem [shape: f32[2], index: 0, kind: input, shape index: {}]   ;;  %s2693_s1 = inlined_call_operand.vmem [shape: f32[2], index: 1, kind: input, shape index: {}]   ;;  %s2694_s2 = inlined_call_operand.vmem [shape: f32[2], index: 2, kind: input, shape index: {}]   ;;  %s2695_s3 = inlined_call_operand.vmem [shape: f32[2,136,6], index: 3, kind: input, shape index: {}]   ;;  %s2696_s4 = inlined_call_operand.vmem [shape: f32[6,32], index: 4, kind: input, shape index: {}]   ;;  %s2697_s5 = inlined_call_operand.vmem [shape: f32[1,32], index: 5, kind: input, shape index: {}]   ;;  %s2698_s6 = inlined_call_operand.vmem [shape: f32[32,32], index: 6, kind: input, shape index: {}]   ;;  %s2699_s7 = inlined_call_operand.vmem [shape: f32[1,32], index: 7, kind: input, shape index: {}]   ;;  %s2700_s8 = inlined_call_operand.hbm [shape: f32[2,8,128], index: 8, kind: output, shape index: {0}]   ;;  %s2701_s9 = inlined_call_operand.vmem [shape: f32[2,8,128], index: 9, kind: output, shape index: {1}]  }
   0x1   :  { %2705 = sst [smem:[#allocation13_spill]] %s2692_s0 }
   0x2   :  { %2706 = sst [smem:[#allocation14_spill]] %s2693_s1 }
   0x3   :  { %15 = vsyncpa [#allocation5], 0 }
   0x4   :  { %16 = vsyncpa [#allocation7], 0 }
   0x5   :  { %17 = vsyncpa [#allocation4], 0 }
   0x6   :  { %19 = vsyncpa [#allocation4 + $0x1], 0  ;;  %s2210_s30 = smov 0   ;;  %s2212_s10 = smov 0  }
   0x7   :  { %s2214_s11 = smov 0   ;;  %s2216_s12 = smov 0  }
   0x8 LB: > { %s2231_s13 = sadd.s32 4294967295, %s2150_s12   ;;  %s1594_s14 = sadd.s32 4294967294, %s2150_s12   ;;  %s2150_s12 = sphi %s2216_s12, %s2725_s12   ;;  %s2146_s11 = sphi %s2214_s11, %s2724_s11   ;;  %s2142_s10 = sphi %s2212_s10, %s2723_s10   ;;  %s2138_s30 = sphi %s2210_s30, %s2722_s30  }
   0x9   : > { %s2235_s15 = sadd.s32 1, %s2150_s12   ;;  %s205_s16 = sadd.s32 1, %s2146_s11 }
   0xa   : > { %s202_s17 = ssub.s32 %s2150_s12, %s2235_s15  ;;  %p215_p0 = scmp.ne.s32.totalorder %s2146_s11, %s2142_s10 }
   0xb   : > { %p203_p1 = scmp.eq.s32.totalorder %s202_s17, 0  ;;  %p216_p2 = scmp.eq.s32.totalorder %s2231_s13, 1 }
   0xc   : > { %p221_p3 = scmp.ne.s32.totalorder %s2142_s10, %s2138_s30  ;;  %p222_p4 = scmp.eq.s32.totalorder %s1594_s14, 1 }
   0xd   : > { %s2246_s18 = scalar_select %p203_p1, %s2146_s11, %s205_s16  }
   0xe   : > { %p2248_p5 = por %p216_p2, %p215_p0  ;;  %p2252_p6 = por %p222_p4, %p221_p3 }
   0xf   : > { %p1595_p7 = scmp.ge.s32.totalorder %s2150_s12, 1  ;;  %p255_p8 = scmp.lt.s32.totalorder %s2150_s12, 3 }
  0x10   : > { %s2707_s19 = scalar_select %p2248_p5, 1, 0 }
  0x11   : > { %s2708_s20 = scalar_select %p2252_p6, 1, 0 }
  0x12   : > { %p2702_p9 = scmp.eq.s32.totalorder %s2231_s13, 0  ;;  %p2259_p10 = pnand %p1595_p7, %p255_p8 }
  0x13   : > { %s2710_s1 = sld [smem:[#allocation14_spill]]  ;;  %s2711_s0 = sld [smem:[#allocation13_spill]] }
  0x14   : > { %s2709_s21 = scalar_select %p2259_p10, 1, 0 }
  0x15   : > { %p1921_p11 = pneg %p2259_p10  ;;  %s290_s16 = sshll.u32 %s2694_s2, 4  ;;  %s2280_s16 = int_to_ptr.vmem [resolvable:$true] %s290_s16 }
  0x17   : > { %p2273_p12 = pnand %p2702_p9, %p1921_p11 }
  0x19   : > { %s279_s24 = sshll.u32 %s2710_s1, 4  ;;  %s268_s27 = sshll.u32 %s2711_s0, 4  ;;  %s280_s24 = int_to_ptr.vmem [resolvable:$true] %s279_s24  ;;  %s269_s27 = int_to_ptr.vmem [resolvable:$true] %s268_s27 }
  0x1a   : > { %s2035_s17 = scalar_lea.vmem %s280_s24, 16  ;;  %p2037_p0 = pneg %p2273_p12 }
  0x1b   : > { %p2036_p13 = scmp.ne.s32.totalorder %s280_s24, %s2035_s17  ;;  %p2043_p3 = scmp.lt.s32.totalorder %s280_s24, %s280_s24 }
  0x1c   : > { %p2044_p4 = scmp.lt.s32.totalorder %s2035_s17, %s2035_s17 }
  0x1d   : > { %p2038_p1 = pnand %p2037_p0, %p2036_p13 }
  0x1e   : > { %p2045_p7 = por %p2044_p4, %p2043_p3 }
  0x1f   : > { %p2039_p2 = pneg %p2038_p1 }
  0x21   : > { %p2046_p8 = pnand %p2045_p7, %p2039_p2 }
  0x23   : > { %2049 = shalt.err (!%p2046_p8)
}
  0x24   : > { %s2152_s22 = smov [#allocation6]   ;;  %s2050_s23 = scalar_lea.vmem %s269_s27, 16 }
  0x25   : > { %1927 = dma.vmem_to_smem (!%p2273_p12), %s280_s24, 16, %s2152_s22, [#allocation7]  }
  0x26   : > { %p2051_p11 = scmp.ne.s32.totalorder %s269_s27, %s2050_s23  ;;  %p2058_p5 = scmp.lt.s32.totalorder %s269_s27, %s269_s27 }
  0x27   : > { %p2059_p10 = scmp.lt.s32.totalorder %s2050_s23, %s2050_s23 }
  0x28   : > { %p2053_p9 = pnand %p2051_p11, %p2037_p0 }
  0x29   : > { %p2060_p13 = por %p2059_p10, %p2058_p5 }
  0x2a   : > { %p2054_p6 = pneg %p2053_p9 }
  0x2c   : > { %p2061_p1 = pnand %p2060_p13, %p2054_p6 }
  0x2e   : > { %2064 = shalt.err (!%p2061_p1)
}
  0x2f   : > { %s2153_s25 = smov [#allocation3]   ;;  %s2065_s24 = scalar_lea.vmem %s2280_s16, 16 }
  0x30   : > { %1924 = dma.vmem_to_smem (!%p2273_p12), %s269_s27, 16, %s2153_s25, [#allocation5]  }
  0x31   : > { %p2066_p2 = scmp.ne.s32.totalorder %s2280_s16, %s2065_s24  ;;  %p2073_p9 = scmp.lt.s32.totalorder %s2280_s16, %s2280_s16 }
  0x32   : > { %p2074_p7 = scmp.lt.s32.totalorder %s2065_s24, %s2065_s24 }
  0x33   : > { %p2068_p3 = pnand %p2066_p2, %p2037_p0 }
  0x34   : > { %p2075_p5 = por %p2074_p7, %p2073_p9 }
  0x35   : > { %p2069_p4 = pneg %p2068_p3 }
  0x37   : > { %p2076_p6 = pnand %p2075_p5, %p2069_p4 }
  0x39   : > { %2079 = shalt.err (!%p2076_p6)
}
  0x3a   : > { %s2154_s26 = smov [#allocation8]   ;;  %p2713_p10 = scmp.ne.s32.totalorder %s2709_s21, 0 }
  0x3b   : > { %1930 = dma.vmem_to_smem (!%p2273_p12), %s2280_s16, 16, %s2154_s26, [#allocation7]  }
  0x3c   : > { %323 = sbr.rel (%p2713_p10) target bundleno = 2712 (0xa98), region = 52  ;;  %p2714_p8 = scmp.eq.s32.totalorder (!%p2713_p10), %s2231_s13, 0 }
  0x43   : > { %2125 = dma.done.wait (%p2714_p8), [#allocation5], 16   ;;  %p2715_p0 = pmov %p2714_p8 }
  0x45   : > { %2127 = vsyncadd (%p2715_p0), [#allocation5], 4294967280  ;;  %p2716_p11 = pmov %p2715_p0 }
  0x46   : > { %p2717_p13 = pmov %p2715_p0 }
  0x47   : > { %2129 = dma.done.wait (%p2716_p11), [#allocation7], 32  }
  0x48   : > { %2131 = vsyncadd (%p2717_p13), [#allocation7], 4294967264 }
  0x49   : > { %337 = sfence }
  0x4a   : > { %v398_v0 = vld [vmem:[%s2696_s4] sm:$0x3f]  ;;  %vm458_vm0 = vcmask 1045504   ;;  %p372_p12 = scmp.lt.s32.totalorder %s2231_s13, 1  ;;  %v2155_v1 = vmov 0.0   ;;  %vm2156_vm1 = vmmov 0  }
  0x4b   : > { %1721 = vmatprep.subr.mxu0 %v2155_v1  ;;  %1723 = vmatprep.mubr.msk.f32.mxu0 %vm2156_vm1, %v2155_v1  ;;  %v629_v2 = vld [vmem:[%s2698_s6] sm:$0xff]  ;;  %v630_v3 = vld [vmem:[%s2698_s6 + $0x8] sm:$0xff]  ;;  %v2157_v4 = vmov 0.0|0.0   ;;  %vm406_vm2 = vcmask 48128   ;;  %v631_v23 = vld [vmem:[%s2698_s6 + $0x10] sm:$0xff]  ;;  %vm640_vm3 = vcmask 261120  }
  0x4c   : > { %1722 = vmatpush3.msk.msra.mxu0 %vm458_vm0, %v398_v0  ;;  %s2328_s17 = scalar_select %p372_p12, %s2231_s13, 1  ;;  %1868 = vmatprep.subr.bf16.mxu1 %v2157_v4  ;;  %v1869_v5 = vpack.c.bf16 %v630_v3, %v629_v2  ;;  %v632_v24 = vld [vmem:[%s2698_s6 + $0x18] sm:$0xff]  ;;  %v2418_v26 = vld [vmem:[%s2697_s5] ss:$0 sm:$0xff]  ;;  %vm2498_vm4 = vmpackc.low %vm640_vm3, %vm640_vm3  ;;  %vm1060_vm6 = vcmask 130112   ;;  %vm1067_vm7 = vcmask 195712  }
  0x4d   : > { %1782 = vmatprep.mubr.msk.f32.mxu1 %vm2156_vm1, %v2155_v1  ;;  %1874 = vmatprep.subr.bf16.mxu0 %v2157_v4  ;;  %v1872_v25 = vpack.c.bf16 %v632_v24, %v631_v23  ;;  %s2559_s23 = sld [smem:[#allocation8 + %s2231_s13]]  ;;  %vm1074_vm8 = vcmask 261312   ;;  %vm1081_vm9 = vcmask 326912   ;;  %vm1088_vm10 = vcmask 392512   ;;  %s363_s27 = sand.u32 1, %s2142_s10  }
  0x4e   : > { %s1906_s22 = smul.u32 136, %s2328_s17  ;;  %1870 = vmatpush3.bf16.msra.mxu1 %v1869_v5  ;;  %vm1095_vm11 = vcmask 458112   ;;  %vm1102_vm12 = vcmask 523712   ;;  %vm1109_vm13 = vcmask 589312   ;;  %s2605_s25 = sld [smem:[#allocation3 + %s2231_s13]]  ;;  %vm1116_vm14 = vcmask 654912  }
  0x4f   : > { %1871 = vmatprep.subr.bf16.mxu1 %v2157_v4  ;;  %vm1123_vm15 = vcmask 720512   ;;  %vm1130_vm0 = vcmask 786112   ;;  %s2621_s28 = sshll.u32 %s363_s27, 3  ;;  %s1662_s29 = sshll.u32 %s2231_s13, 7 }
  0x50   : > { %s2339_s24 = scalar_lea.vmem %s2695_s3, %s1906_s22  ;;  %s365_s21 = scalar_lea.vmem [#allocation9], %s2621_s28 }
  0x51   : > { %v381_v6 = vld [vmem:[%s2339_s24] sm:$0xff]  ;;  %v382_v7 = vld [vmem:[%s2339_s24 + $0x8] sm:$0xff]  ;;  %v383_v8 = vld [vmem:[%s2339_s24 + $0x10] sm:$0xff]  ;;  %s1477_s14 = sshll.u32 %s365_s21, 4  ;;  %p2720_p2 = scmp.ne.s32.totalorder %s2707_s19, 0  ;;  %s1478_s14 = int_to_ptr.vmem [resolvable:$true] %s1477_s14 }
  0x52   : > { %1724 = vmatmul.mubr.msk.f32.vlgmr.msra.gmra.mrb[0].mxu0 %vm406_vm2, %v381_v6  ;;  %v384_v9 = vld [vmem:[%s2339_s24 + $0x18] sm:$0xff]  ;;  %v385_v10 = vld [vmem:[%s2339_s24 + $0x20] sm:$0xff]  ;;  %v386_v11 = vld [vmem:[%s2339_s24 + $0x28] sm:$0xff]  ;;  %1873 = vmatpush3.bf16.msra.mxu1 %v1872_v25 }
  0x53   : > { %1726 = vmatprep.mubr.msk.f32.mxu0 %vm2156_vm1, %v2155_v1  ;;  %v387_v12 = vld [vmem:[%s2339_s24 + $0x30] sm:$0xff]  ;;  %v388_v13 = vld [vmem:[%s2339_s24 + $0x38] sm:$0xff]  ;;  %v389_v14 = vld [vmem:[%s2339_s24 + $0x40] sm:$0xff] }
  0x54   : > { %v390_v15 = vld [vmem:[%s2339_s24 + $0x48] sm:$0xff]  ;;  %v391_v16 = vld [vmem:[%s2339_s24 + $0x50] sm:$0xff]  ;;  %v392_v17 = vld [vmem:[%s2339_s24 + $0x58] sm:$0xff]  ;;  %s1179_s26 = ssub.f32 0.0, %s2605_s25  ;;  %s1460_s25 = scalar_lea.sflag [#allocation4], %s363_s27 }
  0x55   : > { %v393_v18 = vld [vmem:[%s2339_s24 + $0x60] sm:$0xff]  ;;  %v394_v19 = vld [vmem:[%s2339_s24 + $0x68] sm:$0xff]  ;;  %v395_v20 = vld [vmem:[%s2339_s24 + $0x70] sm:$0xff] }
  0x56   : > { %1727 = vmatmul.mubr.msk.f32.gmra.mrb[2].mxu0 %vm406_vm2, %v382_v7  ;;  %v396_v21 = vld [vmem:[%s2339_s24 + $0x78] sm:$0xff]  ;;  %v397_v22 = vld [vmem:[%s2339_s24 + $0x80] sm:$0xff]  ;;  %s1177_s24 = sld [smem:[#allocation6 + %s2231_s13]] }
  0x57   : > { %1729 = vmatprep.mubr.msk.f32.mxu0 %vm2156_vm1, %v2155_v1 }
  0x5a   : > { %1730 = vmatmul.mubr.msk.f32.gmra.mrb[4].mxu0 %vm406_vm2, %v383_v8 }
  0x5b   : > { %1732 = vmatprep.mubr.msk.f32.mxu0 %vm2156_vm1, %v2155_v1 }
  0x5e   : > { %1733 = vmatmul.mubr.msk.f32.gmra.mrb[6].mxu0 %vm406_vm2, %v384_v9 }
  0x5f   : > { %1735 = vmatprep.mubr.msk.f32.mxu0 %vm2156_vm1, %v2155_v1 }
  0x62   : > { %1736 = vmatmul.mubr.msk.f32.gmra.mrb[8].mxu0 %vm406_vm2, %v385_v10 }
  0x63   : > { %1738 = vmatprep.mubr.msk.f32.mxu0 %vm2156_vm1, %v2155_v1 }
  0x66   : > { %1739 = vmatmul.mubr.msk.f32.gmra.mrb[10].mxu0 %vm406_vm2, %v386_v11 }
  0x67   : > { %1741 = vmatprep.mubr.msk.f32.mxu0 %vm2156_vm1, %v2155_v1 }
  0x6a   : > { %1742 = vmatmul.mubr.msk.f32.gmra.mrb[12].mxu0 %vm406_vm2, %v387_v12 }
  0x6b   : > { %1744 = vmatprep.mubr.msk.f32.mxu0 %vm2156_vm1, %v2155_v1 }
  0x6e   : > { %1745 = vmatmul.mubr.msk.f32.gmra.mrb[14].mxu0 %vm406_vm2, %v388_v13 }
  0x6f   : > { %1747 = vmatprep.mubr.msk.f32.mxu0 %vm2156_vm1, %v2155_v1 }
  0x72   : > { %1748 = vmatmul.mubr.msk.f32.gmra.mrb[16].mxu0 %vm406_vm2, %v389_v14 }
  0x73   : > { %1750 = vmatprep.mubr.msk.f32.mxu0 %vm2156_vm1, %v2155_v1 }
  0x76   : > { %1751 = vmatmul.mubr.msk.f32.gmra.mrb[18].mxu0 %vm406_vm2, %v390_v15 }
  0x77   : > { %1753 = vmatprep.mubr.msk.f32.mxu0 %vm2156_vm1, %v2155_v1 }
  0x7a   : > { %1754 = vmatmul.mubr.msk.f32.gmra.mrb[20].mxu0 %vm406_vm2, %v391_v16 }
  0x7b   : > { %1756 = vmatprep.mubr.msk.f32.mxu0 %vm2156_vm1, %v2155_v1 }
  0x7e   : > { %1757 = vmatmul.mubr.msk.f32.gmra.mrb[22].mxu0 %vm406_vm2, %v392_v17 }
  0x7f   : > { %1759 = vmatprep.mubr.msk.f32.mxu0 %vm2156_vm1, %v2155_v1 }
  0x82   : > { %1760 = vmatmul.mubr.msk.f32.gmra.mrb[24].mxu0 %vm406_vm2, %v393_v18 }
  0x83   : > { %1762 = vmatprep.mubr.msk.f32.mxu0 %vm2156_vm1, %v2155_v1 }
  0x86   : > { %1763 = vmatmul.mubr.msk.f32.gmra.mrb[26].mxu0 %vm406_vm2, %v394_v19 }
  0x87   : > { %1765 = vmatprep.mubr.msk.f32.mxu0 %vm2156_vm1, %v2155_v1 }
  0x8a   : > { %1766 = vmatmul.mubr.msk.f32.gmra.mrb[28].mxu0 %vm406_vm2, %v395_v20 }
  0x8b   : > { %1768 = vmatprep.mubr.msk.f32.mxu0 %vm2156_vm1, %v2155_v1 }
  0x8e   : > { %1769 = vmatmul.mubr.msk.f32.gmra.mrb[30].mxu0 %vm406_vm2, %v396_v21 }
  0x8f   : > { %1771 = vmatprep.mubr.msk.f32.mxu0 %vm2156_vm1, %v2155_v1 }
  0x92   : > { %1772 = vmatmul.mubr.msk.f32.gmra.mrb[32].mxu0 %vm406_vm2, %v397_v22  ;;  %vm1144_vm2 = vcmask 917312  }
  0x93   : > { %1865 = vmatprep.mubr.msk.f32.mxu0 %vm2156_vm1, %v2155_v1 }
 0x125   : > { %v528_v27 = vpop.f32.mrb[0].mxu0 }
 0x126   : > { %v529_v28 = vadd.f32 %v2418_v26, %v528_v27  ;;  %v1725_v29 = vpop.f32.mrb[1].mxu0 }
 0x128   : > { %v612_v30 = vmax.f32 %v529_v28, 0.0 }
 0x129   : > { %v533_v31 = vpop.f32.mrb[2].mxu0 }
 0x12a   : > { %v534_v32 = vadd.f32 %v2418_v26, %v533_v31  ;;  %v1728_v33 = vpop.f32.mrb[3].mxu0  ;;  %1783 = vmatmul.mubr.msk.f32.vlgmr.msra.gmra.mrb[0].mxu1 %vm640_vm3, %v612_v30 }
 0x12b   : > { %1785 = vmatprep.mubr.msk.f32.mxu1 %vm2156_vm1, %v2155_v1 }
 0x12c   : > { %v613_v34 = vmax.f32 %v534_v32, 0.0 }
 0x12d   : > { %v538_v35 = vpop.f32.mrb[4].mxu0 }
 0x12e   : > { %v539_v36 = vadd.f32 %v2418_v26, %v538_v35  ;;  %v1731_v37 = vpop.f32.mrb[5].mxu0  ;;  %1786 = vmatmul.mubr.msk.f32.gmra.mrb[2].mxu1 %vm640_vm3, %v613_v34 }
 0x12f   : > { %1788 = vmatprep.mubr.msk.f32.mxu1 %vm2156_vm1, %v2155_v1 }
 0x130   : > { %v614_v38 = vmax.f32 %v539_v36, 0.0  ;;  %v2491_v36 = vld [vmem:[%s2699_s7] ss:$0 sm:$0xff] }
 0x131   : > { %v543_v39 = vpop.f32.mrb[6].mxu0 }
 0x132   : > { %v544_v40 = vadd.f32 %v2418_v26, %v543_v39  ;;  %v1734_v41 = vpop.f32.mrb[7].mxu0  ;;  %1789 = vmatmul.mubr.msk.f32.gmra.mrb[4].mxu1 %vm640_vm3, %v614_v38 }
 0x133   : > { %1791 = vmatprep.mubr.msk.f32.mxu1 %vm2156_vm1, %v2155_v1 }
 0x134   : > { %v615_v42 = vmax.f32 %v544_v40, 0.0 }
 0x135   : > { %v548_v43 = vpop.f32.mrb[8].mxu0 }
 0x136   : > { %v549_v44 = vadd.f32 %v2418_v26, %v548_v43  ;;  %v1737_v45 = vpop.f32.mrb[9].mxu0  ;;  %1792 = vmatmul.mubr.msk.f32.gmra.mrb[6].mxu1 %vm640_vm3, %v615_v42 }
 0x137   : > { %1794 = vmatprep.mubr.msk.f32.mxu1 %vm2156_vm1, %v2155_v1 }
 0x138   : > { %v616_v46 = vmax.f32 %v549_v44, 0.0 }
 0x139   : > { %v553_v47 = vpop.f32.mrb[10].mxu0 }
 0x13a   : > { %v554_v48 = vadd.f32 %v2418_v26, %v553_v47  ;;  %v1740_v49 = vpop.f32.mrb[11].mxu0  ;;  %1795 = vmatmul.mubr.msk.f32.gmra.mrb[8].mxu1 %vm640_vm3, %v616_v46 }
 0x13b   : > { %1797 = vmatprep.mubr.msk.f32.mxu1 %vm2156_vm1, %v2155_v1 }
 0x13c   : > { %v617_v50 = vmax.f32 %v554_v48, 0.0 }
 0x13d   : > { %v558_v51 = vpop.f32.mrb[12].mxu0 }
 0x13e   : > { %v559_v52 = vadd.f32 %v2418_v26, %v558_v51  ;;  %v1743_v53 = vpop.f32.mrb[13].mxu0  ;;  %1798 = vmatmul.mubr.msk.f32.gmra.mrb[10].mxu1 %vm640_vm3, %v617_v50 }
 0x13f   : > { %1800 = vmatprep.mubr.msk.f32.mxu1 %vm2156_vm1, %v2155_v1 }
 0x140   : > { %v618_v54 = vmax.f32 %v559_v52, 0.0 }
 0x141   : > { %v563_v55 = vpop.f32.mrb[14].mxu0 }
 0x142   : > { %v564_v56 = vadd.f32 %v2418_v26, %v563_v55  ;;  %1801 = vmatmul.mubr.msk.f32.gmra.mrb[12].mxu1 %vm640_vm3, %v618_v54  ;;  %v1746_v57 = vpop.f32.mrb[15].mxu0 }
 0x143   : > { %1803 = vmatprep.mubr.msk.f32.mxu1 %vm2156_vm1, %v2155_v1 }
 0x144   : > { %v619_v58 = vmax.f32 %v564_v56, 0.0 }
 0x145   : > { %v568_v59 = vpop.f32.mrb[16].mxu0 }
 0x146   : > { %v569_v60 = vadd.f32 %v2418_v26, %v568_v59  ;;  %1804 = vmatmul.mubr.msk.f32.gmra.mrb[14].mxu1 %vm640_vm3, %v619_v58  ;;  %v1749_v61 = vpop.f32.mrb[17].mxu0 }
 0x147   : > { %1806 = vmatprep.mubr.msk.f32.mxu1 %vm2156_vm1, %v2155_v1 }
 0x148   : > { %v620_v62 = vmax.f32 %v569_v60, 0.0 }
 0x149   : > { %v573_v63 = vpop.f32.mrb[18].mxu0 }
 0x14a   : > { %v574_v0 = vadd.f32 %v2418_v26, %v573_v63  ;;  %1807 = vmatmul.mubr.msk.f32.gmra.mrb[16].mxu1 %vm640_vm3, %v620_v62  ;;  %v1752_v2 = vpop.f32.mrb[19].mxu0 }
 0x14b   : > { %1809 = vmatprep.mubr.msk.f32.mxu1 %vm2156_vm1, %v2155_v1 }
 0x14c   : > { %v621_v3 = vmax.f32 %v574_v0, 0.0 }
 0x14d   : > { %v578_v5 = vpop.f32.mrb[20].mxu0 }
 0x14e   : > { %v579_v6 = vadd.f32 %v2418_v26, %v578_v5  ;;  %1810 = vmatmul.mubr.msk.f32.gmra.mrb[18].mxu1 %vm640_vm3, %v621_v3  ;;  %v1755_v7 = vpop.f32.mrb[21].mxu0 }
 0x14f   : > { %1812 = vmatprep.mubr.msk.f32.mxu1 %vm2156_vm1, %v2155_v1 }
 0x150   : > { %v622_v8 = vmax.f32 %v579_v6, 0.0 }
 0x151   : > { %v583_v9 = vpop.f32.mrb[22].mxu0 }
 0x152   : > { %v584_v10 = vadd.f32 %v2418_v26, %v583_v9  ;;  %1813 = vmatmul.mubr.msk.f32.gmra.mrb[20].mxu1 %vm640_vm3, %v622_v8  ;;  %v1758_v11 = vpop.f32.mrb[23].mxu0 }
 0x153   : > { %1815 = vmatprep.mubr.msk.f32.mxu1 %vm2156_vm1, %v2155_v1 }
 0x154   : > { %v623_v12 = vmax.f32 %v584_v10, 0.0 }
 0x155   : > { %v588_v13 = vpop.f32.mrb[24].mxu0 }
 0x156   : > { %v589_v14 = vadd.f32 %v2418_v26, %v588_v13  ;;  %1816 = vmatmul.mubr.msk.f32.gmra.mrb[22].mxu1 %vm640_vm3, %v623_v12  ;;  %v1761_v15 = vpop.f32.mrb[25].mxu0 }
 0x157   : > { %1818 = vmatprep.mubr.msk.f32.mxu1 %vm2156_vm1, %v2155_v1 }
 0x158   : > { %v624_v16 = vmax.f32 %v589_v14, 0.0 }
 0x159   : > { %v593_v17 = vpop.f32.mrb[26].mxu0 }
 0x15a   : > { %v594_v18 = vadd.f32 %v2418_v26, %v593_v17  ;;  %1819 = vmatmul.mubr.msk.f32.gmra.mrb[24].mxu1 %vm640_vm3, %v624_v16  ;;  %v1764_v19 = vpop.f32.mrb[27].mxu0 }
 0x15b   : > { %1821 = vmatprep.mubr.msk.f32.mxu1 %vm2156_vm1, %v2155_v1 }
 0x15c   : > { %v625_v20 = vmax.f32 %v594_v18, 0.0 }
 0x15d   : > { %v598_v21 = vpop.f32.mrb[28].mxu0 }
 0x15e   : > { %v599_v22 = vadd.f32 %v2418_v26, %v598_v21  ;;  %1822 = vmatmul.mubr.msk.f32.gmra.mrb[26].mxu1 %vm640_vm3, %v625_v20  ;;  %v1767_v23 = vpop.f32.mrb[29].mxu0 }
 0x15f   : > { %1824 = vmatprep.mubr.msk.f32.mxu1 %vm2156_vm1, %v2155_v1 }
 0x160   : > { %v626_v24 = vmax.f32 %v599_v22, 0.0 }
 0x161   : > { %v603_v25 = vpop.f32.mrb[30].mxu0 }
 0x162   : > { %v604_v27 = vadd.f32 %v2418_v26, %v603_v25  ;;  %1825 = vmatmul.mubr.msk.f32.gmra.mrb[28].mxu1 %vm640_vm3, %v626_v24  ;;  %v1770_v28 = vpop.f32.mrb[31].mxu0 }
 0x163   : > { %1827 = vmatprep.mubr.msk.f32.mxu1 %vm2156_vm1, %v2155_v1 }
 0x164   : > { %v627_v29 = vmax.f32 %v604_v27, 0.0 }
 0x165   : > { %v608_v30 = vpop.f32.mrb[32].mxu0 }
 0x166   : > { %v609_v31 = vadd.f32 %v2418_v26, %v608_v30  ;;  %1828 = vmatmul.mubr.msk.f32.gmra.mrb[30].mxu1 %vm640_vm3, %v627_v29  ;;  %v1773_v32 = vpop.f32.mrb[33].mxu0 }
 0x167   : > { %1830 = vmatprep.mubr.msk.f32.mxu1 %vm2156_vm1, %v2155_v1  ;;  %vm1137_vm1 = vcmask 851712  }
 0x168   : > { %v628_v33 = vmax.f32 %v609_v31, 0.0 }
 0x16a   : > { %1831 = vmatmul.mubr.msk.f32.gmra.mrb[32].mxu1 %vm640_vm3, %v628_v33 }
 0x1fd   : > { %v2486_v34 = vpop.f32.mrb[0].mxu1 }
 0x1fe   : > { %v1784_v35 = vpop.f32.mrb[1].mxu1 }
 0x201   : > { %v763_v37 = vpop.f32.mrb[2].mxu1 }
 0x202   : > { %v764_v26 = vadd.f32 %v2491_v36, %v763_v37  ;;  %v1787_v38 = vpop.f32.mrb[3].mxu1 }
 0x204   : > { %v969_v39 = vmul.f32 %v764_v26, %v764_v26 }
 0x205   : > { %v768_v40 = vpop.f32.mrb[4].mxu1 }
 0x206   : > { %v769_v41 = vadd.f32 %v2491_v36, %v768_v40  ;;  %v1790_v1 = vpop.f32.mrb[5].mxu1  ;;  %v985_v42 = vsel %vm640_vm3, %v969_v39, 0.0 }
 0x207   : > { %986 = vadd.xlane.f32.xlu0 %v985_v42 }
 0x208   : > { %v1875_v44 = vpack.c.bf16 %v769_v41, %v764_v26  ;;  %v970_v45 = vmul.f32 %v769_v41, %v769_v41 }
 0x209   : > { %v773_v46 = vpop.f32.mrb[6].mxu1 }
 0x20a   : > { %v774_v47 = vadd.f32 %v2491_v36, %v773_v46  ;;  %v1793_v48 = vpop.f32.mrb[7].mxu1  ;;  %1877 = vmatpush3.bf16.xpose.msk.msra.mxu0 %vm2498_vm4, %v1875_v44  ;;  %v988_v49 = vsel %vm640_vm3, %v970_v45, 0.0 }
 0x20b   : > { %989 = vadd.xlane.f32.xlu0 %v988_v49  ;;  %1878 = vmatprep.subr.bf16.mxu0 %v2157_v4 }
 0x20c   : > { %v971_v50 = vmul.f32 %v774_v47, %v774_v47 }
 0x20d   : > { %v778_v51 = vpop.f32.mrb[8].mxu1 }
 0x20e   : > { %v779_v52 = vadd.f32 %v2491_v36, %v778_v51  ;;  %v1796_v53 = vpop.f32.mrb[9].mxu1  ;;  %v991_v54 = vsel %vm640_vm3, %v971_v50, 0.0 }
 0x20f   : > { %992 = vadd.xlane.f32.xlu1 %v991_v54  ;;  %v759_v53 = vadd.f32 %v2491_v36, %v2486_v34 }
 0x210   : > { %v1879_v55 = vpack.c.bf16 %v779_v52, %v774_v47  ;;  %v972_v56 = vmul.f32 %v779_v52, %v779_v52 }
 0x211   : > { %v783_v57 = vpop.f32.mrb[10].mxu1  ;;  %v964_v34 = vmul.f32 %v759_v53, %v759_v53 }
 0x212   : > { %v784_v58 = vadd.f32 %v2491_v36, %v783_v57  ;;  %v1799_v59 = vpop.f32.mrb[11].mxu1  ;;  %1881 = vmatpush3.bf16.xpose.msk.msra.mxu0 %vm2498_vm4, %v1879_v55  ;;  %v994_v60 = vsel %vm640_vm3, %v972_v56, 0.0 }
 0x213   : > { %995 = vadd.xlane.f32.xlu1 %v994_v60  ;;  %1882 = vmatprep.subr.bf16.mxu0 %v2157_v4 }
 0x214   : > { %v973_v61 = vmul.f32 %v784_v58, %v784_v58 }
 0x215   : > { %v788_v62 = vpop.f32.mrb[12].mxu1 }
 0x216   : > { %v789_v63 = vadd.f32 %v2491_v36, %v788_v62  ;;  %v1802_v0 = vpop.f32.mrb[13].mxu1  ;;  %v997_v2 = vsel %vm640_vm3, %v973_v61, 0.0 }
 0x217   : > { %998 = vadd.xlane.f32.xlu0 %v997_v2  ;;  %v965_v0 = vsel %vm640_vm3, %v964_v34, 0.0 }
 0x218   : > { %v1883_v3 = vpack.c.bf16 %v789_v63, %v784_v58  ;;  %v974_v5 = vmul.f32 %v789_v63, %v789_v63 }
 0x219   : > { %v793_v6 = vpop.f32.mrb[14].mxu1 }
 0x21a   : > { %v794_v7 = vadd.f32 %v2491_v36, %v793_v6  ;;  %1885 = vmatpush3.bf16.xpose.msk.msra.mxu0 %vm2498_vm4, %v1883_v3  ;;  %v1000_v8 = vsel %vm640_vm3, %v974_v5, 0.0  ;;  %v1805_v9 = vpop.f32.mrb[15].mxu1  ;;  %v1189_v5 = vstv %s2559_s23  ;;  %s2648_s23 = scalar_lea.hbm %s2700_s8, %s1662_s29 }
 0x21b   : > { %1001 = vadd.xlane.f32.xlu1 %v1000_v8  ;;  %1886 = vmatprep.subr.bf16.mxu0 %v2157_v4 }
 0x21c   : > { %v975_v10 = vmul.f32 %v794_v7, %v794_v7 }
 0x21d   : > { %v798_v11 = vpop.f32.mrb[16].mxu1 }
 0x21e   : > { %v799_v12 = vadd.f32 %v2491_v36, %v798_v11  ;;  %v1003_v13 = vsel %vm640_vm3, %v975_v10, 0.0  ;;  %v1808_v14 = vpop.f32.mrb[17].mxu1 }
 0x21f   : > { %1004 = vadd.xlane.f32.xlu0 %v1003_v13 }
 0x220   : > { %v1887_v15 = vpack.c.bf16 %v799_v12, %v794_v7  ;;  %v976_v16 = vmul.f32 %v799_v12, %v799_v12 }
 0x221   : > { %v803_v17 = vpop.f32.mrb[18].mxu1 }
 0x222   : > { %v804_v18 = vadd.f32 %v2491_v36, %v803_v17  ;;  %1889 = vmatpush3.bf16.xpose.msk.msra.mxu0 %vm2498_vm4, %v1887_v15  ;;  %v1006_v19 = vsel %vm640_vm3, %v976_v16, 0.0  ;;  %v1811_v20 = vpop.f32.mrb[19].mxu1 }
 0x223   : > { %1007 = vadd.xlane.f32.xlu1 %v1006_v19  ;;  %1890 = vmatprep.subr.bf16.mxu0 %v2157_v4 }
 0x224   : > { %v977_v21 = vmul.f32 %v804_v18, %v804_v18 }
 0x225   : > { %v808_v22 = vpop.f32.mrb[20].mxu1 }
 0x226   : > { %v809_v23 = vadd.f32 %v2491_v36, %v808_v22  ;;  %v1009_v24 = vsel %vm640_vm3, %v977_v21, 0.0  ;;  %v1814_v25 = vpop.f32.mrb[21].mxu1 }
 0x227   : > { %1010 = vadd.xlane.f32.xlu0 %v1009_v24 }
 0x228   : > { %v1891_v27 = vpack.c.bf16 %v809_v23, %v804_v18  ;;  %v978_v28 = vmul.f32 %v809_v23, %v809_v23 }
 0x229   : > { %v813_v29 = vpop.f32.mrb[22].mxu1 }
 0x22a   : > { %v814_v30 = vadd.f32 %v2491_v36, %v813_v29  ;;  %1893 = vmatpush3.bf16.xpose.msk.msra.mxu0 %vm2498_vm4, %v1891_v27  ;;  %v1012_v31 = vsel %vm640_vm3, %v978_v28, 0.0  ;;  %v1817_v32 = vpop.f32.mrb[23].mxu1 }
 0x22b   : > { %1013 = vadd.xlane.f32.xlu1 %v1012_v31  ;;  %1894 = vmatprep.subr.bf16.mxu0 %v2157_v4 }
 0x22c   : > { %v979_v33 = vmul.f32 %v814_v30, %v814_v30 }
 0x22d   : > { %v818_v35 = vpop.f32.mrb[24].mxu1 }
 0x22e   : > { %v819_v37 = vadd.f32 %v2491_v36, %v818_v35  ;;  %v1015_v26 = vsel %vm640_vm3, %v979_v33, 0.0  ;;  %v1820_v38 = vpop.f32.mrb[25].mxu1 }
 0x22f   : > { %1016 = vadd.xlane.f32.xlu0 %v1015_v26 }
 0x230   : > { %v1895_v39 = vpack.c.bf16 %v819_v37, %v814_v30  ;;  %v980_v40 = vmul.f32 %v819_v37, %v819_v37 }
 0x231   : > { %v823_v41 = vpop.f32.mrb[26].mxu1 }
 0x232   : > { %v824_v1 = vadd.f32 %v2491_v36, %v823_v41  ;;  %1897 = vmatpush3.bf16.xpose.msk.msra.mxu0 %vm2498_vm4, %v1895_v39  ;;  %v1018_v42 = vsel %vm640_vm3, %v980_v40, 0.0  ;;  %v1823_v44 = vpop.f32.mrb[27].mxu1 }
 0x233   : > { %1019 = vadd.xlane.f32.xlu1 %v1018_v42  ;;  %1898 = vmatprep.subr.bf16.mxu0 %v2157_v4 }
 0x234   : > { %v981_v45 = vmul.f32 %v824_v1, %v824_v1 }
 0x235   : > { %v828_v46 = vpop.f32.mrb[28].mxu1 }
 0x236   : > { %v829_v47 = vadd.f32 %v2491_v36, %v828_v46  ;;  %v1021_v48 = vsel %vm640_vm3, %v981_v45, 0.0  ;;  %v1826_v49 = vpop.f32.mrb[29].mxu1 }
 0x237   : > { %1022 = vadd.xlane.f32.xlu0 %v1021_v48 }
 0x238   : > { %v1899_v50 = vpack.c.bf16 %v829_v47, %v824_v1  ;;  %v982_v51 = vmul.f32 %v829_v47, %v829_v47 }
 0x239   : > { %v833_v52 = vpop.f32.mrb[30].mxu1 }
 0x23a   : > { %v834_v54 = vadd.f32 %v2491_v36, %v833_v52  ;;  %1901 = vmatpush3.bf16.xpose.msk.msra.mxu0 %vm2498_vm4, %v1899_v50  ;;  %v1024_v55 = vsel %vm640_vm3, %v982_v51, 0.0  ;;  %v1829_v56 = vpop.f32.mrb[31].mxu1 }
 0x23b   : > { %1025 = vadd.xlane.f32.xlu1 %v1024_v55  ;;  %1902 = vmatprep.subr.bf16.mxu0 %v2157_v4  ;;  %v2158_v4 = vmov -1e+30  }
 0x23c   : > { %v983_v57 = vmul.f32 %v834_v54, %v834_v54  ;;  %1175 = vst [vmem:[#allocation2 + $0x8] sm:$0xff] %v2158_v4 }
 0x23d   : > { %v838_v58 = vpop.f32.mrb[32].mxu1 }
 0x23e   : > { %v839_v59 = vadd.f32 %v2491_v36, %v838_v58  ;;  %v1027_v60 = vsel %vm640_vm3, %v983_v57, 0.0  ;;  %v1832_v61 = vpop.f32.mrb[33].mxu1  ;;  %v1049_v36 = vlaneseq }
 0x23f   : > { %1028 = vadd.xlane.f32.xlu0 %v1027_v60 }
 0x240   : > { %v1903_v62 = vpack.c.bf16 %v839_v59, %v834_v54  ;;  %v984_v63 = vmul.f32 %v839_v59, %v839_v59  ;;  %v2561_v3 = vand.u32 127, %v1049_v36  ;;  %v2569_v14 = vshrl.u32 %v1049_v36, 7 }
 0x242   : > { %1905 = vmatpush3.bf16.xpose.msk.msra.mxu0 %vm2498_vm4, %v1903_v62  ;;  %v1030_v2 = vsel %vm640_vm3, %v984_v63, 0.0  ;;  %vm1193_vm5 = vcmp.le.s32.totalorder %v2561_v3, 8  ;;  %v1055_v12 = vadd.s32 4294967288, %v2561_v3  ;;  %v1062_v13 = vadd.s32 4294967280, %v2561_v3 }
 0x243   : > { %966 = vadd.xlane.f32.xlu0 %v965_v0  ;;  %1031 = vadd.xlane.f32.xlu1 %v1030_v2  ;;  %v1194_v43 = vsel %vm1193_vm5, %v1189_v5, -1e+30  ;;  %v1069_v15 = vadd.s32 4294967272, %v2561_v3  ;;  %v1076_v17 = vadd.s32 4294967264, %v2561_v3  ;;  %v1083_v20 = vadd.s32 4294967256, %v2561_v3 }
 0x244   : > { %1195 = vst [vmem:[#allocation2 + $0x8] sm:$0x1] %v1194_v43  ;;  %v1058_v19 = vsub.s32 %v1055_v12, %v2569_v14  ;;  %v1065_v21 = vsub.s32 %v1062_v13, %v2569_v14  ;;  %v1090_v22 = vadd.s32 4294967248, %v2561_v3  ;;  %v1053_v23 = vsub.s32 %v2561_v3, %v2569_v14 }
 0x245   : > { %v1072_v24 = vsub.s32 %v1069_v15, %v2569_v14  ;;  %v1097_v25 = vadd.s32 4294967240, %v2561_v3  ;;  %v1079_v28 = vsub.s32 %v1076_v17, %v2569_v14  ;;  %v1104_v29 = vadd.s32 4294967232, %v2561_v3 }
 0x246   : > { %v1086_v32 = vsub.s32 %v1083_v20, %v2569_v14  ;;  %v1111_v33 = vadd.s32 4294967224, %v2561_v3  ;;  %v1093_v37 = vsub.s32 %v1090_v22, %v2569_v14  ;;  %v1118_v26 = vadd.s32 4294967216, %v2561_v3 }
 0x247   : > { %v1100_v40 = vsub.s32 %v1097_v25, %v2569_v14  ;;  %v1125_v1 = vadd.s32 4294967208, %v2561_v3  ;;  %v1107_v44 = vsub.s32 %v1104_v29, %v2569_v14  ;;  %v1132_v46 = vadd.s32 4294967200, %v2561_v3 }
 0x248   : > { %v1114_v49 = vsub.s32 %v1111_v33, %v2569_v14  ;;  %v1139_v50 = vadd.s32 4294967192, %v2561_v3  ;;  %v1146_v54 = vadd.s32 4294967184, %v2561_v3  ;;  %v1153_v59 = vadd.s32 4294967176, %v2561_v3 }
 0x249   : > { %1866 = vmatmul.mubr.msk.f32.vlgmr.msra.gmra.mrb[34].mxu0 %vm640_vm3, %v759_v53  ;;  %v1121_v53 = vsub.s32 %v1118_v26, %v2569_v14  ;;  %v1128_v57 = vsub.s32 %v1125_v1, %v2569_v14  ;;  %v1135_v34 = vsub.s32 %v1132_v46, %v2569_v14  ;;  %vm1151_vm3 = vcmask 982912  }
 0x24a   : > { %v1142_v2 = vsub.s32 %v1139_v50, %v2569_v14  ;;  %v1149_v43 = vsub.s32 %v1146_v54, %v2569_v14  ;;  %vm1158_vm4 = vcmask 1048512   ;;  %v1180_v29 = vstv %s1177_s24  ;;  %s2080_s24 = scalar_lea.vmem %s1478_s14, 128 }
 0x24b   : > { %vm1188_vm5 = vcmp.eq.s32.totalorder %v2561_v3, 8  ;;  %v1200_v46 = vld [vmem:[#allocation2 + $0x8] sm:$0xff]  ;;  %p2081_p1 = scmp.ne.s32.totalorder %s1478_s14, %s2080_s24 }
 0x24c   : > { %v1190_v33 = vsel %vm1188_vm5, %v1189_v5, -1e+30 }
 0x24d   : > { %p2082_p3 = pnand %p2081_p1, %p2720_p2 }
 0x24f   : > { %p2083_p4 = pneg %p2082_p3 }
 0x294   : > { %v987_v6 = vpop.xlane.xlu0 %986 }
 0x295   : > { %v1054_v38 = vrot.slane %v987_v6, %v1053_v23 }
 0x298   : > { %v990_v8 = vpop.xlane.xlu0 %989 }
 0x299   : > { %v1059_v31 = vrot.slane %v990_v8, %v1058_v19 }
 0x29b   : > { %v1061_v47 = vsel %vm1060_vm6, %v1059_v31, %v1054_v38  ;;  %v1182_v31 = vstv %s1179_s26  ;;  %vm1187_vm6 = vcmp.lt.s32.totalorder %v2561_v3, 8  ;;  %s2159_s26 = smov [#allocation9]  }
 0x29c   : > { %v993_v7 = vpop.xlane.xlu1 %992  ;;  %s2084_s0 = sshll.u32 %s2159_s26, 4  ;;  %s2085_s0 = int_to_ptr.vmem [resolvable:$false] %s2084_s0 }
 0x29d   : > { %v1066_v35 = vrot.slane %v993_v7, %v1065_v21  ;;  %s2086_s1 = scalar_lea.vmem %s2085_s0, 256  ;;  %p2087_p9 = scmp.lt.s32.totalorder %s1478_s14, %s2085_s0 }
 0x29e   : > { %p2088_p7 = scmp.lt.s32.totalorder %s2086_s1, %s2080_s24 }
 0x29f   : > { %v1068_v51 = vsel %vm1067_vm7, %v1066_v35, %v1061_v47 }
 0x2a0   : > { %v996_v9 = vpop.xlane.xlu1 %995  ;;  %p2089_p5 = por %p2088_p7, %p2087_p9 }
 0x2a1   : > { %v1073_v39 = vrot.slane %v996_v9, %v1072_v24  ;;  %v1156_v9 = vsub.s32 %v1153_v59, %v2569_v14 }
 0x2a2   : > { %p2090_p6 = pnand %p2089_p5, %p2083_p4 }
 0x2a3   : > { %v1075_v55 = vsel %vm1074_vm8, %v1073_v39, %v1068_v51 }
 0x2a4   : > { %v999_v10 = vpop.xlane.xlu0 %998 }
 0x2a5   : > { %v1080_v42 = vrot.slane %v999_v10, %v1079_v28 }
 0x2a7   : > { %v1082_v60 = vsel %vm1081_vm9, %v1080_v42, %v1075_v55 }
 0x2a8   : > { %v1002_v11 = vpop.xlane.xlu1 %1001 }
 0x2a9   : > { %v1087_v48 = vrot.slane %v1002_v11, %v1086_v32 }
 0x2ab   : > { %v1089_v63 = vsel %vm1088_vm10, %v1087_v48, %v1082_v60 }
 0x2ac   : > { %v1005_v16 = vpop.xlane.xlu0 %1004 }
 0x2ad   : > { %v1094_v52 = vrot.slane %v1005_v16, %v1093_v37 }
 0x2af   : > { %v1096_v4 = vsel %vm1095_vm11, %v1094_v52, %v1089_v63 }
 0x2b0   : > { %v1008_v18 = vpop.xlane.xlu1 %1007 }
 0x2b1   : > { %v1101_v56 = vrot.slane %v1008_v18, %v1100_v40 }
 0x2b3   : > { %v1103_v6 = vsel %vm1102_vm12, %v1101_v56, %v1096_v4 }
 0x2b4   : > { %v1011_v27 = vpop.xlane.xlu0 %1010 }
 0x2b5   : > { %v1108_v61 = vrot.slane %v1011_v27, %v1107_v44 }
 0x2b7   : > { %v1110_v10 = vsel %vm1109_vm13, %v1108_v61, %v1103_v6 }
 0x2b8   : > { %v1014_v30 = vpop.xlane.xlu1 %1013 }
 0x2b9   : > { %v1115_v0 = vrot.slane %v1014_v30, %v1114_v49 }
 0x2bb   : > { %v1117_v13 = vsel %vm1116_vm14, %v1115_v0, %v1110_v10 }
 0x2bc   : > { %v1017_v41 = vpop.xlane.xlu0 %1016 }
 0x2bd   : > { %v1122_v36 = vrot.slane %v1017_v41, %v1121_v53 }
 0x2bf   : > { %v1124_v16 = vsel %vm1123_vm15, %v1122_v36, %v1117_v13 }
 0x2c0   : > { %v1020_v45 = vpop.xlane.xlu1 %1019 }
 0x2c1   : > { %v1129_v7 = vrot.slane %v1020_v45, %v1128_v57 }
 0x2c3   : > { %v1131_v18 = vsel %vm1130_vm0, %v1129_v7, %v1124_v16 }
 0x2c4   : > { %v1023_v58 = vpop.xlane.xlu0 %1022 }
 0x2c5   : > { %v1136_v11 = vrot.slane %v1023_v58, %v1135_v34 }
 0x2c7   : > { %v1138_v21 = vsel %vm1137_vm1, %v1136_v11, %v1131_v18 }
 0x2c8   : > { %v1026_v62 = vpop.xlane.xlu1 %1025 }
 0x2c9   : > { %v1143_v15 = vrot.slane %v1026_v62, %v1142_v2 }
 0x2cb   : > { %v1145_v23 = vsel %vm1144_vm2, %v1143_v15, %v1138_v21 }
 0x2cc   : > { %v1029_v8 = vpop.xlane.xlu0 %1028 }
 0x2cd   : > { %v1150_v17 = vrot.slane %v1029_v8, %v1149_v43 }
 0x2cf   : > { %v1152_v25 = vsel %vm1151_vm3, %v1150_v17, %v1145_v23 }
 0x2d0   : > { %v1032_v12 = vpop.xlane.xlu1 %1031  ;;  %v967_v24 = vpop.xlane.xlu0 %966 }
 0x2d1   : > { %v1157_v19 = vrot.slane %v1032_v12, %v1156_v9 }
 0x2d3   : > { %v1159_v28 = vsel %vm1158_vm4, %v1157_v19, %v1152_v25 }
 0x31c   : > { %v959_v20 = vpop.f32.mrb[34].mxu0 }
 0x31d   : > { %v963_v14 = vmul.f32 -2.0, %v959_v20  ;;  %v1867_v22 = vpop.f32.mrb[35].mxu0 }
 0x31f   : > { %v968_v27 = vadd.f32 %v967_v24, %v963_v14 }
 0x321   : > { %v1173_v30 = vadd.f32 %v1159_v28, %v968_v27 }
 0x323   : > { %v1181_v32 = vsub.f32 %v1173_v30, %v1180_v29 }
 0x325   : > { %v1183_v35 = vmul.f32 %v1182_v31, %v1181_v32 }
 0x327   : > { %v1184_v37 = vmul.f32 1.442695, %v1183_v35  ;;  %v1191_v26 = vsel %vm1187_vm6, %v1183_v35, %v1190_v33 }
 0x328   : > { %1201 = vmax.xlane.f32.xlu1 %v1191_v26 }
 0x329   : > { %1981 = vpow2.f32 %v1184_v37 }
 0x333   : > { %v1982_v38 = vpop.eup %1981 }
 0x334   : > { %1186 = vst [vmem:[%s365_s21] sm:$0xff] %v1982_v38 }
 0x3b5   : > { %v1202_v39 = vpop.xlane.xlu1 %1201 }
 0x3b6   : > { %v1205_v40 = vsub.f32 %v1191_v26, %v1202_v39 }
 0x3b8   : > { %v1207_v5 = vmul.f32 1.442695, %v1205_v40 }
 0x3ba   : > { %1983 = vpow2.f32 %v1207_v5 }
 0x3c4   : > { %v1984_v41 = vpop.eup %1983 }
 0x3c5   : > { %1211 = vadd.xlane.f32.xlu0 %v1984_v41 }
 0x452   : > { %v1212_v1 = vpop.xlane.xlu0 %1211 }
 0x453   : > { %1985 = vlog2.f32 %v1212_v1 }
 0x45d   : > { %v1986_v42 = vpop.eup %1985 }
 0x45e   : > { %v1216_v44 = vmul.f32 0.6931472, %v1986_v42 }
 0x460   : > { %v1219_v45 = vadd.f32 %v1216_v44, %v1202_v39 }
 0x462   : > { %v1223_v47 = vsub.f32 %v1191_v26, %v1219_v45 }
 0x464   : > { %v1227_v48 = vmax.f32 %v1223_v47, %v1200_v46 }
 0x466   : > { %v1228_v49 = vrot.slane %v1227_v48, 4 }
 0x468   : > { %v1229_v50 = vmax.f32 %v1227_v48, %v1228_v49 }
 0x46a   : > { %v1230_v51 = vrot.slane %v1229_v50, 2 }
 0x46c   : > { %v1231_v52 = vmax.f32 %v1229_v50, %v1230_v51 }
 0x46e   : > { %v1232_v53 = vrot.slane %v1231_v52, 1 }
 0x470   : > { %v1233_v54 = vmax.f32 %v1231_v52, %v1232_v53 }
 0x472   : > { %v1234_v55 = vsub.f32 %v1223_v47, %v1233_v54  ;;  %v1235_v56 = vsub.f32 %v1200_v46, %v1233_v54 }
 0x474   : > { %v1236_v57 = vmul.f32 1.442695, %v1234_v55  ;;  %v1238_v58 = vmul.f32 1.442695, %v1235_v56 }
 0x476   : > { %1987 = vpow2.f32 %v1236_v57 }
 0x477   : > { %1989 = vpow2.f32 %v1238_v58 }
 0x480   : > { %v1988_v59 = vpop.eup %1987 }
 0x481   : > { %v1990_v60 = vpop.eup %1989 }
 0x482   : > { %v1240_v61 = vadd.f32 %v1990_v60, %v1988_v59 }
 0x484   : > { %v1241_v34 = vrot.slane %v1240_v61, 4 }
 0x486   : > { %v1242_v62 = vadd.f32 %v1241_v34, %v1240_v61 }
 0x488   : > { %v1243_v63 = vrot.slane %v1242_v62, 2 }
 0x48a   : > { %v1244_v0 = vadd.f32 %v1243_v63, %v1242_v62 }
 0x48c   : > { %v1245_v2 = vrot.slane %v1244_v0, 1 }
 0x48e   : > { %v1246_v4 = vadd.f32 %v1245_v2, %v1244_v0 }
 0x490   : > { %1991 = vlog2.f32 %v1246_v4 }
 0x49a   : > { %v1992_v36 = vpop.eup %1991 }
 0x49b   : > { %v1248_v43 = vmul.f32 0.6931472, %v1992_v36 }
 0x49d   : > { %v1249_v6 = vadd.f32 %v1248_v43, %v1233_v54 }
 0x49f   : > { %v1250_v7 = vsub.f32 %v1223_v47, %v1249_v6  ;;  %v1251_v8 = vsub.f32 %v1200_v46, %v1249_v6 }
 0x4a1   : > { %v1252_v9 = vsel %vm1187_vm6, %v1250_v7, %v1223_v47  ;;  %v1253_v10 = vsel %vm1187_vm6, %v1251_v8, %v1200_v46 }
 0x4a2   : > { %1254 = vmax.xlane.f32.xlu1 %v1252_v9 }
 0x52f   : > { %v1255_v11 = vpop.xlane.xlu1 %1254 }
 0x530   : > { %v1258_v12 = vsub.f32 %v1252_v9, %v1255_v11 }
 0x532   : > { %v1260_v13 = vmul.f32 1.442695, %v1258_v12 }
 0x534   : > { %1993 = vpow2.f32 %v1260_v13 }
 0x53e   : > { %v1994_v15 = vpop.eup %1993 }
 0x53f   : > { %1264 = vadd.xlane.f32.xlu0 %v1994_v15 }
 0x5cc   : > { %v1265_v16 = vpop.xlane.xlu0 %1264 }
 0x5cd   : > { %1995 = vlog2.f32 %v1265_v16 }
 0x5d7   : > { %v1996_v17 = vpop.eup %1995 }
 0x5d8   : > { %v1269_v18 = vmul.f32 0.6931472, %v1996_v17 }
 0x5da   : > { %v1272_v19 = vadd.f32 %v1269_v18, %v1255_v11 }
 0x5dc   : > { %v1274_v20 = vsub.f32 %v1252_v9, %v1272_v19 }
 0x5de   : > { %v1278_v21 = vmax.f32 %v1274_v20, %v1253_v10 }
 0x5e0   : > { %v1279_v14 = vrot.slane %v1278_v21, 4 }
 0x5e2   : > { %v1280_v22 = vmax.f32 %v1278_v21, %v1279_v14 }
 0x5e4   : > { %v1281_v23 = vrot.slane %v1280_v22, 2 }
 0x5e6   : > { %v1282_v24 = vmax.f32 %v1280_v22, %v1281_v23 }
 0x5e8   : > { %v1283_v25 = vrot.slane %v1282_v24, 1 }
 0x5ea   : > { %v1284_v27 = vmax.f32 %v1282_v24, %v1283_v25 }
 0x5ec   : > { %v1285_v28 = vsub.f32 %v1274_v20, %v1284_v27  ;;  %v1286_v29 = vsub.f32 %v1253_v10, %v1284_v27 }
 0x5ee   : > { %v1287_v30 = vmul.f32 1.442695, %v1285_v28  ;;  %v1289_v31 = vmul.f32 1.442695, %v1286_v29 }
 0x5f0   : > { %1997 = vpow2.f32 %v1287_v30 }
 0x5f1   : > { %1999 = vpow2.f32 %v1289_v31 }
 0x5fa   : > { %v1998_v32 = vpop.eup %1997 }
 0x5fb   : > { %v2000_v33 = vpop.eup %1999 }
 0x5fc   : > { %v1291_v35 = vadd.f32 %v2000_v33, %v1998_v32 }
 0x5fe   : > { %v1292_v37 = vrot.slane %v1291_v35, 4 }
 0x600   : > { %v1293_v26 = vadd.f32 %v1292_v37, %v1291_v35 }
 0x602   : > { %v1294_v38 = vrot.slane %v1293_v26, 2 }
 0x604   : > { %v1295_v39 = vadd.f32 %v1294_v38, %v1293_v26 }
 0x606   : > { %v1296_v40 = vrot.slane %v1295_v39, 1 }
 0x608   : > { %v1297_v5 = vadd.f32 %v1296_v40, %v1295_v39 }
 0x60a   : > { %2001 = vlog2.f32 %v1297_v5 }
 0x614   : > { %v2002_v41 = vpop.eup %2001 }
 0x615   : > { %v1299_v1 = vmul.f32 0.6931472, %v2002_v41 }
 0x617   : > { %v1300_v42 = vadd.f32 %v1299_v1, %v1284_v27 }
 0x619   : > { %v1301_v44 = vsub.f32 %v1274_v20, %v1300_v42  ;;  %v1302_v45 = vsub.f32 %v1253_v10, %v1300_v42 }
 0x61b   : > { %v1303_v46 = vsel %vm1187_vm6, %v1301_v44, %v1274_v20  ;;  %v1304_v47 = vsel %vm1187_vm6, %v1302_v45, %v1253_v10 }
 0x61c   : > { %1305 = vmax.xlane.f32.xlu1 %v1303_v46 }
 0x6a9   : > { %v1306_v48 = vpop.xlane.xlu1 %1305 }
 0x6aa   : > { %v1309_v49 = vsub.f32 %v1303_v46, %v1306_v48 }
 0x6ac   : > { %v1311_v50 = vmul.f32 1.442695, %v1309_v49 }
 0x6ae   : > { %2003 = vpow2.f32 %v1311_v50 }
 0x6b8   : > { %v2004_v51 = vpop.eup %2003 }
 0x6b9   : > { %1315 = vadd.xlane.f32.xlu0 %v2004_v51 }
 0x746   : > { %v1316_v52 = vpop.xlane.xlu0 %1315 }
 0x747   : > { %2005 = vlog2.f32 %v1316_v52 }
 0x751   : > { %v2006_v53 = vpop.eup %2005 }
 0x752   : > { %v1320_v54 = vmul.f32 0.6931472, %v2006_v53 }
 0x754   : > { %v1323_v55 = vadd.f32 %v1320_v54, %v1306_v48 }
 0x756   : > { %v1325_v56 = vsub.f32 %v1303_v46, %v1323_v55 }
 0x758   : > { %v1329_v57 = vmax.f32 %v1325_v56, %v1304_v47 }
 0x75a   : > { %v1330_v58 = vrot.slane %v1329_v57, 4 }
 0x75c   : > { %v1331_v59 = vmax.f32 %v1329_v57, %v1330_v58 }
 0x75e   : > { %v1332_v60 = vrot.slane %v1331_v59, 2 }
 0x760   : > { %v1333_v61 = vmax.f32 %v1331_v59, %v1332_v60 }
 0x762   : > { %v1334_v34 = vrot.slane %v1333_v61, 1 }
 0x764   : > { %v1335_v62 = vmax.f32 %v1333_v61, %v1334_v34 }
 0x766   : > { %v1336_v63 = vsub.f32 %v1325_v56, %v1335_v62  ;;  %v1337_v0 = vsub.f32 %v1304_v47, %v1335_v62 }
 0x768   : > { %v1338_v2 = vmul.f32 1.442695, %v1336_v63  ;;  %v1340_v4 = vmul.f32 1.442695, %v1337_v0 }
 0x76a   : > { %2007 = vpow2.f32 %v1338_v2 }
 0x76b   : > { %2009 = vpow2.f32 %v1340_v4 }
 0x774   : > { %v2008_v36 = vpop.eup %2007 }
 0x775   : > { %v2010_v43 = vpop.eup %2009 }
 0x776   : > { %v1342_v6 = vadd.f32 %v2010_v43, %v2008_v36 }
 0x778   : > { %v1343_v7 = vrot.slane %v1342_v6, 4 }
 0x77a   : > { %v1344_v8 = vadd.f32 %v1343_v7, %v1342_v6 }
 0x77c   : > { %v1345_v9 = vrot.slane %v1344_v8, 2 }
 0x77e   : > { %v1346_v10 = vadd.f32 %v1345_v9, %v1344_v8 }
 0x780   : > { %v1347_v11 = vrot.slane %v1346_v10, 1 }
 0x782   : > { %v1348_v12 = vadd.f32 %v1347_v11, %v1346_v10 }
 0x784   : > { %2011 = vlog2.f32 %v1348_v12 }
 0x78e   : > { %v2012_v13 = vpop.eup %2011 }
 0x78f   : > { %v1350_v15 = vmul.f32 0.6931472, %v2012_v13 }
 0x791   : > { %v1351_v16 = vadd.f32 %v1350_v15, %v1335_v62 }
 0x793   : > { %v1352_v17 = vsub.f32 %v1325_v56, %v1351_v16  ;;  %v1353_v18 = vsub.f32 %v1304_v47, %v1351_v16 }
 0x795   : > { %v1354_v19 = vsel %vm1187_vm6, %v1352_v17, %v1325_v56  ;;  %v1355_v20 = vsel %vm1187_vm6, %v1353_v18, %v1304_v47 }
 0x796   : > { %1356 = vmax.xlane.f32.xlu1 %v1354_v19 }
 0x823   : > { %v1357_v21 = vpop.xlane.xlu1 %1356 }
 0x824   : > { %v1360_v14 = vsub.f32 %v1354_v19, %v1357_v21 }
 0x826   : > { %v1362_v22 = vmul.f32 1.442695, %v1360_v14 }
 0x828   : > { %2013 = vpow2.f32 %v1362_v22 }
 0x832   : > { %v2014_v23 = vpop.eup %2013 }
 0x833   : > { %1366 = vadd.xlane.f32.xlu0 %v2014_v23 }
 0x8c0   : > { %v1367_v24 = vpop.xlane.xlu0 %1366 }
 0x8c1   : > { %2015 = vlog2.f32 %v1367_v24 }
 0x8cb   : > { %v2016_v25 = vpop.eup %2015 }
 0x8cc   : > { %v1371_v27 = vmul.f32 0.6931472, %v2016_v25 }
 0x8ce   : > { %v1374_v28 = vadd.f32 %v1371_v27, %v1357_v21 }
 0x8d0   : > { %v1376_v29 = vsub.f32 %v1354_v19, %v1374_v28 }
 0x8d2   : > { %v1380_v30 = vmax.f32 %v1376_v29, %v1355_v20 }
 0x8d4   : > { %v1381_v31 = vrot.slane %v1380_v30, 4 }
 0x8d6   : > { %v1382_v32 = vmax.f32 %v1380_v30, %v1381_v31 }
 0x8d8   : > { %v1383_v33 = vrot.slane %v1382_v32, 2 }
 0x8da   : > { %v1384_v35 = vmax.f32 %v1382_v32, %v1383_v33 }
 0x8dc   : > { %v1385_v37 = vrot.slane %v1384_v35, 1 }
 0x8de   : > { %v1386_v26 = vmax.f32 %v1384_v35, %v1385_v37 }
 0x8e0   : > { %v1387_v38 = vsub.f32 %v1376_v29, %v1386_v26  ;;  %v1388_v39 = vsub.f32 %v1355_v20, %v1386_v26 }
 0x8e2   : > { %v1389_v40 = vmul.f32 1.442695, %v1387_v38  ;;  %v1391_v5 = vmul.f32 1.442695, %v1388_v39 }
 0x8e4   : > { %2017 = vpow2.f32 %v1389_v40 }
 0x8e5   : > { %2019 = vpow2.f32 %v1391_v5 }
 0x8ee   : > { %v2018_v41 = vpop.eup %2017 }
 0x8ef   : > { %v2020_v1 = vpop.eup %2019 }
 0x8f0   : > { %v1393_v42 = vadd.f32 %v2020_v1, %v2018_v41 }
 0x8f2   : > { %v1394_v44 = vrot.slane %v1393_v42, 4 }
 0x8f4   : > { %v1395_v45 = vadd.f32 %v1394_v44, %v1393_v42 }
 0x8f6   : > { %v1396_v46 = vrot.slane %v1395_v45, 2 }
 0x8f8   : > { %v1397_v47 = vadd.f32 %v1396_v46, %v1395_v45 }
 0x8fa   : > { %v1398_v48 = vrot.slane %v1397_v47, 1 }
 0x8fc   : > { %v1399_v49 = vadd.f32 %v1398_v48, %v1397_v47 }
 0x8fe   : > { %2021 = vlog2.f32 %v1399_v49 }
 0x908   : > { %v2022_v50 = vpop.eup %2021 }
 0x909   : > { %v1401_v51 = vmul.f32 0.6931472, %v2022_v50 }
 0x90b   : > { %v1402_v52 = vadd.f32 %v1401_v51, %v1386_v26 }
 0x90d   : > { %v1403_v53 = vsub.f32 %v1376_v29, %v1402_v52  ;;  %v1404_v54 = vsub.f32 %v1355_v20, %v1402_v52 }
 0x90f   : > { %v1405_v55 = vsel %vm1187_vm6, %v1403_v53, %v1376_v29  ;;  %v1406_v56 = vsel %vm1187_vm6, %v1404_v54, %v1355_v20 }
 0x910   : > { %1407 = vmax.xlane.f32.xlu1 %v1405_v55 }
 0x99d   : > { %v1408_v57 = vpop.xlane.xlu1 %1407 }
 0x99e   : > { %v1411_v58 = vsub.f32 %v1405_v55, %v1408_v57 }
 0x9a0   : > { %v1413_v59 = vmul.f32 1.442695, %v1411_v58 }
 0x9a2   : > { %2023 = vpow2.f32 %v1413_v59 }
 0x9ac   : > { %v2024_v60 = vpop.eup %2023 }
 0x9ad   : > { %1417 = vadd.xlane.f32.xlu0 %v2024_v60 }
 0x9ae   : > { %2093 = shalt.err (!%p2090_p6)
}
 0x9af   : > { %s2094_s13 = scalar_lea.hbm %s2648_s23, 128  ;;  %s2098_s21 = scalar_lea.hbm %s2700_s8, 256 }
 0x9b0   : > { %p2095_p10 = scmp.ne.s32.totalorder %s2648_s23, %s2094_s13  ;;  %p2099_p11 = scmp.lt.u32.totalorder %s2648_s23, %s2700_s8 }
 0x9b1   : > { %p2100_p13 = scmp.lt.u32.totalorder %s2098_s21, %s2094_s13  ;;  %p2102_p1 = scmp.lt.u32.totalorder %s2094_s13, %s2648_s23 }
 0x9b2   : > { %p2096_p8 = pnand %p2095_p10, %p2720_p2 }
 0x9b3   : > { %p2101_p12 = por %p2100_p13, %p2099_p11 }
 0x9b4   : > { %p2097_p0 = pneg %p2096_p8 }
 0x9b5   : > { %p2103_p3 = por %p2102_p1, %p2101_p12 }
 0x9b7   : > { %p2104_p4 = pnand %p2103_p3, %p2097_p0 }
 0x9b9   : > { %2107 = shalt.err (!%p2104_p4)
}
 0x9ba   : > { %1919 = dma.vmem_to_hbm [thread:$0]  (%p2720_p2), %s1478_s14, 128, %s2648_s23, %s1460_s25  }
 0x9bb   : > { %s1606_s1 = sshll.u32 %s2328_s17, 3 }
 0x9bc   : > { %s380_s16 = scalar_lea.vmem %s2701_s9, %s1606_s1 }
 0xa3a   : > { %v1418_v61 = vpop.xlane.xlu0 %1417 }
 0xa3b   : > { %2025 = vlog2.f32 %v1418_v61 }
 0xa45   : > { %v2026_v34 = vpop.eup %2025 }
 0xa46   : > { %v1422_v62 = vmul.f32 0.6931472, %v2026_v34 }
 0xa48   : > { %v1425_v63 = vadd.f32 %v1422_v62, %v1408_v57 }
 0xa4a   : > { %v1427_v0 = vsub.f32 %v1405_v55, %v1425_v63 }
 0xa4c   : > { %v1431_v2 = vmax.f32 %v1427_v0, %v1406_v56 }
 0xa4e   : > { %v1432_v4 = vrot.slane %v1431_v2, 4 }
 0xa50   : > { %v1433_v36 = vmax.f32 %v1431_v2, %v1432_v4 }
 0xa52   : > { %v1434_v43 = vrot.slane %v1433_v36, 2 }
 0xa54   : > { %v1435_v6 = vmax.f32 %v1433_v36, %v1434_v43 }
 0xa56   : > { %v1436_v7 = vrot.slane %v1435_v6, 1 }
 0xa58   : > { %v1437_v8 = vmax.f32 %v1435_v6, %v1436_v7 }
 0xa5a   : > { %v1438_v9 = vsub.f32 %v1427_v0, %v1437_v8  ;;  %v1439_v10 = vsub.f32 %v1406_v56, %v1437_v8 }
 0xa5c   : > { %v1440_v11 = vmul.f32 1.442695, %v1438_v9  ;;  %v1442_v12 = vmul.f32 1.442695, %v1439_v10 }
 0xa5e   : > { %2027 = vpow2.f32 %v1440_v11 }
 0xa5f   : > { %2029 = vpow2.f32 %v1442_v12 }
 0xa68   : > { %v2028_v13 = vpop.eup %2027 }
 0xa69   : > { %v2030_v15 = vpop.eup %2029 }
 0xa6a   : > { %v1444_v16 = vadd.f32 %v2030_v15, %v2028_v13 }
 0xa6c   : > { %v1445_v17 = vrot.slane %v1444_v16, 4 }
 0xa6e   : > { %v1446_v18 = vadd.f32 %v1445_v17, %v1444_v16 }
 0xa70   : > { %v1447_v19 = vrot.slane %v1446_v18, 2 }
 0xa72   : > { %v1448_v20 = vadd.f32 %v1447_v19, %v1446_v18 }
 0xa74   : > { %v1449_v21 = vrot.slane %v1448_v20, 1 }
 0xa76   : > { %v1450_v14 = vadd.f32 %v1449_v21, %v1448_v20 }
 0xa78   : > { %2031 = vlog2.f32 %v1450_v14 }
 0xa82   : > { %v2032_v22 = vpop.eup %2031 }
 0xa83   : > { %v1452_v23 = vmul.f32 0.6931472, %v2032_v22 }
 0xa85   : > { %v1453_v24 = vadd.f32 %v1452_v23, %v1437_v8 }
 0xa87   : > { %v1454_v25 = vsub.f32 %v1427_v0, %v1453_v24 }
 0xa89   : > { %v1455_v27 = vsel %vm1187_vm6, %v1454_v25, %v1427_v0 }
 0xa8a   : > { %v1456_v28 = vmul.f32 1.442695, %v1455_v27 }
 0xa8c   : > { %2033 = vpow2.f32 %v1456_v28 }
 0xa96   : > { %v2034_v29 = vpop.eup %2033 }
 0xa97   : > { %1458 = vst [vmem:[%s380_s16] sm:$0xff] %v2034_v29 }
 0xa98 PF: > { %p1941_p2 = scmp.ge.s32.totalorder %s2150_s12, 2  ;;  %s1492_s22 = sand.u32 1, %s2138_s30  }
 0xa99   : > { %p2721_p9 = scmp.ne.s32.totalorder %s2708_s20, 0  ;;  %s1493_s23 = scalar_lea.sflag [#allocation4], %s1492_s22 }
 0xa9b   : > { %p1932_p7 = pnand %p1941_p2, %p2721_p9 }
 0xa9d   : > { %2133 = dma.done.wait (!%p1932_p7), %s1493_s23, 128  }
 0xa9e   : > { %2135 = vsyncadd (!%p1932_p7), %s1493_s23, 4294967168  ;;  %p22_p5 = scmp.ge.s32.totalorder %s2235_s15, 4   ;;  %s2722_s30 = smov %s2142_s10 }
 0xa9f   : > { %s2723_s10 = smov %s2146_s11  ;;  %s2724_s11 = smov %s2246_s18 }
 0xaa0   : > { %s2725_s12 = smov %s2235_s15  ;;  %24 = sbr.rel (!%p22_p5) target bundleno = 8 (0x8), region = 112 }
 0xaa7   :  { %1505 = vsyncpa [#allocation4], 1 }
 0xaa8   :  { %1507 = vsyncpa [#allocation4 + $0x1], 1 }
 0xaa9   :  { %1508 = vsyncpa [#allocation5], 1 }
 0xaaa   :  { %1510 = vsyncpa [#allocation5 + $0x1], 1 }
 0xaab   :  { %1511 = vsyncpa [#allocation7], 1 }

// kernel: custom-call.22
= control target key start
LH: loop header
LB: loop body
LE: loop exit
PB: predicated region body
PF: predicated region fallthrough
CT: control target
= control target key end

     0   :  { %s1704_s30 = smov 0   ;;  %s1706_s10 = smov 0   ;;  %s2030_s0 = inlined_call_operand.vmem [shape: f32[2,2,2], index: 0, kind: input, shape index: {}]   ;;  %s2031_s1 = inlined_call_operand.vmem [shape: f32[2,2,2], index: 1, kind: input, shape index: {}]   ;;  %s2032_s2 = inlined_call_operand.vmem [shape: f32[2,2,2], index: 2, kind: input, shape index: {}]   ;;  %s2033_s3 = inlined_call_operand.vmem [shape: f32[2,2,2], index: 3, kind: input, shape index: {}]   ;;  %s2034_s4 = inlined_call_operand.vmem [shape: f32[2,2], index: 4, kind: output, shape index: {0}]   ;;  %s2035_s5 = inlined_call_operand.vmem [shape: f32[2,2], index: 5, kind: output, shape index: {1}]   ;;  %s2036_s6 = inlined_call_operand.vmem [shape: f32[2,2,2], index: 6, kind: output, shape index: {2}]   ;;  %s2037_s7 = inlined_call_operand.vmem [shape: f32[2,2,2], index: 7, kind: output, shape index: {3}]   ;;  %s2038_s8 = inlined_call_operand.vmem [shape: f32[2,2,2], index: 8, kind: output, shape index: {4}]   ;;  %s2039_s9 = inlined_call_operand.vmem [shape: f32[2,2,2], index: 9, kind: output, shape index: {5}]  }
   0x1   :  { %s1708_s11 = smov 0  }
   0x2 LB: > { %s1720_s12 = sadd.s32 4294967295, %s1641_s11   ;;  %s1723_s13 = sadd.s32 1, %s1641_s11   ;;  %s1641_s11 = sphi %s1708_s11, %s2058_s11   ;;  %s1637_s10 = sphi %s1706_s10, %s2057_s10   ;;  %s1633_s30 = sphi %s1704_s30, %s2056_s30  }
   0x3   : > { %s20_s14 = sshrl.u32 %s1641_s11, 3  ;;  %s21_s15 = sshrl.u32 %s1723_s13, 3 }
   0x4   : > { %s22_s16 = ssub.s32 %s20_s14, %s21_s15  ;;  %s25_s17 = sadd.s32 1, %s1637_s10 }
   0x5   : > { %p23_p0 = scmp.eq.s32.totalorder %s22_s16, 0  ;;  %p35_p1 = scmp.ne.s32.totalorder %s1637_s10, %s1633_s30 }
   0x6   : > { %p36_p2 = scmp.eq.s32.totalorder %s1720_s12, 1  ;;  %p1502_p4 = scmp.ge.s32.totalorder %s1641_s11, 2 }
   0x7   : > { %s1732_s18 = scalar_select %p23_p0, %s1637_s10, %s25_s17  }
   0x8   : > { %p1734_p3 = por %p36_p2, %p35_p1  ;;  %86 = sbr.rel (%p1502_p4) target bundleno = 17 (0x11), region = 16 }
   0x9   : > { %2040 = sst [smem:[#allocation33_spill]] %s1732_s18  ;;  %s88_s20 = sand.u32 (!%p1502_p4), 1, %s1641_s11  }
   0xa   : > { %s1504_s21 = sshll.u32 (!%p1502_p4), %s1641_s11, 1  ;;  %s1503_s22 = sshll.u32 (!%p1502_p4), %s88_s20, 1 }
   0xb   : > { %s92_s25 = scalar_lea.vmem (!%p1502_p4), %s2030_s0, %s1504_s21  ;;  %s90_s26 = scalar_lea.vmem (!%p1502_p4), [#allocation1], %s1503_s22 }
   0xc   : > { %v108_v0 = vld [vmem:[%s92_s25] sm:$0x3] (!%p1502_p4)  ;;  %s129_s29 = scalar_lea.vmem (!%p1502_p4), %s2031_s1, %s1504_s21  ;;  %s166_s16 = scalar_lea.vmem (!%p1502_p4), %s2032_s2, %s1504_s21 }
   0xd   : > { %109 = vst [vmem:[%s90_s26] sm:$0x3] (!%p1502_p4), %v108_v0  ;;  %v145_v1 = vld [vmem:[%s129_s29] sm:$0x3] (!%p1502_p4)  ;;  %s127_s17 = scalar_lea.vmem (!%p1502_p4), [#allocation3], %s1503_s22  ;;  %s203_s23 = scalar_lea.vmem (!%p1502_p4), %s2033_s3, %s1504_s21 }
   0xe   : > { %146 = vst [vmem:[%s127_s17] sm:$0x3] (!%p1502_p4), %v145_v1  ;;  %v182_v2 = vld [vmem:[%s166_s16] sm:$0x3] (!%p1502_p4)  ;;  %s164_s24 = scalar_lea.vmem (!%p1502_p4), [#allocation5], %s1503_s22  ;;  %s201_s25 = scalar_lea.vmem (!%p1502_p4), [#allocation7], %s1503_s22 }
   0xf   : > { %183 = vst [vmem:[%s164_s24] sm:$0x3] %v182_v2  ;;  %v219_v3 = vld [vmem:[%s203_s23] sm:$0x3] }
  0x10   : > { %220 = vst [vmem:[%s201_s25] sm:$0x3] %v219_v3 }
  0x11 PF: > { %p1511_p5 = scmp.ge.s32.totalorder %s1641_s11, 1  ;;  %p236_p6 = scmp.lt.s32.totalorder %s1641_s11, 3 }
  0x13   : > { %p237_p7 = pnand %p1511_p5, %p236_p6 }
  0x15   : > { %240 = sbr.rel (%p237_p7) target bundleno = 999 (0x3e7), region = 140 }
  0x1c   : > { %s259_s26 = sand.u32 1, %s1720_s12   ;;  %s277_s27 = sand.u32 1, %s1633_s30   ;;  %v337_v4 = vlaneseq  ;;  %v1651_v5 = vmov 0.0  }
  0x1d   : > { %s1757_s28 = sshll.u32 %s259_s26, 1  ;;  %s1759_s18 = sshll.u32 %s277_s27, 1  ;;  %332 = vst [vmem:[#allocation12] sm:$0xff] %v1651_v5  ;;  %333 = vst [vmem:[#allocation14] sm:$0xff] %v1651_v5 }
  0x1e   : > { %334 = vst [vmem:[#allocation16] sm:$0xff] %v1651_v5  ;;  %335 = vst [vmem:[#allocation18] sm:$0xff] %v1651_v5  ;;  %v1761_v6 = vand.u32 127, %v337_v4  ;;  %v1763_v7 = vshrl.u32 %v337_v4, 7  ;;  %s261_s11 = scalar_lea.vmem [#allocation1], %s1757_s28  ;;  %s265_s30 = scalar_lea.vmem [#allocation3], %s1757_s28 }
  0x1f   : > { %v304_v8 = vld [vmem:[%s261_s11] sm:$0x3]  ;;  %v308_v9 = vld [vmem:[%s265_s30] sm:$0x3]  ;;  %s269_s21 = scalar_lea.vmem [#allocation5], %s1757_s28  ;;  %s273_s22 = scalar_lea.vmem [#allocation7], %s1757_s28 }
  0x20   : > { %305 = vst [vmem:[#allocation0] sm:$0x3] %v304_v8  ;;  %309 = vst [vmem:[#allocation2] sm:$0x3] %v308_v9  ;;  %v312_v10 = vld [vmem:[%s269_s21] sm:$0x3]  ;;  %v339_v6 = vmov %v1761_v6  ;;  %v342_v7 = vmov %v1763_v7 }
  0x21   : > { %v316_v11 = vld [vmem:[%s273_s22] sm:$0x3]  ;;  %313 = vst [vmem:[#allocation4] sm:$0x3] %v312_v10  ;;  %v352_v6 = vmov %v1761_v6  ;;  %v355_v7 = vmov %v1763_v7  ;;  %s320_s29 = smov [#allocation20]  ;;  %s323_s14 = smov [#allocation21]  ;;  %vm346_vm0 = vcmp.eq.s32.totalorder %v342_v7, %v339_v6 }
  0x22   : > { %317 = vst [vmem:[#allocation6] sm:$0x3] %v316_v11  ;;  %vm359_vm1 = vcmp.eq.s32.totalorder %v355_v7, %v352_v6  ;;  %s336_s15 = smov [#allocation12]  ;;  %s349_s16 = smov [#allocation18]  ;;  %vm1391_vm2 = vcmp.lt.s32.totalorder %v1761_v6, 2  ;;  %v1383_v6 = vmov %v1761_v6  ;;  %v1386_v7 = vmov %v1763_v7 }
  0x23   : > { %s326_s17 = smov [#allocation22]  ;;  %s329_s20 = smov [#allocation23]  ;;  %vm1396_vm3 = vcmp.eq.s32.totalorder %v1386_v7, %v1383_v6  ;;  %v1434_v6 = vmov %v1761_v6  ;;  %v1403_v7 = vmov %v1763_v7 }
  0x24   : > { %v343_v12 = vld [vmem:[%s336_s15] sm:$0x3]  ;;  %s1387_s30 = smov [#allocation20]  ;;  %s1404_s21 = smov [#allocation21]  ;;  %v1400_v6 = vmov %v1761_v6  ;;  %v1437_v7 = vmov %v1763_v7 }
  0x25   : > { %v356_v13 = vld [vmem:[%s349_s16] sm:$0x3]  ;;  %v347_v16 = vsel %vm346_vm0, 1.0, %v343_v12  ;;  %s1421_s22 = smov [#allocation22]  ;;  %v1417_v6 = vmov %v1761_v6  ;;  %v1420_v7 = vmov %v1763_v7  ;;  %vm1447_vm4 = vcmp.eq.s32.totalorder %v1437_v7, %v1434_v6 }
  0x26   : > { %v360_v17 = vsel %vm359_vm1, 1.0, %v356_v13  ;;  %348 = vst [vmem:[%s336_s15] sm:$0x3] %v347_v16 }
  0x27   : > { %v321_v14 = vld [vmem:[#allocation0] sm:$0xff]  ;;  %v324_v15 = vld [vmem:[#allocation2] sm:$0xff]  ;;  %361 = vst [vmem:[%s349_s16] sm:$0x3] %v360_v17 }
  0x28   : > { %322 = vst [vmem:[%s320_s29] sm:$0xff] %v321_v14  ;;  %325 = vst [vmem:[%s323_s14] sm:$0xff] %v324_v15  ;;  %v327_v18 = vld [vmem:[#allocation4] sm:$0xff]  ;;  %s1438_s29 = smov [#allocation23] }
  0x29   : > { %v330_v19 = vld [vmem:[#allocation6] sm:$0xff]  ;;  %328 = vst [vmem:[%s326_s17] sm:$0xff] %v327_v18 }
  0x2a   : > { %331 = vst [vmem:[%s329_s20] sm:$0xff] %v330_v19 }
  0x2f   : > { %v1393_v20 = vld [vmem:[%s1387_s30] sm:$0x3] }
  0x30   : > { %v1410_v21 = vld [vmem:[%s1404_s21] sm:$0x3]  ;;  %v1394_v22 = vsel %vm1391_vm2, %v1393_v20, 0.0 }
  0x31   : > { %v1411_v23 = vsel %vm1391_vm2, %v1410_v21, 0.0  ;;  %v1427_v24 = vld [vmem:[%s1421_s22] sm:$0x3]  ;;  %v1395_v26 = vmul.f32 %v1394_v22, %v1394_v22 }
  0x32   : > { %v1444_v25 = vld [vmem:[%s1438_s29] sm:$0x3]  ;;  %v1412_v27 = vmul.f32 %v1411_v23, %v1411_v23  ;;  %v1428_v28 = vsel %vm1391_vm2, %v1427_v24, 0.0 }
  0x33   : > { %v1445_v29 = vsel %vm1391_vm2, %v1444_v25, 0.0  ;;  %v1429_v30 = vmul.f32 %v1428_v28, %v1428_v28  ;;  %v1397_v33 = vsel %vm1396_vm3, 0.0, %v1395_v26 }
  0x34   : > { %v1414_v31 = vadd.f32 %v1412_v27, %v1395_v26  ;;  %v1446_v32 = vmul.f32 %v1445_v29, %v1445_v29  ;;  %v1413_v34 = vadd.f32 %v1412_v27, %v1397_v33 }
  0x36   : > { %v1431_v35 = vadd.f32 %v1429_v30, %v1414_v31  ;;  %v1430_v36 = vadd.f32 %v1429_v30, %v1413_v34  ;;  %v1448_v37 = vsel %vm1447_vm4, 0.0, %v1446_v32 }
  0x38   : > { %v1450_v38 = vadd.f32 %v1446_v32, %v1431_v35  ;;  %v1449_v39 = vadd.f32 %v1448_v37, %v1430_v36 }
  0x3a   : > { %1451 = vadd.xlane.f32.xlu0 %v1450_v38 }
  0x3e   : > { %1459 = vadd.xlane.f32.xlu0 %v1449_v39 }
  0xc7   : > { %v1452_v40 = vpop.xlane.xlu0 %1451 }
  0xc8   : > { %v1453_v41 = vrot.slane %v1452_v40, 4 }
  0xca   : > { %v1454_v42 = vadd.f32 %v1453_v41, %v1452_v40 }
  0xcb   : > { %v1460_v43 = vpop.xlane.xlu0 %1459 }
  0xcc   : > { %v1455_v44 = vrot.slane %v1454_v42, 2  ;;  %v1461_v45 = vrot.slane %v1460_v43, 4 }
  0xce   : > { %v1462_v46 = vadd.f32 %v1461_v45, %v1460_v43  ;;  %v1456_v47 = vadd.f32 %v1455_v44, %v1454_v42 }
  0xd0   : > { %v1463_v48 = vrot.slane %v1462_v46, 2  ;;  %v1457_v50 = vrot.slane %v1456_v47, 1 }
  0xd2   : > { %v1464_v49 = vadd.f32 %v1463_v48, %v1462_v46  ;;  %v1458_v53 = vadd.f32 %v1457_v50, %v1456_v47 }
  0xd4   : > { %v1465_v51 = vrot.slane %v1464_v49, 1 }
  0xd6   : > { %v1466_v52 = vadd.f32 %v1465_v51, %v1464_v49 }
  0xd8   : > { %1552 = vpush %v1466_v52 }
  0xd9   : > { %1554 = vpush %v1458_v53 }
 0x109   : > { %s1553_s14 = spop %1552 }
 0x10a   : > { %s1555_s15 = spop %1554 }
 0x10b   : > { %s1469_s16 = smul.f32 1e-10, %s1555_s15 }
 0x10d   : > { %p1470_p8 = scmp.le.f32.partialorder %s1553_s14, %s1469_s16 }
 0x10e   : > { %s1797_s17 = smov (!%p1470_p8), 0  }
 0x10f   : > { %1473 = sbr.rel (%p1470_p8) target bundleno = 953 (0x3b9), region = 467 }
 0x116 LB: >> { %s1802_s20 = smov 0   ;;  %s1645_s17 = sphi %s1797_s17, %s2042_s17  }
 0x117 LB: >>> { %s466_s30 = smov [#allocation20]  ;;  %v470_v6 = vmov %v1761_v6  ;;  %v473_v7 = vmov %v1763_v7  ;;  %s486_s21 = smov [#allocation21]  ;;  %vm789_vm14 = vcmp.eq.s32.totalorder %v1763_v7, 0  ;;  %vm801_vm15 = vcmp.eq.s32.totalorder %v1763_v7, 1  ;;  %s1649_s20 = sphi %s1802_s20, %s465_s20  }
 0x118   : >>> { %v490_v6 = vmov %v1761_v6  ;;  %v493_v7 = vmov %v1763_v7  ;;  %v474_v54 = vld [vmem:[%s466_s30] sm:$0x3]  ;;  %vm477_vm5 = vcmp.eq.s32.totalorder %v473_v7, %v470_v6  ;;  %s506_s22 = smov [#allocation23]  ;;  %s467_s29 = smov [#allocation24] }
 0x119   : >>> { %vm497_vm6 = vcmp.eq.s32.totalorder %v493_v7, %v490_v6  ;;  %v510_v6 = vmov %v1761_v6  ;;  %v513_v7 = vmov %v1763_v7  ;;  %v478_v55 = vsel %vm477_vm5, %v474_v54, 0.0  ;;  %v494_v56 = vld [vmem:[%s486_s21] sm:$0x3]  ;;  %s487_s14 = smov [#allocation25]  ;;  %s507_s15 = smov [#allocation26] }
 0x11a   : >>> { %vm517_vm7 = vcmp.eq.s32.totalorder %v513_v7, %v510_v6  ;;  %v479_v57 = vrot.slane %v478_v55, 4  ;;  %v498_v58 = vsel %vm497_vm6, %v494_v56, 0.0  ;;  %v514_v59 = vld [vmem:[%s506_s22] sm:$0x3]  ;;  %s530_s16 = smov [#allocation25]  ;;  %s528_s30 = smov [#allocation24]  ;;  %v579_v6 = vmov %v1761_v6 }
 0x11b   : >>> { %v499_v60 = vrot.slane %v498_v58, 4  ;;  %v518_v61 = vsel %vm517_vm7, %v514_v59, 0.0  ;;  %s532_s21 = smov [#allocation26]  ;;  %s567_s22 = smov [#allocation27]  ;;  %v582_v7 = vmov %v1763_v7  ;;  %v594_v6 = vmov %v1761_v6 }
 0x11c   : >>> { %v480_v62 = vadd.f32 %v479_v57, %v478_v55  ;;  %v519_v63 = vrot.slane %v518_v61, 4  ;;  %v597_v7 = vmov %v1763_v7  ;;  %vm584_vm12 = vcmp.eq.s32.totalorder %v582_v7, %v579_v6  ;;  %s1821_s24 = smov [#allocation22]  ;;  %s1827_s23 = smov [#allocation14] }
 0x11d   : >>> { %v500_v0 = vadd.f32 %v499_v60, %v498_v58  ;;  %vm599_vm13 = vcmp.eq.s32.totalorder %v597_v7, %v594_v6  ;;  %s829_s11 = smov [#allocation31]  ;;  %s1833_s27 = smov [#allocation18]  ;;  %v615_v55 = vld [vmem:[%s1821_s24] sm:$0x3]  ;;  %v692_v6 = vmov %v1761_v6  ;;  %v695_v7 = vmov %v1763_v7 }
 0x11e   : >>> { %v481_v1 = vrot.slane %v480_v62, 2  ;;  %v520_v2 = vadd.f32 %v519_v63, %v518_v61  ;;  %v838_v58 = vld [vmem:[%s1827_s23] sm:$0x3]  ;;  %s607_s26 = smov [#allocation32]  ;;  %s831_s25 = smov [#allocation32]  ;;  %v706_v6 = vmov %v1761_v6  ;;  %v709_v7 = vmov %v1763_v7 }
 0x11f   : >>> { %v501_v3 = vrot.slane %v500_v0, 2  ;;  %v840_v61 = vld [vmem:[%s1833_s27] sm:$0x3]  ;;  %vm699_vm0 = vcmp.eq.s32.totalorder %v695_v7, %v692_v6  ;;  %v665_v6 = vmov %v1761_v6  ;;  %v668_v7 = vmov %v1763_v7  ;;  %s465_s20 = sadd.s32 1, %s1649_s20  }
 0x120   : >>> { %v482_v4 = vadd.f32 %v481_v1, %v480_v62  ;;  %v521_v5 = vrot.slane %v520_v2, 2  ;;  %v679_v6 = vmov %v1761_v6  ;;  %v682_v7 = vmov %v1763_v7  ;;  %p462_p9 = scmp.ge.s32.totalorder %s465_s20, 3  }
 0x121   : >>> { %v502_v8 = vadd.f32 %v501_v3, %v500_v0  ;;  %vm714_vm1 = vcmp.eq.s32.totalorder %v709_v7, %v706_v6  ;;  %vm673_vm3 = vcmp.eq.s32.totalorder %v668_v7, %v665_v6  ;;  %vm686_vm4 = vcmp.eq.s32.totalorder %v682_v7, %v679_v6 }
 0x122   : >>> { %v483_v9 = vrot.slane %v482_v4, 1  ;;  %v522_v10 = vadd.f32 %v521_v5, %v520_v2  ;;  %vm728_vm5 = vcmp.eq.s32.totalorder %v1761_v6, 0  ;;  %vm732_vm6 = vcmp.eq.s32.totalorder %v1761_v6, 1 }
 0x123   : >>> { %v503_v11 = vrot.slane %v502_v8, 1  ;;  %v366_v6 = vmov (%p462_p9), %v1761_v6  ;;  %v369_v7 = vmov (%p462_p9), %v1763_v7 }
 0x124   : >>> { %v484_v12 = vadd.f32 %v483_v9, %v482_v4  ;;  %v523_v13 = vrot.slane %v522_v10, 1  ;;  %v419_v6 = vmov (%p462_p9), %v1761_v6  ;;  %vm381_vm7 = vcmp.eq.s32.totalorder (%p462_p9), %v369_v7, %v366_v6 }
 0x125   : >>> { %v504_v14 = vadd.f32 %v503_v11, %v502_v8  ;;  %v422_v7 = vmov (%p462_p9), %v1763_v7  ;;  %v385_v6 = vmov (%p462_p9), %v1761_v6 }
 0x126   : >>> { %485 = vst [vmem:[%s467_s29] sm:$0x1] %v484_v12  ;;  %v524_v15 = vadd.f32 %v523_v13, %v522_v10  ;;  %s569_s29 = smov [#allocation28]  ;;  %v388_v7 = vmov (%p462_p9), %v1763_v7  ;;  %v402_v6 = vmov (%p462_p9), %v1761_v6 }
 0x127   : >>> { %505 = vst [vmem:[%s487_s14] sm:$0x1] %v504_v14  ;;  %s526_s14 = smov [#allocation29]  ;;  %v405_v7 = vmov (%p462_p9), %v1763_v7 }
 0x128   : >>> { %525 = vst [vmem:[%s507_s15] sm:$0x1] %v524_v15  ;;  %s527_s15 = smov [#allocation30]  ;;  %s571_s14 = smov %s526_s14 }
 0x129   : >>> { %s573_s15 = smov %s527_s15 }
 0x12d   : >>> { %v529_v18 = vld [vmem:[%s528_s30] sm:$0xff]  ;;  %s590_s30 = smov [#allocation30] }
 0x12e   : >>> { %v531_v16 = vld [vmem:[%s530_s16] sm:$0xff]  ;;  %v552_v31 = vand.u32 2147483647, %v529_v18  ;;  %s575_s16 = smov [#allocation29] }
 0x12f   : >>> { %v535_v17 = vmul.f32 2.0, %v531_v16  ;;  %v533_v19 = vld [vmem:[%s532_s21] sm:$0xff]  ;;  %v553_v36 = vand.u32 2147483647, %v531_v16  ;;  %s588_s21 = smov [#allocation31] }
 0x130   : >>> { %v534_v20 = vsub.f32 %v533_v19, %v529_v18  ;;  %v554_v32 = vand.u32 2147483647, %v533_v19 }
 0x131   : >>> { %1603 = vrcp.f32 %v535_v17 }
 0x132   : >>> { %v555_v35 = vmin.f32 %v552_v31, %v554_v32 }
 0x134   : >>> { %v556_v37 = vmul.f32 1.1920929e-08, %v555_v35 }
 0x136   : >>> { %vm557_vm11 = vcmp.le.f32.partialorder %v553_v36, %v556_v37 }
 0x13b   : >>> { %v1604_v21 = vpop.eup %1603 }
 0x13c   : >>> { %v537_v22 = vmul.f32 %v1604_v21, %v534_v20 }
 0x13e   : >>> { %v539_v23 = vmul.f32 %v537_v22, %v537_v22  ;;  %vm538_vm10 = vcmp.ge.f32.partialorder %v537_v22, 0.0 }
 0x140   : >>> { %v540_v24 = vadd.f32 1.0, %v539_v23 }
 0x142   : >>> { %1605 = vrsqrt.f32 %v540_v24  ;;  %vm543_vm8 = vcmp.eq.f32.partialorder %v540_v24, inf  ;;  %v546_v26 = vand.u32 2147483648, %v540_v24  ;;  %vm545_vm9 = vcmp.eq.f32.partialorder %v540_v24, 0.0 }
 0x14c   : >>> { %v1606_v25 = vpop.eup %1605 }
 0x14d   : >>> { %v542_v27 = vmul.f32 %v1606_v25, %v540_v24 }
 0x14f   : >>> { %v544_v28 = vsel %vm543_vm8, %v540_v24, %v542_v27  ;;  %vm434_vm8 = vcmp.eq.s32.totalorder (%p462_p9), %v422_v7, %v419_v6 }
 0x150   : >>> { %v547_v29 = vsel %vm545_vm9, %v546_v26, %v544_v28 }
 0x151   : >>> { %v548_v30 = vxor.u32 2147483648, %v547_v29 }
 0x153   : >>> { %v549_v33 = vsel %vm538_vm10, %v547_v29, %v548_v30 }
 0x154   : >>> { %v550_v34 = vadd.f32 %v549_v33, %v537_v22 }
 0x156   : >>> { %1607 = vrcp.f32 %v550_v34 }
 0x160   : >>> { %v1608_v38 = vpop.eup %1607 }
 0x161   : >>> { %v558_v39 = vsel %vm557_vm11, 0.0, %v1608_v38 }
 0x162   : >>> { %v559_v40 = vmul.f32 %v558_v39, %v558_v39  ;;  %v563_v41 = vmul.f32 %v558_v39, %v531_v16 }
 0x164   : >>> { %v560_v42 = vadd.f32 1.0, %v559_v40  ;;  %v564_v43 = vsub.f32 %v529_v18, %v563_v41  ;;  %v566_v44 = vadd.f32 %v563_v41, %v533_v19 }
 0x166   : >>> { %1609 = vrsqrt.f32 %v560_v42  ;;  %568 = vst [vmem:[%s567_s22] sm:$0xff] %v564_v43  ;;  %570 = vst [vmem:[%s569_s29] sm:$0xff] %v566_v44  ;;  %s605_s22 = smov [#allocation31]  ;;  %s1817_s29 = smov [#allocation20] }
 0x167   : >>> { %v613_v53 = vld [vmem:[%s1817_s29] sm:$0x3] }
 0x170   : >>> { %v1610_v45 = vpop.eup %1609 }
 0x171   : >>> { %572 = vst [vmem:[%s571_s14] sm:$0xff] %v1610_v45  ;;  %v562_v46 = vmul.f32 %v1610_v45, %v558_v39  ;;  %s603_s14 = smov [#allocation32] }
 0x173   : >>> { %574 = vst [vmem:[%s573_s15] sm:$0xff] %v562_v46  ;;  %s1819_s15 = smov [#allocation21] }
 0x174   : >>> { %v614_v54 = vld [vmem:[%s1819_s15] sm:$0x3] }
 0x178   : >>> { %v576_v47 = vld [vmem:[%s575_s16] ss:$0 sm:$0xff]  ;;  %s1823_s16 = smov [#allocation23] }
 0x179   : >>> { %v585_v48 = vsel %vm584_vm12, %v576_v47, 0.0  ;;  %v616_v56 = vld [vmem:[%s1823_s16] sm:$0x3] }
 0x17a   : >>> { %586 = vadd.xlane.f32.xlu0 %v585_v48  ;;  %v591_v49 = vld [vmem:[%s590_s30] ss:$0 sm:$0xff]  ;;  %s1825_s30 = smov [#allocation12] }
 0x17b   : >>> { %v600_v50 = vsel %vm599_vm13, %v591_v49, 0.0  ;;  %v837_v57 = vld [vmem:[%s1825_s30] sm:$0x3] }
 0x17e   : >>> { %601 = vadd.xlane.f32.xlu0 %v600_v50 }
 0x207   : >>> { %v587_v51 = vpop.xlane.xlu0 %586 }
 0x208   : >>> { %589 = vst [vmem:[%s588_s21] sm:$0xff] %v587_v51  ;;  %s1829_s21 = smov [#allocation16] }
 0x209   : >>> { %v839_v59 = vld [vmem:[%s1829_s21] sm:$0x3] }
 0x20b   : >>> { %v602_v52 = vpop.xlane.xlu0 %601 }
 0x20c   : >>> { %604 = vst [vmem:[%s603_s14] sm:$0xff] %v602_v52  ;;  %s1853_s14 = smov [#allocation23] }
 0x20f   : >>> { %v606_v60 = vld [vmem:[%s605_s22] sm:$0xff]  ;;  %s1851_s22 = smov [#allocation22] }
 0x210   : >>> { %v830_v62 = vld [vmem:[%s829_s11] sm:$0xff]  ;;  %v617_v63 = vmul.f32 %v613_v53, %v606_v60  ;;  %v620_v0 = vmul.f32 %v614_v54, %v606_v60  ;;  %v624_v1 = vmul.f32 %v615_v55, %v606_v60  ;;  %v627_v2 = vmul.f32 %v616_v56, %v606_v60  ;;  %s1849_s11 = smov [#allocation12] }
 0x211   : >>> { %v841_v3 = vmul.f32 %v837_v57, %v830_v62  ;;  %v844_v4 = vmul.f32 %v838_v58, %v830_v62  ;;  %v848_v5 = vmul.f32 %v839_v59, %v830_v62  ;;  %v851_v8 = vmul.f32 %v840_v61, %v830_v62 }
 0x213   : >>> { %v608_v9 = vld [vmem:[%s607_s26] sm:$0xff]  ;;  %s635_s26 = smov [#allocation30] }
 0x214   : >>> { %v832_v10 = vld [vmem:[%s831_s25] sm:$0xff]  ;;  %v618_v11 = vmul.f32 %v615_v55, %v608_v9  ;;  %v621_v12 = vmul.f32 %v616_v56, %v608_v9  ;;  %v623_v13 = vmul.f32 %v613_v53, %v608_v9  ;;  %v626_v14 = vmul.f32 %v614_v54, %v608_v9  ;;  %s633_s25 = smov [#allocation29] }
 0x215   : >>> { %v842_v15 = vmul.f32 %v839_v59, %v832_v10  ;;  %v845_v16 = vmul.f32 %v840_v61, %v832_v10  ;;  %v847_v17 = vmul.f32 %v837_v57, %v832_v10  ;;  %v850_v18 = vmul.f32 %v838_v58, %v832_v10  ;;  %v634_v27 = vld [vmem:[%s633_s25] ss:$0 sm:$0xff]  ;;  %s662_s25 = smov [#allocation27] }
 0x216   : >>> { %v619_v19 = vsub.f32 %v617_v63, %v618_v11  ;;  %v622_v20 = vsub.f32 %v620_v0, %v621_v12  ;;  %v625_v21 = vadd.f32 %v624_v1, %v623_v13  ;;  %v628_v22 = vadd.f32 %v627_v2, %v626_v14  ;;  %v636_v28 = vld [vmem:[%s635_s26] ss:$0 sm:$0xff]  ;;  %s661_s26 = smov [#allocation20] }
 0x217   : >>> { %v843_v23 = vsub.f32 %v841_v3, %v842_v15  ;;  %v846_v24 = vsub.f32 %v844_v4, %v845_v16  ;;  %v849_v25 = vadd.f32 %v848_v5, %v847_v17  ;;  %v852_v26 = vadd.f32 %v851_v8, %v850_v18  ;;  %v669_v63 = vld [vmem:[%s662_s25] ss:$0 sm:$0xff]  ;;  %s905_s25 = sadd.s32 (%p462_p9), 1, %s1645_s17  }
 0x218   : >>> { %630 = vst [vmem:[%s1819_s15] sm:$0x3] %v622_v20  ;;  %632 = vst [vmem:[%s1823_s16] sm:$0x3] %v628_v22  ;;  %s1855_s15 = smov [#allocation20]  ;;  %s703_s16 = smov [#allocation28] }
 0x219   : >>> { %629 = vst [vmem:[%s1817_s29] sm:$0x3] %v619_v19  ;;  %631 = vst [vmem:[%s1821_s24] sm:$0x3] %v625_v21  ;;  %s1857_s24 = smov [#allocation16]  ;;  %s1865_s29 = smov [#allocation21]  ;;  %v710_v59 = vld [vmem:[%s703_s16] ss:$0 sm:$0xff] }
 0x21a   : >>> { %853 = vst [vmem:[%s1825_s30] sm:$0x3] %v843_v23  ;;  %854 = vst [vmem:[%s1827_s23] sm:$0x3] %v846_v24  ;;  %s1859_s23 = smov [#allocation14]  ;;  %s689_s30 = smov [#allocation22] }
 0x21b   : >>> { %855 = vst [vmem:[%s1829_s21] sm:$0x3] %v849_v25  ;;  %856 = vst [vmem:[%s1833_s27] sm:$0x3] %v852_v26  ;;  %s1863_s27 = smov [#allocation18]  ;;  %s702_s21 = smov [#allocation23] }
 0x21c   : >>> { %s805_s16 = smov [#allocation21]  ;;  %p458_p10 = scmp.ge.s32.totalorder (%p462_p9), %s905_s25, 15 }
 0x21d   : >> { %s2042_s17 = smov (%p462_p9), %s905_s25 }
 0x21f   : >>> { %v644_v30 = vld [vmem:[%s1853_s14] sm:$0x3] }
 0x220   : >>> { %v643_v29 = vld [vmem:[%s1851_s22] sm:$0x3]  ;;  %v652_v36 = vmul.f32 %v644_v30, %v636_v28  ;;  %v655_v42 = vmul.f32 %v644_v30, %v634_v27 }
 0x221   : >>> { %v641_v31 = vld [vmem:[%s1855_s15] sm:$0x3]  ;;  %v651_v35 = vmul.f32 %v643_v29, %v634_v27  ;;  %v654_v37 = vmul.f32 %v643_v29, %v636_v28 }
 0x222   : >>> { %v859_v32 = vld [vmem:[%s1849_s11] ss:$0 sm:$0xff]  ;;  %v1531_v34 = vld [vmem:[%s1849_s11 + $0x1] ss:$0 sm:$0xff]  ;;  %v645_v48 = vmul.f32 %v641_v31, %v634_v27  ;;  %v648_v49 = vmul.f32 %v641_v31, %v636_v28 }
 0x223   : >>> { %v1530_v33 = vld [vmem:[%s1849_s11 - $0x1] sm:$0x2]  ;;  %v1533_v40 = vld [vmem:[%s1857_s24 + $0x1] sm:$0x1]  ;;  %v653_v47 = vsub.f32 %v651_v35, %v652_v36  ;;  %v656_v53 = vadd.f32 %v655_v42, %v654_v37 }
 0x224   : >>> { %v866_v38 = vsel %vm789_vm14, %v859_v32, %v1530_v33  ;;  %v870_v39 = vld [vmem:[%s1857_s24] ss:$0 sm:$0xff]  ;;  %v878_v43 = vsel %vm801_vm15, %v1531_v34, %v1533_v40  ;;  %v1535_v45 = vld [vmem:[%s1859_s23 + $0x1] ss:$0 sm:$0xff] }
 0x225   : >>> { %v883_v41 = vld [vmem:[%s1859_s23] ss:$0 sm:$0xff]  ;;  %869 = vst [vmem:[%s1849_s11] sm:$0x3] %v866_v38  ;;  %880 = vst [vmem:[%s1857_s24] sm:$0x3] %v878_v43  ;;  %v1537_v51 = vld [vmem:[%s1863_s27 + $0x1] sm:$0x1] }
 0x226   : >>> { %v1534_v44 = vld [vmem:[%s1859_s23 - $0x1] sm:$0x2]  ;;  %1532 = vst [vmem:[%s1849_s11 + $0x1] sm:$0x1] %v870_v39  ;;  %v902_v54 = vsel %vm801_vm15, %v1535_v45, %v1537_v51  ;;  %659 = vst [vmem:[%s1851_s22] sm:$0x3] %v653_v47  ;;  %s676_s11 = smov [#allocation21] }
 0x227   : >>> { %v894_v46 = vld [vmem:[%s1863_s27] ss:$0 sm:$0xff]  ;;  %v890_v50 = vsel %vm789_vm14, %v883_v41, %v1534_v44  ;;  %660 = vst [vmem:[%s1853_s14] sm:$0x3] %v656_v53  ;;  %s1907_s22 = smov [#allocation22]  ;;  %s1652_s14 = smov 1  }
 0x228   : >>> { %v642_v52 = vld [vmem:[%s1865_s29] sm:$0x3]  ;;  %893 = vst [vmem:[%s1859_s23] sm:$0x3] %v890_v50  ;;  %904 = vst [vmem:[%s1863_s27] sm:$0x3] %v902_v54  ;;  %s718_s24 = smov [#allocation21]  ;;  %s1910_s27 = smov [#allocation23] }
 0x229   : >>> { %v646_v55 = vmul.f32 %v642_v52, %v636_v28  ;;  %v649_v56 = vmul.f32 %v642_v52, %v634_v27  ;;  %1536 = vst [vmem:[%s1859_s23 + $0x1] sm:$0x1] %v894_v46  ;;  %s1653_s23 = smov 127  }
 0x22b   : >>> { %v647_v57 = vsub.f32 %v645_v48, %v646_v55  ;;  %v650_v58 = vadd.f32 %v649_v56, %v648_v49 }
 0x22d   : >>> { %657 = vst [vmem:[%s1855_s15] sm:$0x3] %v647_v57  ;;  %658 = vst [vmem:[%s1865_s29] sm:$0x3] %v650_v58  ;;  %v696_v60 = vld [vmem:[%s689_s30] sm:$0x3]  ;;  %s717_s15 = smov [#allocation20]  ;;  %s781_s29 = smov [#allocation20] }
 0x22e   : >>> { %v700_v61 = vsel %vm699_vm0, 0.0, %v696_v60  ;;  %v711_v62 = vld [vmem:[%s702_s21] sm:$0x3] }
 0x22f   : >>> { %701 = vst [vmem:[%s689_s30] sm:$0x3] %v700_v61  ;;  %v715_v0 = vsel %vm714_vm1, %v710_v59, %v711_v62  ;;  %s782_s30 = smov [#allocation22] }
 0x230   : >>> { %716 = vst [vmem:[%s702_s21] sm:$0x3] %v715_v0  ;;  %s806_s21 = smov [#allocation23] }
 0x234   : >>> { %v670_v1 = vld [vmem:[%s661_s26] sm:$0x3] }
 0x235   : >>> { %v683_v2 = vld [vmem:[%s676_s11] sm:$0x3]  ;;  %v674_v3 = vsel %vm673_vm3, %v669_v63, %v670_v1 }
 0x236   : >>> { %v687_v4 = vsel %vm686_vm4, 0.0, %v683_v2  ;;  %675 = vst [vmem:[%s661_s26] sm:$0x3] %v674_v3  ;;  %v755_v5 = vld [vmem:[%s1907_s22] sm:$0x3]  ;;  %s370_s26 = smov (%p462_p9), [#allocation20] }
 0x237   : >>> { %688 = vst [vmem:[%s676_s11] sm:$0x3] %v687_v4  ;;  %756 = vrot.lane.b32.xlu0 %v755_v5, %s1652_s14  ;;  %v751_v11 = vld [vmem:[%s1910_s27] sm:$0x3]  ;;  %s389_s11 = smov (%p462_p9), [#allocation21] }
 0x238   : >>> { %v772_v12 = vld [vmem:[%s1910_s27] sm:$0x3] }
 0x239   : >>> { %v754_v30 = vld [vmem:[%s1907_s22] sm:$0x3] }
 0x23d   : >>> { %v723_v8 = vld [vmem:[%s717_s15] sm:$0x3] }
 0x23e   : >>> { %724 = vrot.lane.b32.xlu1 %v723_v8, %s1652_s14  ;;  %v719_v9 = vld [vmem:[%s718_s24] sm:$0x3] }
 0x23f   : >>> { %v740_v10 = vld [vmem:[%s718_s24] sm:$0x3] }
 0x240   : >>> { %v722_v18 = vld [vmem:[%s717_s15] sm:$0x3] }
 0x242   : >>> { %720 = vrot.lane.b32.xlu1 %v719_v9, %s1652_s14 }
 0x246   : >>> { %741 = vrot.lane.b32.xlu1 %v740_v10, %s1653_s23 }
 0x24a   : >>> { %752 = vrot.lane.b32.xlu1 %v751_v11, %s1652_s14  ;;  %s423_s14 = smov (%p462_p9), [#allocation23] }
 0x24e   : >>> { %773 = vrot.lane.b32.xlu1 %v772_v12, %s1653_s23 }
 0x2a9   : >>> { %v757_v20 = vpop.permute.xlu0 %756 }
 0x2aa   : >>> { %v761_v22 = vsel %vm728_vm5, %v755_v5, %v757_v20 }
 0x2b0   : >>> { %v725_v13 = vpop.permute.xlu1 %724 }
 0x2b1   : >>> { %v729_v14 = vsel %vm728_vm5, %v723_v8, %v725_v13 }
 0x2b4   : >>> { %v721_v15 = vpop.permute.xlu1 %720 }
 0x2b5   : >>> { %v733_v16 = vsel %vm732_vm6, %v721_v15, %v729_v14 }
 0x2b6   : >>> { %v739_v17 = vsel %vm1391_vm2, %v733_v16, 0.0 }
 0x2b7   : >>> { %747 = vst [vmem:[%s717_s15] sm:$0x3] %v739_v17 }
 0x2b8   : >>> { %v742_v19 = vpop.permute.xlu1 %741 }
 0x2b9   : >>> { %v746_v21 = vsel %vm732_vm6, %v722_v18, %v742_v19 }
 0x2ba   : >>> { %748 = vst [vmem:[%s718_s24] sm:$0x3] %v746_v21 }
 0x2bc   : >>> { %v753_v23 = vpop.permute.xlu1 %752 }
 0x2bd   : >>> { %v765_v24 = vsel %vm732_vm6, %v753_v23, %v761_v22 }
 0x2be   : >>> { %v783_v25 = vld [vmem:[%s781_s29] ss:$0 sm:$0xff]  ;;  %v1523_v27 = vld [vmem:[%s781_s29 + $0x1] ss:$0 sm:$0xff]  ;;  %v771_v29 = vsel %vm1391_vm2, %v765_v24, 0.0 }
 0x2bf   : >>> { %v1522_v26 = vld [vmem:[%s781_s29 - $0x1] sm:$0x2]  ;;  %779 = vst [vmem:[%s1907_s22] sm:$0x3] %v771_v29  ;;  %s406_s22 = smov (%p462_p9), [#allocation22] }
 0x2c0   : >>> { %v790_v28 = vsel %vm789_vm14, %v783_v25, %v1522_v26  ;;  %v774_v31 = vpop.permute.xlu1 %773 }
 0x2c1   : >>> { %793 = vst [vmem:[%s781_s29] sm:$0x3] %v790_v28  ;;  %v807_v32 = vld [vmem:[%s805_s16] ss:$0 sm:$0xff]  ;;  %v1527_v34 = vld [vmem:[%s805_s16 + $0x1] ss:$0 sm:$0xff]  ;;  %v778_v35 = vsel %vm732_vm6, %v754_v30, %v774_v31 }
 0x2c2   : >>> { %v1526_v33 = vld [vmem:[%s805_s16 - $0x1] sm:$0x2]  ;;  %780 = vst [vmem:[%s1910_s27] sm:$0x3] %v778_v35 }
 0x2c3   : >>> { %v814_v36 = vsel %vm789_vm14, %v807_v32, %v1526_v33 }
 0x2c4   : >>> { %817 = vst [vmem:[%s805_s16] sm:$0x3] %v814_v36 }
 0x2c6   : >>> { %v794_v37 = vld [vmem:[%s782_s30] ss:$0 sm:$0xff]  ;;  %v1525_v38 = vld [vmem:[%s782_s30 + $0x1] sm:$0x1] }
 0x2c7   : >>> { %1524 = vst [vmem:[%s781_s29 + $0x1] sm:$0x1] %v794_v37  ;;  %v802_v39 = vsel %vm801_vm15, %v1523_v27, %v1525_v38  ;;  %464 = sbr.rel (!%p462_p9) target bundleno = 279 (0x117), region = 462 }
 0x2c8   : >>> { %804 = vst [vmem:[%s782_s30] sm:$0x3] %v802_v39 }
 0x2c9   : >>> { %v818_v40 = vld [vmem:[%s806_s21] ss:$0 sm:$0xff]  ;;  %v1529_v41 = vld [vmem:[%s806_s21 + $0x1] sm:$0x1] }
 0x2ca   : >>> { %1528 = vst [vmem:[%s805_s16 + $0x1] sm:$0x1] %v818_v40  ;;  %v826_v42 = vsel %vm801_vm15, %v1527_v34, %v1529_v41 }
 0x2cb   : >>> { %828 = vst [vmem:[%s806_s21] sm:$0x3] %v826_v42 }
 0x2ce   : >> { %v376_v43 = vld [vmem:[%s370_s26] sm:$0x3] }
 0x2cf   : >> { %v377_v45 = vsel %vm1391_vm2, %v376_v43, 0.0  ;;  %v412_v47 = vld [vmem:[%s406_s22] sm:$0x3] }
 0x2d0   : >> { %v378_v49 = vmul.f32 %v377_v45, %v377_v45  ;;  %v413_v51 = vsel %vm1391_vm2, %v412_v47, 0.0 }
 0x2d1   : >> { %v395_v44 = vld [vmem:[%s389_s11] sm:$0x3]  ;;  %v414_v53 = vmul.f32 %v413_v51, %v413_v51 }
 0x2d2   : >> { %v396_v46 = vsel %vm1391_vm2, %v395_v44, 0.0  ;;  %v429_v48 = vld [vmem:[%s423_s14] sm:$0x3]  ;;  %v382_v56 = vsel %vm381_vm7, 0.0, %v378_v49 }
 0x2d3   : >> { %v397_v50 = vmul.f32 %v396_v46, %v396_v46  ;;  %v430_v52 = vsel %vm1391_vm2, %v429_v48, 0.0 }
 0x2d4   : >> { %v431_v55 = vmul.f32 %v430_v52, %v430_v52 }
 0x2d5   : >> { %v399_v54 = vadd.f32 %v397_v50, %v378_v49  ;;  %v398_v57 = vadd.f32 %v397_v50, %v382_v56 }
 0x2d6   : >> { %v435_v60 = vsel %vm434_vm8, 0.0, %v431_v55 }
 0x2d7   : >> { %v416_v58 = vadd.f32 %v414_v53, %v399_v54  ;;  %v415_v59 = vadd.f32 %v414_v53, %v398_v57 }
 0x2d9   : >> { %v437_v61 = vadd.f32 %v431_v55, %v416_v58  ;;  %v436_v62 = vadd.f32 %v435_v60, %v415_v59 }
 0x2db   : >> { %438 = vadd.xlane.f32.xlu0 %v437_v61 }
 0x2df   : >> { %446 = vadd.xlane.f32.xlu0 %v436_v62 }
 0x368   : >> { %v439_v63 = vpop.xlane.xlu0 %438 }
 0x369   : >> { %v440_v0 = vrot.slane %v439_v63, 4 }
 0x36b   : >> { %v441_v1 = vadd.f32 %v440_v0, %v439_v63 }
 0x36c   : >> { %v447_v2 = vpop.xlane.xlu0 %446 }
 0x36d   : >> { %v442_v3 = vrot.slane %v441_v1, 2  ;;  %v448_v4 = vrot.slane %v447_v2, 4 }
 0x36f   : >> { %v449_v5 = vadd.f32 %v448_v4, %v447_v2  ;;  %v443_v8 = vadd.f32 %v442_v3, %v441_v1 }
 0x371   : >> { %v450_v9 = vrot.slane %v449_v5, 2  ;;  %v444_v11 = vrot.slane %v443_v8, 1 }
 0x373   : >> { %v451_v10 = vadd.f32 %v450_v9, %v449_v5  ;;  %v445_v14 = vadd.f32 %v444_v11, %v443_v8 }
 0x375   : >> { %v452_v12 = vrot.slane %v451_v10, 1 }
 0x377   : >> { %v453_v13 = vadd.f32 %v452_v12, %v451_v10 }
 0x379   : >> { %1556 = vpush %v453_v13 }
 0x37a   : >> { %1558 = vpush %v445_v14 }
 0x3aa   : >> { %s1557_s20 = spop %1556 }
 0x3ab   : >> { %s1559_s15 = spop %1558 }
 0x3ac   : >> { %s456_s24 = smul.f32 1e-10, %s1559_s15 }
 0x3ae   : >> { %p457_p11 = scmp.le.f32.partialorder %s1557_s20, %s456_s24 }
 0x3b0   : >> { %p459_p12 = por %p458_p10, %p457_p11 }
 0x3b2   : > { %907 = sbr.rel (!%p459_p12) target bundleno = 278 (0x116), region = 473 }
 0x3b9 PF: > { %s912_s23 = smov [#allocation20]  ;;  %v916_v6 = vmov %v1761_v6  ;;  %v919_v7 = vmov %v1763_v7  ;;  %v967_v15 = vld [vmem:[#allocation12] sm:$0x3]  ;;  %v973_v16 = vld [vmem:[#allocation14] sm:$0x3]  ;;  %s2043_s17 = scalar_lea.vmem [#allocation13], %s1757_s28 }
 0x3ba   : > { %v936_v6 = vmov %v1761_v6  ;;  %v939_v7 = vmov %v1763_v7  ;;  %v920_v17 = vld [vmem:[%s912_s23] sm:$0x3]  ;;  %vm923_vm9 = vcmp.eq.s32.totalorder %v919_v7, %v916_v6  ;;  %969 = vst [vmem:[%s2043_s17] sm:$0x3] %v967_v15  ;;  %s2044_s27 = scalar_lea.vmem [#allocation15], %s1757_s28  ;;  %s932_s29 = smov [#allocation23] }
 0x3bb   : > { %vm943_vm10 = vcmp.eq.s32.totalorder %v939_v7, %v936_v6  ;;  %975 = vst [vmem:[%s2044_s27] sm:$0x3] %v973_v16  ;;  %v979_v18 = vld [vmem:[#allocation16] sm:$0x3]  ;;  %v924_v19 = vsel %vm923_vm9, %v920_v17, 0.0  ;;  %s2045_s16 = scalar_lea.vmem [#allocation17], %s1757_s28  ;;  %s2046_s30 = scalar_lea.vmem [#allocation19], %s1757_s28 }
 0x3bc   : > { %981 = vst [vmem:[%s2045_s16] sm:$0x3] %v979_v18  ;;  %v985_v20 = vld [vmem:[#allocation18] sm:$0x3]  ;;  %v925_v21 = vrot.slane %v924_v19, 4  ;;  %v940_v22 = vld [vmem:[%s932_s29] sm:$0x3] }
 0x3bd   : > { %987 = vst [vmem:[%s2046_s30] sm:$0x3] %v985_v20  ;;  %v944_v23 = vsel %vm943_vm10, %v940_v22, 0.0  ;;  %s908_s21 = sand.u32 7, %s1720_s12   ;;  %s2047_s11 = scalar_lea.vmem [#allocation9], %s1759_s18 }
 0x3be   : > { %v926_v24 = vadd.f32 %v925_v21, %v924_v19  ;;  %v945_v25 = vrot.slane %v944_v23, 4  ;;  %s909_s25 = scalar_lea.vmem [#allocation8], %s908_s21  ;;  %s911_s26 = scalar_lea.vmem [#allocation10], %s908_s21 }
 0x3bf   : > { %s913_s25 = smov %s909_s25  ;;  %s933_s26 = smov %s911_s26 }
 0x3c0   : > { %v927_v26 = vrot.slane %v926_v24, 2  ;;  %v946_v6 = vadd.f32 %v945_v25, %v944_v23  ;;  %s2048_s22 = scalar_lea.vmem [#allocation11], %s1759_s18  ;;  %s1015_s14 = sshrl.u32 (%p1734_p3), %s1720_s12, 3 }
 0x3c1   : > { %s2049_s20 = scalar_lea.vmem (%p1734_p3), [#allocation9], %s1759_s18  ;;  %s1544_s15 = sshll.u32 (%p1734_p3), %s1015_s14, 1 }
 0x3c2   : > { %v928_v7 = vadd.f32 %v927_v26, %v926_v24  ;;  %v947_v27 = vrot.slane %v946_v6, 2  ;;  %s1017_s17 = scalar_lea.vmem (%p1734_p3), %s2034_s4, %s1544_s15 }
 0x3c4   : > { %v929_v28 = vrot.slane %v928_v7, 1  ;;  %v948_v29 = vadd.f32 %v947_v27, %v946_v6 }
 0x3c6   : > { %v930_v30 = vadd.f32 %v929_v28, %v928_v7  ;;  %v949_v31 = vrot.slane %v948_v29, 1 }
 0x3c8   : > { %931 = vst [vmem:[%s913_s25] sm:$0x1] %v930_v30  ;;  %v950_v32 = vadd.f32 %v949_v31, %v948_v29 }
 0x3ca   : > { %951 = vst [vmem:[%s933_s26] sm:$0x1] %v950_v32 }
 0x3cc   : > { %1014 = sbr.rel (!%p1734_p3) target bundleno = 985 (0x3d9), region = 158 }
 0x3cf   : > { %v955_v33 = vld [vmem:[#allocation8] sm:$0x3] }
 0x3d0   : > { %957 = vst [vmem:[%s2047_s11] sm:$0x3] %v955_v33 }
 0x3d1   : > { %v961_v34 = vld [vmem:[#allocation10] sm:$0x3] }
 0x3d2   : > { %963 = vst [vmem:[%s2048_s22] sm:$0x3] %v961_v34 }
 0x3d7   : > { %v1033_v35 = vld [vmem:[%s2049_s20] sm:$0x3] }
 0x3d8   : > { %1034 = vst [vmem:[%s1017_s17] sm:$0x3] %v1033_v35 }
 0x3d9 PF: > { %1051 = sbr.rel (!%p1734_p3) target bundleno = 993 (0x3e1), region = 192  ;;  %s1052_s27 = sshrl.u32 (%p1734_p3), %s1720_s12, 3 }
 0x3da   : > { %s2050_s29 = scalar_lea.vmem (%p1734_p3), [#allocation11], %s1759_s18  ;;  %s1545_s16 = sshll.u32 (%p1734_p3), %s1052_s27, 1 }
 0x3db   : > { %s1054_s25 = scalar_lea.vmem (%p1734_p3), %s2035_s5, %s1545_s16 }
 0x3df   : > { %v1070_v36 = vld [vmem:[%s2050_s29] sm:$0x3] (%p1734_p3) }
 0x3e0   : > { %1071 = vst [vmem:[%s1054_s25] sm:$0x3] %v1070_v36 }
 0x3e1 PF: > { %s1546_s26 = sshll.u32 %s1720_s12, 1  ;;  %s2051_s19 = scalar_lea.vmem [#allocation13], %s1757_s28 }
 0x3e2   : > { %v1103_v37 = vld [vmem:[%s2051_s19] sm:$0x3]  ;;  %s2052_s11 = scalar_lea.vmem [#allocation15], %s1757_s28  ;;  %s1087_s14 = scalar_lea.vmem %s2036_s6, %s1546_s26 }
 0x3e3   : > { %v1136_v38 = vld [vmem:[%s2052_s11] sm:$0x3]  ;;  %s1120_s24 = scalar_lea.vmem %s2037_s7, %s1546_s26  ;;  %s2053_s23 = scalar_lea.vmem [#allocation17], %s1757_s28  ;;  %1104 = vst [vmem:[%s1087_s14] sm:$0x3] %v1103_v37 }
 0x3e4   : > { %v1169_v39 = vld [vmem:[%s2053_s23] sm:$0x3]  ;;  %s2054_s17 = scalar_lea.vmem [#allocation19], %s1757_s28  ;;  %1137 = vst [vmem:[%s1120_s24] sm:$0x3] %v1136_v38  ;;  %s1153_s29 = scalar_lea.vmem %s2038_s8, %s1546_s26 }
 0x3e5   : > { %v1202_v40 = vld [vmem:[%s2054_s17] sm:$0x3]  ;;  %s1186_s21 = scalar_lea.vmem %s2039_s9, %s1546_s26  ;;  %1170 = vst [vmem:[%s1153_s29] sm:$0x3] %v1169_v39 }
 0x3e6   : > { %1203 = vst [vmem:[%s1186_s21] sm:$0x3] %v1202_v40 }
 0x3e7 PF: > { %s2055_s25 = sld [smem:[#allocation33_spill]]  ;;  %p13_p13 = scmp.ge.s32.totalorder %s1723_s13, 4  }
 0x3e8   : > { %s2056_s30 = smov %s1637_s10  ;;  %s2058_s11 = smov %s1723_s13 }
 0x3e9   :  { %15 = sbr.rel (!%p13_p13) target bundleno = 2 (0x2), region = 484 }
 0x3ed   : > { %s2057_s10 = smov %s2055_s25 }

// kernel: reverse
= control target key start
LH: loop header
LB: loop body
LE: loop exit
PB: predicated region body
PF: predicated region fallthrough
CT: control target
= control target key end

     0   :  { %v2_v0 = vlaneseq  ;;  %s105_s0 = inlined_call_operand.vmem [shape: f32[2,3], index: 0, kind: input, shape index: {}]   ;;  %s106_s1 = inlined_call_operand.vmem [shape: f32[2,3], index: 1, kind: output, shape index: {}]  }
   0x2   :  { %v3_v1 = vsub.s32 2, %v2_v0 }
   0x4   :  { %4 = vset.pattern.permute.xlu0 %v3_v1 }
   0x5   :  { %v20_v2 = vld [vmem:[%s105_s0] sm:$0x3] }
   0x6   :  { %21 = vst [vmem:[#allocation1] sm:$0x3] %v20_v2 }
   0xd   :  { %v38_v3 = vld [vmem:[#allocation1] sm:$0x3] }
   0xe   :  { %39 = vst [vmem:[#allocation0] sm:$0x3] %v38_v3 }
  0x15   :  { %v40_v4 = vld [vmem:[#allocation0] sm:$0xff] }
  0x16   :  { %41 = vperm.xlu0 %4, %v40_v4  }
  0x95   :  { %v42_v5 = vpop.permute.xlu0 %41 }
  0x96   :  { %43 = vst [vmem:[#allocation2] sm:$0xff] %v42_v5 }
  0x9d   :  { %v47_v6 = vld [vmem:[#allocation2] sm:$0x3] }
  0x9e   :  { %49 = vst [vmem:[#allocation3] sm:$0x3] %v47_v6 }
  0xa5   :  { %v65_v7 = vld [vmem:[#allocation3] sm:$0x3] }
  0xa6   :  { %66 = vst [vmem:[%s106_s1] sm:$0x3] %v65_v7 }

// kernel: custom-call.16
= control target key start
LH: loop header
LB: loop body
LE: loop exit
PB: predicated region body
PF: predicated region fallthrough
CT: control target
= control target key end

     0   :  { %s653_s9 = smov 0   ;;  %s655_s10 = smov 0   ;;  %s799_s0 = inlined_call_operand.vmem [shape: f32[2,3,3], index: 0, kind: input, shape index: {}]   ;;  %s800_s1 = inlined_call_operand.vmem [shape: f32[2,3,3], index: 1, kind: output, shape index: {0}]   ;;  %s801_s2 = inlined_call_operand.vmem [shape: f32[2,3], index: 2, kind: output, shape index: {1}]  }
   0x1   :  { %s657_s11 = smov 0   ;;  %s659_s12 = smov 0  }
   0x2   :  { %s661_s13 = smov 0  }
   0x3 LB: > { %s28_s14 = sadd.s32 1, %s626_s12  ;;  %s508_s15 = sadd.s32 4294967295, %s630_s13   ;;  %s630_s13 = sphi %s661_s13, %s9_s13   ;;  %s626_s12 = sphi %s659_s12, %s808_s12   ;;  %s622_s11 = sphi %s657_s11, %s807_s11   ;;  %s618_s10 = sphi %s655_s10, %s806_s10   ;;  %s614_s9 = sphi %s653_s9, %s805_s9  }
   0x4   : > { %p30_p0 = scmp.ge.s32.totalorder %s28_s14, 2  ;;  %s33_s16 = ssub.s32 0, %s626_s12 }
   0x5   : > { %s510_s17 = smin.u32 %s626_s12, %s33_s16  ;;  %p57_p1 = scmp.ne.s32.totalorder %s618_s10, %s614_s9 }
   0x6   : > { %s810_s14 = smov (%p30_p0, %s28_s14), 0  ;;  %s35_s18 = sshrl.u32 %s510_s17, 3 }
   0x7   : > { %s39_s19 = ssub.s32 0, %s810_s14  ;;  %p58_p2 = scmp.eq.s32.totalorder %s508_s15, 1 }
   0x8   : > { %s511_s20 = smin.u32 %s39_s19, %s810_s14  ;;  %s47_s24 = sadd.s32 1, %s618_s10 }
   0x9   : > { %s41_s21 = sshrl.u32 %s511_s20, 3  ;;  %p688_p3 = por %p58_p2, %p57_p1 }
   0xa   : > { %s44_s23 = ssub.s32 %s35_s18, %s41_s21  ;;  %p513_p5 = scmp.ge.s32.totalorder %s630_s13, 2 }
   0xb   : > { %p45_p4 = scmp.eq.s32.totalorder %s44_s23, 0  ;;  %s82_s26 = sand.u32 (!%p513_p5), 1, %s630_s13  }
   0xc   : > { %80 = sbr.rel (%p513_p5) target bundleno = 19 (0x13), region = 16  ;;  %s515_s27 = sshll.u32 (!%p513_p5), %s626_s12, 2 }
   0xd   : > { %s694_s25 = scalar_select %p45_p4, %s618_s10, %s47_s24  }
   0xe   : > { %s514_s28 = sshll.u32 (!%p513_p5), %s82_s26, 2  ;;  %s88_s3 = scalar_lea.vmem (!%p513_p5), %s799_s0, %s515_s27 }
   0xf   : > { %v104_v0 = vld [vmem:[%s88_s3] sm:$0xf] (!%p513_p5)  ;;  %s84_s4 = scalar_lea.vmem (!%p513_p5), [#allocation1], %s514_s28 }
  0x10   : > { %105 = vst [vmem:[%s84_s4] sm:$0xf] (!%p513_p5), %v104_v0 }
  0x13 PF: > { %p516_p6 = scmp.ge.s32.totalorder %s630_s13, 1  ;;  %p121_p7 = scmp.lt.s32.totalorder %s630_s13, 3 }
  0x15   : > { %p122_p8 = pnand %p516_p6, %p121_p7 }
  0x17   : > { %125 = sbr.rel (%p122_p8) target bundleno = 346 (0x15a), region = 50 }
  0x1e   : > { %s132_s5 = sand.u32 1, %s508_s15   ;;  %s142_s6 = sand.u32 1, %s614_s9   ;;  %v636_v2 = vmov 0.0  }
  0x1f   : > { %s517_s7 = sshll.u32 %s132_s5, 2  ;;  %s705_s8 = sshll.u32 %s142_s6, 1 }
  0x20   : > { %s134_s16 = scalar_lea.vmem [#allocation1], %s517_s7  ;;  %s155_s17 = sand.u32 7, %s622_s11  }
  0x21   : > { %v147_v1 = vld [vmem:[%s134_s16] sm:$0xf]  ;;  %s708_s18 = scalar_lea.vmem [#allocation4], %s155_s17  ;;  %s711_s19 = scalar_lea.vmem [#allocation3], %s517_s7 }
  0x22   : > { %148 = vst [vmem:[#allocation0] sm:$0xf] %v147_v1  ;;  %159 = vst [vmem:[%s708_s18] sm:$0x1] %v636_v2  ;;  %s144_s15 = scalar_lea.vmem [#allocation5], %s705_s8  ;;  %s714_s20 = smov 0  }
  0x29   : > { %v157_v3 = vld [vmem:[#allocation0] sm:$0xff] }
  0x2a   : > { %158 = vst [vmem:[#allocation2] sm:$0xff] %v157_v3 }
  0x2b LB: >> { %v167_v4 = vlaneseq  ;;  %v723_v6 = vstv %s634_s20  ;;  %s194_s9 = scalar_lea.vmem [#allocation2], %s634_s20  ;;  %s230_s21 = smov [#allocation2]  ;;  %v637_v60 = vmov 1.0   ;;  %v265_v61 = vld [vmem:[%s708_s18] ss:$0 sm:$0xff]  ;;  %s634_s20 = sphi %s714_s20, %s165_s20  }
  0x2c   : >> { %s252_s23 = scalar_lea.vmem [#allocation6], %s634_s20  ;;  %s268_s24 = smov [#allocation2] }
  0x2d   : >> { %v720_v5 = vshrl.u32 %v167_v4, 7  ;;  %v246_v49 = vand.u32 127, %v167_v4  ;;  %s269_s26 = smov [#allocation6] }
  0x2f   : >> { %vm171_vm0 = vcmp.gt.s32.totalorder %v720_v5, %v723_v6  ;;  %vm172_vm1 = vcmp.lt.s32.totalorder %v720_v5, 3  ;;  %v233_v5 = vmov %v720_v5  ;;  %vm738_vm12 = vcmp.eq.s32.totalorder %v246_v49, %v723_v6 }
  0x30   : >> { %vm173_vm2 = vmand %vm171_vm0, %vm172_vm1  ;;  %vm237_vm9 = vcmp.gt.s32.totalorder %v233_v5, %v723_v6  ;;  %vm238_vm10 = vcmp.lt.s32.totalorder %v233_v5, 3  ;;  %v272_v5 = vmov %v720_v5  ;;  %vm298_vm15 = vcmp.gt.s32.totalorder %v246_v49, %v723_v6 }
  0x31   : >> { %v166_v7 = vld [vmem:[#allocation2] sm:$0xff]  ;;  %v195_v16 = vld [vmem:[%s194_s9] ss:$0 sm:$0xff]  ;;  %vm239_vm11 = vmand %vm237_vm9, %vm238_vm10  ;;  %vm277_vm13 = vcmp.lt.s32.totalorder %v272_v5, 3  ;;  %v289_v5 = vmov %v720_v5 }
  0x32   : >> { %v174_v8 = vsel %vm173_vm2, %v166_v7, 0.0  ;;  %v196_v17 = vand.u32 2147483647, %v195_v16  ;;  %vm221_vm8 = vcmp.lt.f32.partialorder %v195_v16, 0.0  ;;  %v234_v46 = vld [vmem:[%s230_s21] sm:$0xff]  ;;  %vm306_vm14 = vcmp.ge.s32.totalorder %v289_v5, %v723_v6 }
  0x33   : >> { %v175_v9 = vmul.f32 %v174_v8, %v174_v8  ;;  %v240_v50 = vsel %vm239_vm11, %v234_v46, 0.0  ;;  %v275_v0 = vld [vmem:[%s268_s24] sm:$0xff]  ;;  %s285_s24 = smov %s268_s24  ;;  %vm307_vm0 = vmand %vm738_vm12, %vm306_vm14 }
  0x34   : >> { %v197_v22 = vmax.f32 %v196_v17, 0.0  ;;  %s310_s27 = scalar_lea.vmem %s285_s24, %s634_s20  ;;  %s165_s20 = sadd.s32 1, %s634_s20  }
  0x35   : >> { %v176_v10 = vrot.slane %v175_v9, 4  ;;  %p162_p9 = scmp.ge.s32.totalorder %s165_s20, 3  }
  0x36   : > { %s523_s28 = sshll.u32 (%p162_p9), %s622_s11, 2 }
  0x37   : >> { %v177_v11 = vadd.f32 %v176_v10, %v175_v9  ;;  %s341_s3 = scalar_lea.vmem (%p162_p9), %s800_s1, %s523_s28 }
  0x39   : >> { %v178_v12 = vrot.slane %v177_v11, 2 }
  0x3b   : >> { %v179_v13 = vadd.f32 %v178_v12, %v177_v11 }
  0x3d   : >> { %v180_v14 = vrot.slane %v179_v13, 1 }
  0x3f   : >> { %v181_v15 = vadd.f32 %v180_v14, %v179_v13  ;;  %v296_v14 = vld [vmem:[%s285_s24] sm:$0xff] }
  0x41   : >> { %578 = vrsqrt.f32 %v181_v15  ;;  %vm184_vm3 = vcmp.eq.f32.partialorder %v181_v15, inf  ;;  %v187_v19 = vand.u32 2147483648, %v181_v15  ;;  %vm186_vm4 = vcmp.eq.f32.partialorder %v181_v15, 0.0 }
  0x4b   : >> { %v579_v18 = vpop.eup %578 }
  0x4c   : >> { %v183_v20 = vmul.f32 %v579_v18, %v181_v15 }
  0x4e   : >> { %v185_v21 = vsel %vm184_vm3, %v181_v15, %v183_v20 }
  0x4f   : >> { %v188_v23 = vsel %vm186_vm4, %v187_v19, %v185_v21 }
  0x50   : >> { %v198_v24 = vand.u32 2147483647, %v188_v23 }
  0x52   : >> { %v199_v25 = vmax.f32 %v197_v22, %v198_v24 }
  0x54   : >> { %580 = vrcp.f32 %v199_v25  ;;  %vm211_vm7 = vcmp.eq.f32.partialorder %v199_v25, 0.0 }
  0x5e   : >> { %v581_v26 = vpop.eup %580 }
  0x5f   : >> { %v201_v27 = vmul.f32 %v581_v26, %v196_v17  ;;  %v204_v28 = vmul.f32 0.0, %v581_v26  ;;  %v208_v29 = vmul.f32 %v581_v26, %v198_v24 }
  0x61   : >> { %v202_v30 = vmul.f32 %v201_v27, %v201_v27  ;;  %v205_v31 = vmul.f32 %v204_v28, %v204_v28  ;;  %v209_v32 = vmul.f32 %v208_v29, %v208_v29 }
  0x63   : >> { %v206_v33 = vadd.f32 %v205_v31, %v202_v30 }
  0x65   : >> { %v210_v34 = vadd.f32 %v209_v32, %v206_v33 }
  0x67   : >> { %582 = vrsqrt.f32 %v210_v34  ;;  %vm214_vm5 = vcmp.eq.f32.partialorder %v210_v34, inf  ;;  %v217_v36 = vand.u32 2147483648, %v210_v34  ;;  %vm216_vm6 = vcmp.eq.f32.partialorder %v210_v34, 0.0 }
  0x71   : >> { %v583_v35 = vpop.eup %582 }
  0x72   : >> { %v213_v37 = vmul.f32 %v583_v35, %v210_v34 }
  0x74   : >> { %v215_v38 = vsel %vm214_vm5, %v210_v34, %v213_v37 }
  0x75   : >> { %v218_v39 = vsel %vm216_vm6, %v217_v36, %v215_v38 }
  0x76   : >> { %v219_v40 = vmul.f32 %v218_v39, %v199_v25 }
  0x78   : >> { %v220_v41 = vsel %vm211_vm7, 0.0, %v219_v40 }
  0x79   : >> { %v222_v42 = vxor.u32 2147483648, %v220_v41 }
  0x7b   : >> { %v223_v43 = vsel %vm221_vm8, %v220_v41, %v222_v42 }
  0x7c   : >> { %v731_v44 = vsel %vm186_vm4, %v195_v16, %v223_v43  ;;  %584 = vrcp.f32 %v223_v43  ;;  %v224_v47 = vsub.f32 %v223_v43, %v195_v16 }
  0x7d   : >> { %v229_v45 = vsub.f32 %v195_v16, %v731_v44 }
  0x7f   : >> { %586 = vrcp.f32 %v229_v45 }
  0x86   : >> { %v585_v48 = vpop.eup %584 }
  0x87   : >> { %v226_v51 = vmul.f32 %v585_v48, %v224_v47 }
  0x89   : >> { %v587_v52 = vpop.eup %586  ;;  %v228_v56 = vsel %vm186_vm4, 0.0, %v226_v51 }
  0x8a   : >> { %v242_v53 = vmul.f32 %v587_v52, %v240_v50  ;;  %v258_v58 = vsel %vm738_vm12, %v228_v56, 0.0 }
  0x8c   : >> { %v243_v55 = vsel %vm186_vm4, 0.0, %v242_v53 }
  0x8d   : >> { %v248_v57 = vsel %vm738_vm12, %v243_v55, 0.0 }
  0x8e   : >> { %249 = vadd.xlane.f32.xlu0 %v248_v57 }
  0x92   : >> { %259 = vadd.xlane.f32.xlu0 %v258_v58 }
 0x11b   : >> { %v250_v59 = vpop.xlane.xlu0 %249 }
 0x11c   : >> { %251 = vst [vmem:[#allocation6] sm:$0xff] %v250_v59 }
 0x11d   : >> { %253 = vst [vmem:[%s252_s23] sm:$0x1] %v637_v60 }
 0x11f   : >> { %v260_v62 = vpop.xlane.xlu0 %259 }
 0x120   : >> { %v266_v63 = vsel %vm738_vm12, %v260_v62, %v265_v61 }
 0x121   : >> { %267 = vst [vmem:[%s708_s18] sm:$0x1] %v266_v63 }
 0x124   : >> { %v274_v1 = vld [vmem:[%s269_s26] sm:$0xff]  ;;  %s286_s26 = smov %s269_s26 }
 0x125   : >> { %v276_v2 = vmul.f32 %v275_v0, %v274_v1  ;;  %v294_v13 = vld [vmem:[%s286_s26] sm:$0xff] }
 0x127   : >> { %v278_v3 = vsel %vm277_vm13, %v276_v2, 0.0 }
 0x128   : >> { %v279_v4 = vrot.slane %v278_v3, 4  ;;  %v327_v6 = vld [vmem:[#allocation4] sm:$0x3] (%p162_p9) }
 0x129   : > { %329 = vst [vmem:[%s144_s15] sm:$0x3] (%p162_p9), %v327_v6 }
 0x12a   : >> { %v280_v7 = vadd.f32 %v279_v4, %v278_v3 }
 0x12c   : >> { %v281_v8 = vrot.slane %v280_v7, 2 }
 0x12e   : >> { %v282_v9 = vadd.f32 %v281_v8, %v280_v7 }
 0x130   : >> { %v283_v10 = vrot.slane %v282_v9, 1 }
 0x132   : >> { %v284_v11 = vadd.f32 %v283_v10, %v282_v9 }
 0x134   : >> { %v290_v12 = vmul.f32 %v284_v11, %v260_v62 }
 0x136   : >> { %v295_v15 = vmul.f32 %v294_v13, %v290_v12 }
 0x138   : >> { %v299_v16 = vsub.f32 %v296_v14, %v295_v15 }
 0x13a   : >> { %v300_v17 = vsel %vm298_vm15, %v299_v16, %v296_v14 }
 0x13b   : >> { %v308_v18 = vsel %vm307_vm0, %v294_v13, %v300_v17 }
 0x13c   : >> { %309 = vst [vmem:[%s285_s24] sm:$0xff] %v308_v18 }
 0x13f   : > { %164 = sbr.rel (!%p162_p9) target bundleno = 43 (0x2b), region = 167 }
 0x143   : >> { %v311_v19 = vld [vmem:[%s310_s27] ss:$0 sm:$0xff] }
 0x144   : >> { %v316_v20 = vsel %vm738_vm12, %v731_v44, %v311_v19 }
 0x145   : >> { %317 = vst [vmem:[%s310_s27] sm:$0x1] %v316_v20 }
 0x146   : > { %p376_p10 = scmp.lt.s32.totalorder (%p688_p3), %s622_s11, 0  ;;  %s377_s4 = ssub.s32 (%p688_p3), 0, %s622_s11  ;;  %v399_v22 = vld [vmem:[%s144_s15] sm:$0x3] (%p688_p3) }
 0x147   : > { %s524_s5 = smin.u32 (%p688_p3), %s622_s11, %s377_s4 }
 0x148   : > { %s379_s6 = sshrl.u32 (%p688_p3), %s524_s5, 3 }
 0x149   : > { %s380_s7 = ssub.s32 (%p688_p3), 0, %s379_s6 }
 0x14c   : > { %v321_v5 = vld [vmem:[#allocation2] sm:$0xf] }
 0x14d   : > { %323 = vst [vmem:[%s711_s19] sm:$0xf] %v321_v5 }
 0x14f   : > { %375 = sbr.rel (!%p688_p3) target bundleno = 346 (0x15a), region = 91 }
 0x154   : > { %v357_v21 = vld [vmem:[%s711_s19] sm:$0xf] }
 0x155   : > { %358 = vst [vmem:[%s341_s3] sm:$0xf] %v357_v21 }
 0x156   : > { %s812_s7 = smov (!%p376_p10, %s380_s7), %s379_s6 }
 0x157   : > { %s525_s16 = sshll.u32 %s812_s7, 1 }
 0x158   : > { %s383_s19 = scalar_lea.vmem %s801_s2, %s525_s16 }
 0x159   : > { %400 = vst [vmem:[%s383_s19] sm:$0x3] %v399_v22 }
 0x15a PF: > { %s9_s13 = sadd.s32 1, %s630_s13   ;;  %s805_s9 = smov %s618_s10 }
 0x15b   : > { %p6_p11 = scmp.ge.s32.totalorder %s9_s13, 4   ;;  %s806_s10 = smov %s694_s25 }
 0x15c   : > { %s807_s11 = smov %s626_s12  ;;  %s808_s12 = smov %s810_s14 }
 0x15d   :  { %8 = sbr.rel (!%p6_p11) target bundleno = 3 (0x3), region = 178 }

</bundles_post_ra>
